<compile_context>
chip_gen: v6e
topology: v6e:2x2x1
jax: 0.10.0
libtpu: 0.0.40
codegen_flags: <defaults>
</compile_context>

<pallas_src>
import math
import functools

import jax
import jax.numpy as jnp
from jax.experimental import pallas as pl
from jax.experimental.pallas import tpu as pltpu


def _mhsa_kernel(x_ref, gamma_ref, beta_ref,
                 w_q_ref, b_q_ref, w_kv_ref, b_kv_ref,
                 wo_ref, bo_ref,
                 o_ref,
                 k_scr, v_scr,
                 *, num_heads: int, head_dim: int, q_tile: int, eps: float,
                 compute_dtype):
    """Fused LayerNorm + multi-head self-attention.

    Grid: (B, S // q_tile).  Per step we produce one (q_tile, E) output slab.

    x_ref:   (1, S, E)   full sequence for the current batch element
    gamma/beta: (1, E)   LayerNorm affine params
    w_q:     (E, E)      Q projection, pre-transposed, softmax scale folded in
    b_q:     (1, E)
    w_kv:    (E, 2E)     fused K+V projection, pre-transposed
    b_kv:    (1, 2E)
    wo:      (H, Dh, E)  out_proj weight, pre-transposed and split per head
    bo:      (1, E)
    o_ref:   (1, q_tile, E)
    k_scr/v_scr: (H, S, Dh) f32 VMEM scratch, filled at qi == 0, reused across q tiles.
    """
    qi = pl.program_id(1)
    E = num_heads * head_dim
    S = x_ref.shape[1]

    gamma = gamma_ref[...]
    beta = beta_ref[...]

    def layer_norm(x):
        mean = jnp.mean(x, axis=-1, keepdims=True)
        var = jnp.mean((x - mean) ** 2, axis=-1, keepdims=True)
        return (x - mean) * jax.lax.rsqrt(var + eps) * gamma + beta

    # ---- K/V for the full sequence: computed once per batch element, kept in scratch ----
    @pl.when(qi == 0)
    def _():
        xn_full = layer_norm(x_ref[0].astype(jnp.float32))                       # (S, E)
        kv = jnp.dot(xn_full.astype(compute_dtype),
                     w_kv_ref[...].astype(compute_dtype),
                     preferred_element_type=jnp.float32) + b_kv_ref[...]          # (S, 2E)
        k = kv[:, :E].reshape(S, num_heads, head_dim)
        v = kv[:, E:].reshape(S, num_heads, head_dim)
        k_scr[...] = jnp.transpose(k, (1, 0, 2))                                  # (H, S, Dh)
        v_scr[...] = jnp.transpose(v, (1, 0, 2))

    # ---- Q projection for this query tile (softmax scale pre-folded into w_q/b_q) ----
    row0 = pl.multiple_of(qi * q_tile, q_tile)
    xq = layer_norm(x_ref[0, pl.ds(row0, q_tile), :].astype(jnp.float32))         # (TQ, E)
    q = jnp.dot(xq.astype(compute_dtype), w_q_ref[...].astype(compute_dtype),
                preferred_element_type=jnp.float32) + b_q_ref[...]                # (TQ, E)
    qh = jnp.transpose(q.reshape(q_tile, num_heads, head_dim), (1, 0, 2))         # (H, TQ, Dh)

    # ---- batched (per-head) scaled dot-product attention ----
    k = k_scr[...]
    v = v_scr[...]
    s = jnp.einsum("hqd,hkd->hqk",
                   qh.astype(compute_dtype), k.astype(compute_dtype),
                   preferred_element_type=jnp.float32)                            # (H, TQ, S)
    s = s - jnp.max(s, axis=-1, keepdims=True)
    p = jnp.exp(s)
    p = p * pl.reciprocal(jnp.sum(p, axis=-1, keepdims=True), approx=True)
    oh = jnp.einsum("hqk,hkd->hqd",
                    p.astype(compute_dtype), v.astype(compute_dtype),
                    preferred_element_type=jnp.float32)                           # (H, TQ, Dh)

    # ---- out_proj fused with head merge: out = sum_h oh[h] @ Wo[h] + bo (no concat) ----
    out = jnp.broadcast_to(bo_ref[...], (q_tile, E)).astype(jnp.float32)
    for h in range(num_heads):
        out = out + jnp.dot(oh[h].astype(compute_dtype),
                            wo_ref[h].astype(compute_dtype),
                            preferred_element_type=jnp.float32)
    o_ref[0] = out.astype(o_ref.dtype)


def mhsa_block(x, params, *, num_heads: int, eps: float = 1e-5,
               q_tile: int | None = None, compute_dtype=jnp.float32):
    """x: (B, S, E).  compute_dtype=jnp.bfloat16 recommended for MXU ops on v6e/v7x."""
    B, S, E = x.shape
    assert E % num_heads == 0
    head_dim = E // num_heads
    if q_tile is None:
        q_tile = min(S, 256)
    assert S % q_tile == 0 and q_tile % 8 == 0
    nq = S // q_tile
    scale = 1.0 / math.sqrt(head_dim)

    # ---- one-time weight transforms (done in plain JAX, outside the kernel) ----
    gamma = params["ln_gamma"].reshape(1, E)
    beta = params["ln_beta"].reshape(1, E)
    w_in = params["in_proj_weight"]           # (3E, E), y = x @ W.T
    b_in = params["in_proj_bias"]             # (3E,)
    w_q = (w_in[:E] * scale).T                # (E, E)   softmax scale folded in
    b_q = (b_in[:E] * scale).reshape(1, E)
    w_kv = w_in[E:].T                         # (E, 2E)  fused K+V projection
    b_kv = b_in[E:].reshape(1, 2 * E)
    w_o = params["out_proj_weight"].T.reshape(num_heads, head_dim, E)  # (H, Dh, E)
    b_o = params["out_proj_bias"].reshape(1, E)

    kernel = functools.partial(
        _mhsa_kernel, num_heads=num_heads, head_dim=head_dim,
        q_tile=q_tile, eps=eps, compute_dtype=compute_dtype)

    const2 = lambda b, q: (0, 0)

    # TODO(synk): for very long sequences, add a KV tile axis with online softmax
    # (flash-style running max/sum) so score memory stays O(TQ * kv_tile) per head.
    return pl.pallas_call(
        kernel,
        out_shape=jax.ShapeDtypeStruct((B, S, E), x.dtype),
        grid_spec=pltpu.PrefetchScalarGridSpec(
            num_scalar_prefetch=0,
            grid=(B, nq),
            in_specs=[
                pl.BlockSpec((1, S, E), lambda b, q: (b, 0, 0)),          # x (full seq per batch)
                pl.BlockSpec((1, E), const2),                             # gamma
                pl.BlockSpec((1, E), const2),                             # beta
                pl.BlockSpec((E, E), const2),                             # w_q (scaled)
                pl.BlockSpec((1, E), const2),                             # b_q (scaled)
                pl.BlockSpec((E, 2 * E), const2),                         # w_kv (fused K+V)
                pl.BlockSpec((1, 2 * E), const2),                         # b_kv
                pl.BlockSpec((num_heads, head_dim, E),
                             lambda b, q: (0, 0, 0)),                     # w_o per head
                pl.BlockSpec((1, E), const2),                             # b_o
            ],
            out_specs=pl.BlockSpec((1, q_tile, E), lambda b, q: (b, q, 0)),
            scratch_shapes=[
                pltpu.VMEM((num_heads, S, head_dim), jnp.float32),        # K cache
                pltpu.VMEM((num_heads, S, head_dim), jnp.float32),        # V cache
            ],
        ),
        compiler_params=pltpu.CompilerParams(
            dimension_semantics=("parallel", "arbitrary"),
            vmem_limit_bytes=48 * 1024 * 1024,
        ),
    )(x, gamma, beta, w_q, b_q, w_kv, b_kv, w_o, b_o)


def _reference(x, params, *, num_heads: int, eps: float = 1e-5):
    """Pure-JAX reference matching PyTorch LayerNorm + nn.MultiheadAttention."""
    B, S, E = x.shape
    Dh = E // num_heads
    mean = jnp.mean(x, axis=-1, keepdims=True)
    var = jnp.mean((x - mean) ** 2, axis=-1, keepdims=True)
    xn = (x - mean) / jnp.sqrt(var + eps) * params["ln_gamma"] + params["ln_beta"]

    qkv = xn @ params["in_proj_weight"].T + params["in_proj_bias"]
    q, k, v = jnp.split(qkv, 3, axis=-1)

    def heads(t):  # (B,S,E) -> (B,H,S,Dh)
        return t.reshape(B, S, num_heads, Dh).transpose(0, 2, 1, 3)

    qh, kh, vh = heads(q), heads(k), heads(v)
    s = jnp.einsum("bhqd,bhkd->bhqk", qh, kh) / math.sqrt(Dh)
    p = jax.nn.softmax(s, axis=-1)
    o = jnp.einsum("bhqk,bhkd->bhqd", p, vh)
    o = o.transpose(0, 2, 1, 3).reshape(B, S, E)
    return o @ params["out_proj_weight"].T + params["out_proj_bias"]


if __name__ == "__main__":
    # Small shapes consistent with the module (E divisible by H; head_dim = 64 like ViT).
    B, S, E, H = 2, 64, 256, 4
    Q_TILE = 32  # exercises the query-tile grid axis (grid = (B, 2))

    key = jax.random.PRNGKey(0)
    kx, kg, kbt, kw, kb, ko, kob = jax.random.split(key, 7)

    x = jax.random.normal(kx, (B, S, E), dtype=jnp.float32)
    params = {
        "ln_gamma": 1.0 + 0.1 * jax.random.normal(kg, (E,), jnp.float32),
        "ln_beta": 0.05 * jax.random.normal(kbt, (E,), jnp.float32),
        "in_proj_weight": jax.random.normal(kw, (3 * E, E), jnp.float32) / math.sqrt(E),
        "in_proj_bias": 0.02 * jax.random.normal(kb, (3 * E,), jnp.float32),
        "out_proj_weight": jax.random.normal(ko, (E, E), jnp.float32) / math.sqrt(E),
        "out_proj_bias": 0.02 * jax.random.normal(kob, (E,), jnp.float32),
    }

    ref = _reference(x, params, num_heads=H)

    # f32 matmul path (tight check; approx reciprocal adds ~1e-4-level error).
    out = mhsa_block(x, params, num_heads=H, q_tile=Q_TILE)
    out = jax.block_until_ready(out)
    assert out.shape == (B, S, E)
    err = float(jnp.max(jnp.abs(out - ref)))
    assert jnp.allclose(out, ref, atol=2e-3, rtol=2e-3), err

    # bf16 MXU-operand path (recommended on v6e/v7x); looser check.
    out_bf16 = mhsa_block(x, params, num_heads=H, q_tile=Q_TILE,
                          compute_dtype=jnp.bfloat16)
    out_bf16 = jax.block_until_ready(out_bf16)
    err_bf16 = float(jnp.max(jnp.abs(out_bf16 - ref)))
    assert jnp.allclose(out_bf16, ref, atol=7e-2, rtol=7e-2), err_bf16

    print("KERNEL_OK")
</pallas_src>

<mosaic_0001>
module attributes {stable_mosaic.version = 11 : i64} {
  func.func @_mhsa_kernel(%arg0: i32, %arg1: i32, %arg2: memref<1x64x256xf32, #tpu.memory_space<vmem>>, %arg3: memref<1x256xf32, #tpu.memory_space<vmem>>, %arg4: memref<1x256xf32, #tpu.memory_space<vmem>>, %arg5: memref<256x256xf32, #tpu.memory_space<vmem>>, %arg6: memref<1x256xf32, #tpu.memory_space<vmem>>, %arg7: memref<256x512xf32, #tpu.memory_space<vmem>>, %arg8: memref<1x512xf32, #tpu.memory_space<vmem>>, %arg9: memref<4x64x256xf32, #tpu.memory_space<vmem>>, %arg10: memref<1x256xf32, #tpu.memory_space<vmem>>, %arg11: memref<1x32x256xf32, #tpu.memory_space<vmem>>, %arg12: memref<4x64x64xf32, #tpu.memory_space<vmem>>, %arg13: memref<4x64x64xf32, #tpu.memory_space<vmem>>) attributes {dimension_semantics = [#tpu.dimension_semantics<parallel>, #tpu.dimension_semantics<arbitrary>], iteration_bounds = array<i64: 2, 2>, scalar_prefetch = 0 : i64, scratch_operands = 2 : i64, tpu.core_type = #tpu.core_type<tc>, window_params = [{transform_indices = @transform_0, window_bounds = array<i64: 1, 64, 256>}, {pipeline_mode = #tpu.pipeline_mode<synchronous>, transform_indices = @transform_1, window_bounds = array<i64: 1, 256>}, {pipeline_mode = #tpu.pipeline_mode<synchronous>, transform_indices = @transform_2, window_bounds = array<i64: 1, 256>}, {pipeline_mode = #tpu.pipeline_mode<synchronous>, transform_indices = @transform_3, window_bounds = array<i64: 256, 256>}, {pipeline_mode = #tpu.pipeline_mode<synchronous>, transform_indices = @transform_4, window_bounds = array<i64: 1, 256>}, {pipeline_mode = #tpu.pipeline_mode<synchronous>, transform_indices = @transform_5, window_bounds = array<i64: 256, 512>}, {pipeline_mode = #tpu.pipeline_mode<synchronous>, transform_indices = @transform_6, window_bounds = array<i64: 1, 512>}, {pipeline_mode = #tpu.pipeline_mode<synchronous>, transform_indices = @transform_7, window_bounds = array<i64: 4, 64, 256>}, {pipeline_mode = #tpu.pipeline_mode<synchronous>, transform_indices = @transform_8, window_bounds = array<i64: 1, 256>}, {transform_indices = @transform_9, window_bounds = array<i64: 1, 32, 256>}]} {
    %c0 = arith.constant 0 : index
    %c0_0 = arith.constant 0 : index
    %0 = vector.load %arg3[%c0, %c0_0] : memref<1x256xf32, #tpu.memory_space<vmem>>, vector<1x256xf32>
    %c0_1 = arith.constant 0 : index
    %c0_2 = arith.constant 0 : index
    %1 = vector.load %arg4[%c0_1, %c0_2] : memref<1x256xf32, #tpu.memory_space<vmem>>, vector<1x256xf32>
    %c0_i32 = arith.constant 0 : i32
    %2 = arith.cmpi eq, %arg1, %c0_i32 : i32
    %3 = arith.extui %2 : i1 to i32
    %c0_i32_3 = arith.constant 0 : i32
    %4 = arith.cmpi ne, %3, %c0_i32_3 : i32
    scf.if %4 {
      %c0_43 = arith.constant 0 : index
      %c0_44 = arith.constant 0 : index
      %c0_45 = arith.constant 0 : index
      %83 = vector.load %arg2[%c0_43, %c0_44, %c0_45] : memref<1x64x256xf32, #tpu.memory_space<vmem>>, vector<1x64x256xf32>
      %84 = vector.shape_cast %83 : vector<1x64x256xf32> to vector<64x256xf32>
      %cst_46 = arith.constant dense<0.000000e+00> : vector<64xf32>
      %85 = vector.multi_reduction <add>, %84, %cst_46 [1] : vector<64x256xf32> to vector<64xf32>
      %86 = vector.shape_cast %85 : vector<64xf32> to vector<64x1xf32>
      %cst_47 = arith.constant 2.560000e+02 : f32
      %87 = vector.broadcast %cst_47 : f32 to vector<64x1xf32>
      %88 = arith.divf %86, %87 : vector<64x1xf32>
      %89 = vector.broadcast %88 : vector<64x1xf32> to vector<64x256xf32>
      %90 = arith.subf %84, %89 : vector<64x256xf32>
      %91 = arith.mulf %90, %90 : vector<64x256xf32>
      %cst_48 = arith.constant dense<0.000000e+00> : vector<64xf32>
      %92 = vector.multi_reduction <add>, %91, %cst_48 [1] : vector<64x256xf32> to vector<64xf32>
      %93 = vector.shape_cast %92 : vector<64xf32> to vector<64x1xf32>
      %cst_49 = arith.constant 2.560000e+02 : f32
      %94 = vector.broadcast %cst_49 : f32 to vector<64x1xf32>
      %95 = arith.divf %93, %94 : vector<64x1xf32>
      %96 = vector.broadcast %88 : vector<64x1xf32> to vector<64x256xf32>
      %97 = arith.subf %84, %96 : vector<64x256xf32>
      %cst_50 = arith.constant 9.99999974E-6 : f32
      %98 = vector.broadcast %cst_50 : f32 to vector<64x1xf32>
      %99 = arith.addf %95, %98 : vector<64x1xf32>
      %100 = math.rsqrt %99 : vector<64x1xf32>
      %101 = vector.broadcast %100 : vector<64x1xf32> to vector<64x256xf32>
      %102 = arith.mulf %97, %101 : vector<64x256xf32>
      %103 = vector.broadcast %0 : vector<1x256xf32> to vector<64x256xf32>
      %104 = arith.mulf %102, %103 : vector<64x256xf32>
      %105 = vector.broadcast %1 : vector<1x256xf32> to vector<64x256xf32>
      %106 = arith.addf %104, %105 : vector<64x256xf32>
      %c0_51 = arith.constant 0 : index
      %c0_52 = arith.constant 0 : index
      %107 = vector.load %arg7[%c0_51, %c0_52] : memref<256x512xf32, #tpu.memory_space<vmem>>, vector<256x512xf32>
      %cst_53 = arith.constant dense<0.000000e+00> : vector<64x512xf32>
      %108 = tpu.matmul %106, %107, %cst_53 {dimension_numbers = #tpu.dot_dimension_numbers<[1], [0], [0], [1], [0, 0, 1, 1], [], []>} : vector<64x256xf32>, vector<256x512xf32>, vector<64x512xf32> -> vector<64x512xf32>
      %c0_54 = arith.constant 0 : index
      %c0_55 = arith.constant 0 : index
      %109 = vector.load %arg8[%c0_54, %c0_55] : memref<1x512xf32, #tpu.memory_space<vmem>>, vector<1x512xf32>
      %110 = vector.broadcast %109 : vector<1x512xf32> to vector<64x512xf32>
      %111 = arith.addf %108, %110 : vector<64x512xf32>
      %112 = vector.extract_strided_slice %111 {offsets = [0, 0], sizes = [64, 256], strides = [1, 1]} : vector<64x512xf32> to vector<64x256xf32>
      %113 = vector.shape_cast %112 : vector<64x256xf32> to vector<64x4x64xf32>
      %114 = vector.extract_strided_slice %111 {offsets = [0, 256], sizes = [64, 256], strides = [1, 1]} : vector<64x512xf32> to vector<64x256xf32>
      %115 = vector.shape_cast %114 : vector<64x256xf32> to vector<64x4x64xf32>
      %116 = tpu.transpose %113, [1, 0, 2] : vector<64x4x64xf32> -> vector<4x64x64xf32>
      %c0_56 = arith.constant 0 : index
      %c0_57 = arith.constant 0 : index
      %c0_58 = arith.constant 0 : index
      %117 = vector.load %arg12[%c0_56, %c0_57, %c0_58] : memref<4x64x64xf32, #tpu.memory_space<vmem>>, vector<4x64x64xf32>
      tpu.vector_store %arg12[%c0_56, %c0_57, %c0_58], %116 {strides = array<i32>} : memref<4x64x64xf32, #tpu.memory_space<vmem>>, vector<4x64x64xf32>,
      %118 = tpu.transpose %115, [1, 0, 2] : vector<64x4x64xf32> -> vector<4x64x64xf32>
      %c0_59 = arith.constant 0 : index
      %c0_60 = arith.constant 0 : index
      %c0_61 = arith.constant 0 : index
      %119 = vector.load %arg13[%c0_59, %c0_60, %c0_61] : memref<4x64x64xf32, #tpu.memory_space<vmem>>, vector<4x64x64xf32>
      tpu.vector_store %arg13[%c0_59, %c0_60, %c0_61], %118 {strides = array<i32>} : memref<4x64x64xf32, #tpu.memory_space<vmem>>, vector<4x64x64xf32>,
    } else {
    }
    %c32_i32 = arith.constant 32 : i32
    %5 = arith.muli %arg1, %c32_i32 : i32
    %6 = tpu.assume_multiple %5, 32 : i32
    %c0_4 = arith.constant 0 : index
    %7 = arith.index_cast %6 : i32 to index
    %c0_5 = arith.constant 0 : index
    %8 = vector.load %arg2[%c0_4, %7, %c0_5] : memref<1x64x256xf32, #tpu.memory_space<vmem>>, vector<1x32x256xf32>
    %9 = vector.shape_cast %8 : vector<1x32x256xf32> to vector<32x256xf32>
    %cst = arith.constant dense<0.000000e+00> : vector<32xf32>
    %10 = vector.multi_reduction <add>, %9, %cst [1] : vector<32x256xf32> to vector<32xf32>
    %11 = vector.shape_cast %10 : vector<32xf32> to vector<32x1xf32>
    %cst_6 = arith.constant 2.560000e+02 : f32
    %12 = vector.broadcast %cst_6 : f32 to vector<32x1xf32>
    %13 = arith.divf %11, %12 : vector<32x1xf32>
    %14 = vector.broadcast %13 : vector<32x1xf32> to vector<32x256xf32>
    %15 = arith.subf %9, %14 : vector<32x256xf32>
    %16 = arith.mulf %15, %15 : vector<32x256xf32>
    %cst_7 = arith.constant dense<0.000000e+00> : vector<32xf32>
    %17 = vector.multi_reduction <add>, %16, %cst_7 [1] : vector<32x256xf32> to vector<32xf32>
    %18 = vector.shape_cast %17 : vector<32xf32> to vector<32x1xf32>
    %cst_8 = arith.constant 2.560000e+02 : f32
    %19 = vector.broadcast %cst_8 : f32 to vector<32x1xf32>
    %20 = arith.divf %18, %19 : vector<32x1xf32>
    %21 = vector.broadcast %13 : vector<32x1xf32> to vector<32x256xf32>
    %22 = arith.subf %9, %21 : vector<32x256xf32>
    %cst_9 = arith.constant 9.99999974E-6 : f32
    %23 = vector.broadcast %cst_9 : f32 to vector<32x1xf32>
    %24 = arith.addf %20, %23 : vector<32x1xf32>
    %25 = math.rsqrt %24 : vector<32x1xf32>
    %26 = vector.broadcast %25 : vector<32x1xf32> to vector<32x256xf32>
    %27 = arith.mulf %22, %26 : vector<32x256xf32>
    %28 = vector.broadcast %0 : vector<1x256xf32> to vector<32x256xf32>
    %29 = arith.mulf %27, %28 : vector<32x256xf32>
    %30 = vector.broadcast %1 : vector<1x256xf32> to vector<32x256xf32>
    %31 = arith.addf %29, %30 : vector<32x256xf32>
    %c0_10 = arith.constant 0 : index
    %c0_11 = arith.constant 0 : index
    %32 = vector.load %arg5[%c0_10, %c0_11] : memref<256x256xf32, #tpu.memory_space<vmem>>, vector<256x256xf32>
    %cst_12 = arith.constant dense<0.000000e+00> : vector<32x256xf32>
    %33 = tpu.matmul %31, %32, %cst_12 {dimension_numbers = #tpu.dot_dimension_numbers<[1], [0], [0], [1], [0, 0, 1, 1], [], []>} : vector<32x256xf32>, vector<256x256xf32>, vector<32x256xf32> -> vector<32x256xf32>
    %c0_13 = arith.constant 0 : index
    %c0_14 = arith.constant 0 : index
    %34 = vector.load %arg6[%c0_13, %c0_14] : memref<1x256xf32, #tpu.memory_space<vmem>>, vector<1x256xf32>
    %35 = vector.broadcast %34 : vector<1x256xf32> to vector<32x256xf32>
    %36 = arith.addf %33, %35 : vector<32x256xf32>
    %37 = vector.shape_cast %36 : vector<32x256xf32> to vector<32x4x64xf32>
    %38 = tpu.transpose %37, [1, 0, 2] : vector<32x4x64xf32> -> vector<4x32x64xf32>
    %c0_15 = arith.constant 0 : index
    %c0_16 = arith.constant 0 : index
    %c0_17 = arith.constant 0 : index
    %39 = vector.load %arg12[%c0_15, %c0_16, %c0_17] : memref<4x64x64xf32, #tpu.memory_space<vmem>>, vector<4x64x64xf32>
    %c0_18 = arith.constant 0 : index
    %c0_19 = arith.constant 0 : index
    %c0_20 = arith.constant 0 : index
    %40 = vector.load %arg13[%c0_18, %c0_19, %c0_20] : memref<4x64x64xf32, #tpu.memory_space<vmem>>, vector<4x64x64xf32>
    "tpu.trace_start"() <{level = 10 : i32, message = "hqd,hkd->hqk"}> : () -> ()
    %cst_21 = arith.constant dense<0.000000e+00> : vector<4x32x64xf32>
    %41 = tpu.matmul %38, %39, %cst_21 {dimension_numbers = #tpu.dot_dimension_numbers<[2], [2], [1], [1], [0, 0, 0, 1, 1, 1], [0], [0]>} : vector<4x32x64xf32>, vector<4x64x64xf32>, vector<4x32x64xf32> -> vector<4x32x64xf32>
    "tpu.trace_stop"() : () -> ()
    %cst_22 = arith.constant dense<0xFF800000> : vector<4x32xf32>
    %42 = vector.multi_reduction <maximumf>, %41, %cst_22 [2] : vector<4x32x64xf32> to vector<4x32xf32>
    %43 = vector.shape_cast %42 : vector<4x32xf32> to vector<4x32x1xf32>
    %44 = vector.broadcast %43 : vector<4x32x1xf32> to vector<4x32x64xf32>
    %45 = arith.subf %41, %44 : vector<4x32x64xf32>
    %46 = math.exp %45 : vector<4x32x64xf32>
    %cst_23 = arith.constant dense<0.000000e+00> : vector<4x32xf32>
    %47 = vector.multi_reduction <add>, %46, %cst_23 [2] : vector<4x32x64xf32> to vector<4x32xf32>
    %48 = vector.shape_cast %47 : vector<4x32xf32> to vector<4x32x1xf32>
    %49 = tpu.reciprocal %48 {approx = true} : vector<4x32x1xf32> -> vector<4x32x1xf32>
    %50 = vector.broadcast %49 : vector<4x32x1xf32> to vector<4x32x64xf32>
    %51 = arith.mulf %46, %50 : vector<4x32x64xf32>
    "tpu.trace_start"() <{level = 10 : i32, message = "hqk,hkd->hqd"}> : () -> ()
    %cst_24 = arith.constant dense<0.000000e+00> : vector<4x32x64xf32>
    %52 = tpu.matmul %51, %40, %cst_24 {dimension_numbers = #tpu.dot_dimension_numbers<[2], [1], [1], [2], [0, 0, 0, 1, 1, 2], [0], [0]>} : vector<4x32x64xf32>, vector<4x64x64xf32>, vector<4x32x64xf32> -> vector<4x32x64xf32>
    "tpu.trace_stop"() : () -> ()
    %c0_25 = arith.constant 0 : index
    %c0_26 = arith.constant 0 : index
    %53 = vector.load %arg10[%c0_25, %c0_26] : memref<1x256xf32, #tpu.memory_space<vmem>>, vector<1x256xf32>
    %54 = vector.shape_cast %53 : vector<1x256xf32> to vector<1x256xf32>
    %55 = vector.broadcast %54 : vector<1x256xf32> to vector<32x256xf32>
    %56 = vector.extract_strided_slice %52 {offsets = [0, 0, 0], sizes = [1, 32, 64], strides = [1, 1, 1]} : vector<4x32x64xf32> to vector<1x32x64xf32>
    %57 = vector.shape_cast %56 : vector<1x32x64xf32> to vector<32x64xf32>
    %c0_27 = arith.constant 0 : index
    %c0_28 = arith.constant 0 : index
    %c0_29 = arith.constant 0 : index
    %58 = vector.load %arg9[%c0_27, %c0_28, %c0_29] : memref<4x64x256xf32, #tpu.memory_space<vmem>>, vector<1x64x256xf32>
    %59 = vector.shape_cast %58 : vector<1x64x256xf32> to vector<64x256xf32>
    %cst_30 = arith.constant dense<0.000000e+00> : vector<32x256xf32>
    %60 = tpu.matmul %57, %59, %cst_30 {dimension_numbers = #tpu.dot_dimension_numbers<[1], [0], [0], [1], [0, 0, 1, 1], [], []>} : vector<32x64xf32>, vector<64x256xf32>, vector<32x256xf32> -> vector<32x256xf32>
    %61 = arith.addf %55, %60 : vector<32x256xf32>
    %62 = vector.extract_strided_slice %52 {offsets = [1, 0, 0], sizes = [1, 32, 64], strides = [1, 1, 1]} : vector<4x32x64xf32> to vector<1x32x64xf32>
    %63 = vector.shape_cast %62 : vector<1x32x64xf32> to vector<32x64xf32>
    %c1 = arith.constant 1 : index
    %c0_31 = arith.constant 0 : index
    %c0_32 = arith.constant 0 : index
    %64 = vector.load %arg9[%c1, %c0_31, %c0_32] : memref<4x64x256xf32, #tpu.memory_space<vmem>>, vector<1x64x256xf32>
    %65 = vector.shape_cast %64 : vector<1x64x256xf32> to vector<64x256xf32>
    %cst_33 = arith.constant dense<0.000000e+00> : vector<32x256xf32>
    %66 = tpu.matmul %63, %65, %cst_33 {dimension_numbers = #tpu.dot_dimension_numbers<[1], [0], [0], [1], [0, 0, 1, 1], [], []>} : vector<32x64xf32>, vector<64x256xf32>, vector<32x256xf32> -> vector<32x256xf32>
    %67 = arith.addf %61, %66 : vector<32x256xf32>
    %68 = vector.extract_strided_slice %52 {offsets = [2, 0, 0], sizes = [1, 32, 64], strides = [1, 1, 1]} : vector<4x32x64xf32> to vector<1x32x64xf32>
    %69 = vector.shape_cast %68 : vector<1x32x64xf32> to vector<32x64xf32>
    %c2 = arith.constant 2 : index
    %c0_34 = arith.constant 0 : index
    %c0_35 = arith.constant 0 : index
    %70 = vector.load %arg9[%c2, %c0_34, %c0_35] : memref<4x64x256xf32, #tpu.memory_space<vmem>>, vector<1x64x256xf32>
    %71 = vector.shape_cast %70 : vector<1x64x256xf32> to vector<64x256xf32>
    %cst_36 = arith.constant dense<0.000000e+00> : vector<32x256xf32>
    %72 = tpu.matmul %69, %71, %cst_36 {dimension_numbers = #tpu.dot_dimension_numbers<[1], [0], [0], [1], [0, 0, 1, 1], [], []>} : vector<32x64xf32>, vector<64x256xf32>, vector<32x256xf32> -> vector<32x256xf32>
    %73 = arith.addf %67, %72 : vector<32x256xf32>
    %74 = vector.extract_strided_slice %52 {offsets = [3, 0, 0], sizes = [1, 32, 64], strides = [1, 1, 1]} : vector<4x32x64xf32> to vector<1x32x64xf32>
    %75 = vector.shape_cast %74 : vector<1x32x64xf32> to vector<32x64xf32>
    %c3 = arith.constant 3 : index
    %c0_37 = arith.constant 0 : index
    %c0_38 = arith.constant 0 : index
    %76 = vector.load %arg9[%c3, %c0_37, %c0_38] : memref<4x64x256xf32, #tpu.memory_space<vmem>>, vector<1x64x256xf32>
    %77 = vector.shape_cast %76 : vector<1x64x256xf32> to vector<64x256xf32>
    %cst_39 = arith.constant dense<0.000000e+00> : vector<32x256xf32>
    %78 = tpu.matmul %75, %77, %cst_39 {dimension_numbers = #tpu.dot_dimension_numbers<[1], [0], [0], [1], [0, 0, 1, 1], [], []>} : vector<32x64xf32>, vector<64x256xf32>, vector<32x256xf32> -> vector<32x256xf32>
    %79 = arith.addf %73, %78 : vector<32x256xf32>
    %c0_40 = arith.constant 0 : index
    %c0_41 = arith.constant 0 : index
    %c0_42 = arith.constant 0 : index
    %80 = vector.load %arg11[%c0_40, %c0_41, %c0_42] : memref<1x32x256xf32, #tpu.memory_space<vmem>>, vector<1x32x256xf32>
    %81 = vector.shape_cast %80 : vector<1x32x256xf32> to vector<32x256xf32>
    %82 = vector.shape_cast %79 : vector<32x256xf32> to vector<1x32x256xf32>
    tpu.vector_store %arg11[%c0_40, %c0_41, %c0_42], %82 {strides = array<i32>} : memref<1x32x256xf32, #tpu.memory_space<vmem>>, vector<1x32x256xf32>,
    return
  }
  func.func @transform_0(%arg0: i32, %arg1: i32) -> (i32, i32, i32) {
    %c0_i32 = arith.constant 0 : i32
    %c0_i32_0 = arith.constant 0 : i32
    %c0_i32_1 = arith.constant 0 : i32
    return %arg0, %c0_i32, %c0_i32_0 : i32, i32, i32
  }
  func.func @transform_1(%arg0: i32, %arg1: i32) -> (i32, i32) {
    %c0_i32 = arith.constant 0 : i32
    %c0_i32_0 = arith.constant 0 : i32
    %c0_i32_1 = arith.constant 0 : i32
    return %c0_i32, %c0_i32_0 : i32, i32
  }
  func.func @transform_2(%arg0: i32, %arg1: i32) -> (i32, i32) {
    %c0_i32 = arith.constant 0 : i32
    %c0_i32_0 = arith.constant 0 : i32
    %c0_i32_1 = arith.constant 0 : i32
    return %c0_i32, %c0_i32_0 : i32, i32
  }
  func.func @transform_3(%arg0: i32, %arg1: i32) -> (i32, i32) {
    %c0_i32 = arith.constant 0 : i32
    %c0_i32_0 = arith.constant 0 : i32
    %c0_i32_1 = arith.constant 0 : i32
    return %c0_i32, %c0_i32_0 : i32, i32
  }
  func.func @transform_4(%arg0: i32, %arg1: i32) -> (i32, i32) {
    %c0_i32 = arith.constant 0 : i32
    %c0_i32_0 = arith.constant 0 : i32
    %c0_i32_1 = arith.constant 0 : i32
    return %c0_i32, %c0_i32_0 : i32, i32
  }
  func.func @transform_5(%arg0: i32, %arg1: i32) -> (i32, i32) {
    %c0_i32 = arith.constant 0 : i32
    %c0_i32_0 = arith.constant 0 : i32
    %c0_i32_1 = arith.constant 0 : i32
    return %c0_i32, %c0_i32_0 : i32, i32
  }
  func.func @transform_6(%arg0: i32, %arg1: i32) -> (i32, i32) {
    %c0_i32 = arith.constant 0 : i32
    %c0_i32_0 = arith.constant 0 : i32
    %c0_i32_1 = arith.constant 0 : i32
    return %c0_i32, %c0_i32_0 : i32, i32
  }
  func.func @transform_7(%arg0: i32, %arg1: i32) -> (i32, i32, i32) {
    %c0_i32 = arith.constant 0 : i32
    %c0_i32_0 = arith.constant 0 : i32
    %c0_i32_1 = arith.constant 0 : i32
    %c0_i32_2 = arith.constant 0 : i32
    return %c0_i32, %c0_i32_0, %c0_i32_1 : i32, i32, i32
  }
  func.func @transform_8(%arg0: i32, %arg1: i32) -> (i32, i32) {
    %c0_i32 = arith.constant 0 : i32
    %c0_i32_0 = arith.constant 0 : i32
    %c0_i32_1 = arith.constant 0 : i32
    return %c0_i32, %c0_i32_0 : i32, i32
  }
  func.func @transform_9(%arg0: i32, %arg1: i32) -> (i32, i32, i32) {
    %c0_i32 = arith.constant 0 : i32
    %c0_i32_0 = arith.constant 0 : i32
    return %arg0, %arg1, %c0_i32 : i32, i32, i32
  }
}

</mosaic_0001>

<bundles_post_ra>
// kernel: tpu_custom_call.1
= control target key start
LH: loop header
LB: loop body
LE: loop exit
PB: predicated region body
PF: predicated region fallthrough
CT: control target
= control target key end

     0   :  { %s8997_s0 = inlined_call_operand.hbm [shape: f32[2,64,256], index: 0, kind: input, shape index: {}]   ;;  %s8998_s1 = inlined_call_operand.hbm [shape: f32[1,256], index: 1, kind: input, shape index: {}]   ;;  %s8999_s2 = inlined_call_operand.vmem [shape: f32[1,256], index: 2, kind: input, shape index: {}]   ;;  %s9000_s3 = inlined_call_operand.hbm [shape: f32[256,256], index: 3, kind: input, shape index: {}]   ;;  %s9001_s4 = inlined_call_operand.hbm [shape: f32[1,256], index: 4, kind: input, shape index: {}]   ;;  %s9002_s5 = inlined_call_operand.hbm [shape: f32[256,512], index: 5, kind: input, shape index: {}]   ;;  %s9003_s6 = inlined_call_operand.vmem [shape: f32[1,512], index: 6, kind: input, shape index: {}]   ;;  %s9004_s7 = inlined_call_operand.hbm [shape: f32[4,64,256], index: 7, kind: input, shape index: {}]   ;;  %s9005_s8 = inlined_call_operand.vmem [shape: f32[1,256], index: 8, kind: input, shape index: {}]   ;;  %s9006_s9 = inlined_call_operand.hbm [shape: f32[2,64,256], index: 9, kind: output, shape index: {}]  }
   0x1   :  { %9018 = sst [smem:[#allocation27_spill]] %s8998_s1 }
   0x2   :  { %9019 = sst [smem:[#allocation28_spill]] %s9000_s3 }
   0x3   :  { %9020 = sst [smem:[#allocation29_spill]] %s9001_s4 }
   0x4   :  { %9021 = sst [smem:[#allocation30_spill]] %s9002_s5 }
   0x5   :  { %9022 = sst [smem:[#allocation31_spill]] %s9004_s7 }
   0x6   :  { %9023 = sst [smem:[#allocation32_spill]] %s9005_s8 }
   0x7   :  { %9024 = sst [smem:[#allocation33_spill]] %s9006_s9 }
   0x8   :  { %14 = vsyncpa [#allocation5], 0 }
   0x9   :  { %16 = vsyncpa [#allocation5 + $0x1], 0 }
   0xa   :  { %17 = vsyncpa [#allocation8], 0 }
   0xb   :  { %18 = vsyncpa [#allocation11], 0 }
   0xc   :  { %19 = vsyncpa [#allocation14], 0 }
   0xd   :  { %20 = vsyncpa [#allocation6], 0 }
   0xe   :  { %22 = vsyncpa [#allocation6 + $0x1], 0  ;;  %s7075_s30 = smov 0   ;;  %s7077_s10 = smov 0  }
   0xf   :  { %s7079_s11 = smov 0   ;;  %s7081_s12 = smov 0  }
  0x10   :  { %s7083_s13 = smov 0   ;;  %s7085_s14 = smov 0  }
  0x11   :  { %s7087_s15 = smov 0   ;;  %s7089_s16 = smov 0  }
  0x12   :  { %s7091_s17 = smov 0   ;;  %s7093_s18 = smov 0  }
  0x13   :  { %s7095_s19 = smov 0  }
  0x14 LB: > { %9025 = sst [smem:[#allocation21_spill]] %s6991_s16  ;;  %s6033_s20 = sadd.s32 4294967295, %s7003_s19   ;;  %s7003_s19 = sphi %s7095_s19, %s28_s19   ;;  %s6999_s18 = sphi %s7093_s18, %s9072_s18   ;;  %s6995_s17 = sphi %s7091_s17, %s9071_s17   ;;  %s6991_s16 = sphi %s7089_s16, %s9070_s16   ;;  %s6987_s15 = sphi %s7087_s15, %s9069_s15   ;;  %s6983_s14 = sphi %s7085_s14, %s9078_s14   ;;  %s6979_s13 = sphi %s7083_s13, %s9077_s13   ;;  %s6975_s12 = sphi %s7081_s12, %s9076_s12   ;;  %s6971_s11 = sphi %s7079_s11, %s9075_s11   ;;  %s6967_s10 = sphi %s7077_s10, %s9074_s10   ;;  %s6963_s30 = sphi %s7075_s30, %s9073_s30  }
  0x15   : > { %9026 = sst [smem:[#allocation22_spill]] %s6995_s17  ;;  %p6035_p0 = scmp.ge.s32.totalorder %s7003_s19, 1 }
  0x16   : > { %9027 = sst [smem:[#allocation23_spill]] %s6999_s18  ;;  %p7132_p1 = scmp.eq.s32.totalorder %s6033_s20, 0 }
  0x17   : > { %p7136_p2 = scmp.eq.s32.totalorder %s6033_s20, 3  ;;  %p267_p3 = scmp.lt.s32.totalorder %s7003_s19, 5 }
  0x18   : > { %s9028_s21 = scalar_select %p7132_p1, 1, 0 }
  0x19   : > { %s9029_s22 = scalar_select %p7136_p2, 1, 0 }
  0x1a   : > { %p7141_p4 = pnand %p6035_p0, %p267_p3  ;;  %s7005_s24 = smov [#allocation7]  }
  0x1b   : > { %s280_s25 = sshll.u32 %s7005_s24, 4  ;;  %s7006_s26 = smov [#allocation10]   ;;  %s281_s25 = int_to_ptr.vmem [resolvable:$true] %s280_s25 }
  0x1c   : > { %s9030_s23 = scalar_select %p7141_p4, 1, 0 }
  0x1d   : > { %p6483_p5 = pneg %p7141_p4  ;;  %s307_s27 = sshll.u32 %s7006_s26, 4  ;;  %s308_s27 = int_to_ptr.vmem [resolvable:$true] %s307_s27 }
  0x1e   : > { %s7007_s29 = smov [#allocation9]   ;;  %s6724_s24 = scalar_lea.vmem %s281_s25, 32 }
  0x1f   : > { %p7149_p6 = pnand %p6483_p5, %p7132_p1  ;;  %s293_s20 = sshll.u32 %s7007_s29, 4  ;;  %s7153_s20 = int_to_ptr.vmem [resolvable:$true] %s293_s20 }
  0x20   : > { %p6725_p8 = scmp.ne.s32.totalorder %s281_s25, %s6724_s24  ;;  %p6732_p11 = scmp.lt.s32.totalorder %s281_s25, %s281_s25 }
  0x21   : > { %p7157_p7 = pneg %p7149_p6  ;;  %p6733_p12 = scmp.lt.s32.totalorder %s6724_s24, %s6724_s24 }
  0x23   : > { %p6727_p9 = pnand %p6725_p8, %p7157_p7  ;;  %p6734_p13 = por %p6733_p12, %p6732_p11 }
  0x25   : > { %p6728_p10 = pneg %p6727_p9 }
  0x27   : > { %p6735_p0 = pnand %p6734_p13, %p6728_p10 }
  0x29   : > { %6738 = shalt.err (!%p6735_p0)
}
  0x2a   : > { %s9033_s1 = sld [smem:[#allocation27_spill]]  ;;  %s6750_s16 = scalar_lea.vmem %s308_s27, 32 }
  0x2b   : > { %p6751_p3 = scmp.ne.s32.totalorder %s308_s27, %s6750_s16  ;;  %p6758_p2 = scmp.lt.s32.totalorder %s308_s27, %s308_s27 }
  0x2c   : > { %p6759_p8 = scmp.lt.s32.totalorder %s6750_s16, %s6750_s16 }
  0x2d   : > { %p6753_p5 = pnand %p6751_p3, %p7157_p7 }
  0x2e   : > { %p6760_p9 = por %p6759_p8, %p6758_p2 }
  0x2f   : > { %p6754_p4 = pneg %p6753_p5 }
  0x30   : > { %6486 = dma.hbm_to_vmem [thread:$0]  (!%p7149_p6), %s9033_s1, 32, %s281_s25, [#allocation8]  }
  0x31   : > { %p6761_p1 = pnand %p6760_p9, %p6754_p4 }
  0x33   : > { %6764 = shalt.err (!%p6761_p1)
}
  0x34   : > { %s9034_s4 = sld [smem:[#allocation29_spill]]  ;;  %s6776_s25 = scalar_lea.vmem %s7153_s20, 8192 }
  0x35   : > { %p6777_p10 = scmp.ne.s32.totalorder %s7153_s20, %s6776_s25  ;;  %p6784_p13 = scmp.lt.s32.totalorder %s7153_s20, %s7153_s20 }
  0x36   : > { %p6785_p2 = scmp.lt.s32.totalorder %s6776_s25, %s6776_s25 }
  0x37   : > { %p6779_p11 = pnand %p6777_p10, %p7157_p7 }
  0x38   : > { %p6786_p4 = por %p6785_p2, %p6784_p13 }
  0x39   : > { %p6780_p12 = pneg %p6779_p11 }
  0x3a   : > { %6492 = dma.hbm_to_vmem [thread:$0]  (!%p7149_p6), %s9034_s4, 32, %s308_s27, [#allocation11]  }
  0x3b   : > { %p6787_p1 = pnand %p6786_p4, %p6780_p12 }
  0x3d   : > { %6790 = shalt.err (!%p6787_p1)
}
  0x3e   : > { %s9011_s16 = smov 256   ;;  %s9013_s8 = smov 16  }
  0x3f   : > { %s9035_s3 = sld [smem:[#allocation28_spill]]  ;;  %s7010_s29 = smov [#allocation12]  }
  0x40   : > { %s317_s24 = sshll.u32 %s7010_s29, 4  ;;  %s318_s24 = int_to_ptr.vmem [resolvable:$true] %s317_s24 }
  0x41   : > { %s6802_s25 = scalar_lea.vmem %s318_s24, 16384  ;;  %p6810_p8 = scmp.lt.s32.totalorder %s318_s24, %s318_s24 }
  0x42   : > { %p6803_p0 = scmp.ne.s32.totalorder %s318_s24, %s6802_s25  ;;  %p6811_p9 = scmp.lt.s32.totalorder %s6802_s25, %s6802_s25 }
  0x44   : > { %p6805_p3 = pnand %p6803_p0, %p7157_p7  ;;  %p6812_p10 = por %p6811_p9, %p6810_p8 }
  0x45   : > { %6489 = dma.hbm_to_vmem [thread:$0]  (!%p7149_p6), %s9035_s3, 8192, %s7153_s20, [#allocation8], %s9011_s16, %s9011_s16, %s9013_s8  }
  0x46   : > { %p6806_p5 = pneg %p6805_p3 }
  0x48   : > { %p6813_p11 = pnand %p6812_p10, %p6806_p5 }
  0x4a   : > { %6816 = shalt.err (!%p6813_p11)
}
  0x4b   : > { %s7011_s1 = smov 512   ;;  %s7012_s4 = smov 32  }
  0x4c   : > { %s9036_s5 = sld [smem:[#allocation30_spill]]  ;;  %s7013_s26 = smov [#allocation13]  }
  0x4d   : > { %s333_s29 = sshll.u32 %s7013_s26, 4  ;;  %s334_s29 = int_to_ptr.vmem [resolvable:$true] %s333_s29 }
  0x4e   : > { %s6828_s16 = scalar_lea.vmem %s334_s29, 8192  ;;  %p6836_p4 = scmp.lt.s32.totalorder %s334_s29, %s334_s29 }
  0x4f   : > { %p6829_p12 = scmp.ne.s32.totalorder %s334_s29, %s6828_s16  ;;  %p6837_p1 = scmp.lt.s32.totalorder %s6828_s16, %s6828_s16 }
  0x51   : > { %p6831_p13 = pnand %p6829_p12, %p7157_p7  ;;  %p6838_p0 = por %p6837_p1, %p6836_p4 }
  0x52   : > { %6495 = dma.hbm_to_vmem [thread:$0]  (!%p7149_p6), %s9036_s5, 16384, %s318_s24, [#allocation11], %s7011_s1, %s7011_s1, %s7012_s4  }
  0x53   : > { %p6832_p2 = pneg %p6831_p13 }
  0x55   : > { %p6839_p3 = pnand %p6838_p0, %p6832_p2 }
  0x57   : > { %6842 = shalt.err (!%p6839_p3)
}
  0x58   : > { %s9037_s25 = smov 256   ;;  %s9038_s7 = sld [smem:[#allocation31_spill]] }
  0x59   : > { %s6034_s4 = sadd.s32 4294967294, %s7003_s19   ;;  %s37_s9 = sadd.s32 1, %s6995_s17 }
  0x5a   : > { %p38_p7 = scmp.ge.s32.totalorder %s37_s9, 2  ;;  %s40_s28 = sadd.s32 1, %s6999_s18 }
  0x5b   : > { %s47_s16 = sadd.s32 1, %s6983_s14  ;;  %p54_p5 = scmp.ne.s32.totalorder %s6983_s14, %s6979_s13 }
  0x5c   : > { %s9080_s9 = smov (%p38_p7, %s37_s9), 0  ;;  %s9082_s28 = smov (!%p38_p7, %s40_s28), %s6999_s18 }
  0x5d   : > { %9039 = sst [smem:[#allocation24_spill]] %s9080_s9  ;;  %p55_p8 = scmp.eq.s32.totalorder %s7003_s19, 0 }
  0x5e   : > { %6498 = dma.hbm_to_vmem [thread:$0]  (!%p7149_p6), %s9038_s7, 8192, %s334_s29, [#allocation14], %s9037_s25, %s9037_s25, %s9013_s8  }
  0x5f   : > { %p60_p6 = scmp.ne.s32.totalorder %s6979_s13, %s6975_s12  ;;  %p42_p9 = scmp.ge.s32.totalorder %s9082_s28, 2 }
  0x60   : > { %s239_s24 = ssub.s32 %s6995_s17, %s9080_s9  ;;  %p7221_p10 = por %p55_p8, %p54_p5 }
  0x61   : > { %p9041_p11 = scmp.ne.s32.totalorder %s9028_s21, 0  ;;  %s9084_s28 = smov (%p42_p9, %s9082_s28), 0 }
  0x62   : > { %9043 = sst [smem:[#allocation25_spill]] %s9084_s28  ;;  %s243_s29 = sadd.s32 1, %s6971_s11 }
  0x63   : > { %p7227_p12 = por %p9041_p11, %p60_p6  ;;  %p253_p13 = scmp.ne.s32.totalorder %s6971_s11, %s6967_s10 }
  0x64   : > { %s44_s12 = ssub.s32 %s6999_s18, %s9084_s28  ;;  %p259_p2 = scmp.ne.s32.totalorder %s6967_s10, %s6963_s30 }
  0x65   : > { %p45_p4 = scmp.eq.s32.totalorder %s44_s12, 0  ;;  %s240_s27 = sor.u32 %s239_s24, %s44_s12 }
  0x66   : > { %p241_p1 = scmp.eq.s32.totalorder %s240_s27, 0  ;;  %p9044_p0 = scmp.ne.s32.totalorder %s9029_s22, 0 }
  0x67   : > { %s7247_s8 = scalar_select %p45_p4, %s6983_s14, %s47_s16  }
  0x68   : > { %p7242_p3 = por %p9044_p0, %p253_p13  ;;  %p260_p7 = scmp.eq.s32.totalorder %s6034_s4, 3 }
  0x69   : > { %9046 = sst [smem:[#allocation26_spill]] %s7247_s8  ;;  %p6512_p5 = scmp.lt.s32.totalorder %s7003_s19, 4 }
  0x6a   : > { %s7250_s3 = scalar_select %p241_p1, %s6971_s11, %s243_s29  }
  0x6b   : > { %s350_s5 = sand.u32 1, %s6983_s14   ;;  %s6184_s7 = sshll.u32 %s6999_s18, 11 }
  0x6c   : > { %p7255_p8 = por %p260_p7, %p259_p2  ;;  %s6042_s28 = sshll.u32 %s350_s5, 7 }
  0x6d   : > { %s360_s22 = scalar_lea.hbm %s8997_s0, %s6184_s7  ;;  %p7264_p6 = pnand %p6512_p5, %p7221_p10 }
  0x6e   : > { %s354_s16 = scalar_lea.vmem [#allocation4], %s6042_s28  ;;  %s351_s29 = scalar_lea.sflag [#allocation5], %s350_s5 }
  0x6f   : > { %s361_s4 = sshll.u32 %s354_s16, 4  ;;  %p6845_p9 = pneg %p7264_p6  ;;  %s362_s4 = int_to_ptr.vmem [resolvable:$true] %s361_s4 }
  0x70   : > { %s6856_s18 = scalar_lea.vmem %s362_s4, 2048  ;;  %s7014_s17 = smov [#allocation4]  }
  0x71   : > { %p6857_p11 = scmp.ne.s32.totalorder %s362_s4, %s6856_s18  ;;  %s6861_s8 = sshll.u32 %s7014_s17, 4  ;;  %s6862_s8 = int_to_ptr.vmem [resolvable:$false] %s6861_s8 }
  0x72   : > { %s6863_s7 = scalar_lea.vmem %s6862_s8, 4096  ;;  %p6864_p4 = scmp.lt.s32.totalorder %s362_s4, %s6862_s8 }
  0x73   : > { %p6859_p13 = pnand %p6857_p11, %p6845_p9  ;;  %p6865_p10 = scmp.lt.s32.totalorder %s6863_s7, %s6856_s18 }
  0x75   : > { %p6860_p2 = pneg %p6859_p13  ;;  %p6866_p1 = por %p6865_p10, %p6864_p4 }
  0x77   : > { %p6867_p0 = pnand %p6866_p1, %p6860_p2 }
  0x79   : > { %6870 = shalt.err (!%p6867_p0)
}
  0x7a   : > { %s9049_s28 = smov 16   ;;  %p9050_p7 = scmp.ne.s32.totalorder %s9030_s23, 0 }
  0x7b   : > { %6502 = dma.hbm_to_vmem [thread:$0]  (!%p7264_p6), %s360_s22, 2048, %s362_s4, %s351_s29, %s9037_s25, %s9037_s25, %s9049_s28  }
  0x7c   : > { %373 = sbr.rel (%p9050_p7) target bundleno = 2577 (0xa11), region = 56  ;;  %s375_s5 = sand.u32 (!%p9050_p7), 1, %s6979_s13  }
  0x7d   : > { %s6046_s17 = sshll.u32 (!%p9050_p7), %s375_s5, 7  ;;  %s376_s20 = scalar_lea.sflag (!%p9050_p7), [#allocation5], %s375_s5 }
  0x7e   : > { %s7278_s24 = scalar_lea.vmem (!%p9050_p7), [#allocation4], %s6046_s17 }
  0x81   : > { %6942 = dma.done.wait (%p7227_p12), %s376_s20, 2048  }
  0x82   : > { %6944 = vsyncadd (%p7227_p12), %s376_s20, 4294965248  ;;  %p9051_p5 = scmp.ne.s32.totalorder %s9028_s21, 0 }
  0x84   : > { %6946 = dma.done.wait (%p9051_p5), [#allocation8], 8224  }
  0x85   : > { %6948 = vsyncadd (%p9051_p5), [#allocation8], 4294959072 }
  0x86   : > { %6950 = dma.done.wait (%p9051_p5), [#allocation11], 16416  }
  0x87   : > { %6952 = vsyncadd (%p9051_p5), [#allocation11], 4294950880 }
  0x88   : > { %6954 = dma.done.wait (%p9051_p5), [#allocation14], 8192  }
  0x89   : > { %6956 = vsyncadd (%p9051_p5), [#allocation14], 4294959104  ;;  %s431_s18 = sand.u32 1, %s6967_s10   ;;  %v7299_v0 = vld [vmem:[#allocation7] sm:$0x3]  ;;  %p6053_p12 = scmp.ne.s32.totalorder %s6987_s15, 0 }
  0x8a   : > { %s6052_s23 = sshll.u32 %s431_s18, 6  ;;  %v7304_v1 = vld [vmem:[%s8999_s2] sm:$0x3]  ;;  %s7015_s22 = smov (!%p6053_p12), 64  }
  0x8b   : > { %s7306_s26 = scalar_lea.vmem [#allocation15], %s6052_s23  ;;  %440 = sbr.rel (%p6053_p12) target bundleno = 924 (0x39c), region = 84 }
  0x90   : > { %v7310_v2 = vld [vmem:[%s7278_s24] sm:$0xff]  ;;  %v7313_v3 = vld [vmem:[%s7278_s24 + $0x8] sm:$0xff]  ;;  %v7324_v7 = vld [vmem:[%s7278_s24 + $0x10] sm:$0xff]  ;;  %vm2776_vm0 = vcmask 523264  }
  0x91   : > { %v7316_v4 = vld [vmem:[%s7278_s24 + $0x20] sm:$0xff]  ;;  %v457_v5 = vadd.f32 %v7313_v3, %v7310_v2  ;;  %v7321_v6 = vld [vmem:[%s7278_s24 + $0x28] sm:$0xff]  ;;  %v7327_v8 = vld [vmem:[%s7278_s24 + $0x18] sm:$0xff] }
  0x92   : > { %v463_v9 = vadd.f32 %v7321_v6, %v7316_v4  ;;  %v7332_v10 = vld [vmem:[%s7278_s24 + $0x30] sm:$0xff]  ;;  %v7335_v11 = vld [vmem:[%s7278_s24 + $0x38] sm:$0xff]  ;;  %v460_v12 = vadd.f32 %v7327_v8, %v7324_v7  ;;  %v7342_v14 = vld [vmem:[%s7278_s24 + $0x40] sm:$0xff] }
  0x93   : > { %458 = vadd.xlane.f32.xlu0 %v457_v5  ;;  %v466_v13 = vadd.f32 %v7335_v11, %v7332_v10  ;;  %v7345_v15 = vld [vmem:[%s7278_s24 + $0x48] sm:$0xff]  ;;  %v7348_v16 = vld [vmem:[%s7278_s24 + $0x50] sm:$0xff]  ;;  %v7351_v17 = vld [vmem:[%s7278_s24 + $0x58] sm:$0xff] }
  0x94   : > { %464 = vadd.xlane.f32.xlu1 %v463_v9  ;;  %v469_v18 = vadd.f32 %v7345_v15, %v7342_v14  ;;  %v472_v19 = vadd.f32 %v7351_v17, %v7348_v16  ;;  %v7358_v20 = vld [vmem:[%s7278_s24 + $0x60] sm:$0xff]  ;;  %v7361_v21 = vld [vmem:[%s7278_s24 + $0x68] sm:$0xff]  ;;  %v7364_v22 = vld [vmem:[%s7278_s24 + $0x70] sm:$0xff] }
  0x95   : > { %v7367_v23 = vld [vmem:[%s7278_s24 + $0x78] sm:$0xff]  ;;  %v475_v24 = vadd.f32 %v7361_v21, %v7358_v20  ;;  %v701_v26 = vld [vmem:[#allocation12 + $0x1e8] sm:$0xff]  ;;  %v700_v28 = vld [vmem:[#allocation12 + $0x1e0] sm:$0xff] }
  0x96   : > { %v478_v25 = vadd.f32 %v7367_v23, %v7364_v22  ;;  %v703_v27 = vld [vmem:[#allocation12 + $0x1f8] sm:$0xff]  ;;  %790 = vmatprep.subr.mxu0 %v701_v26  ;;  %v702_v29 = vld [vmem:[#allocation12 + $0x1f0] sm:$0xff]  ;;  %v697_v30 = vld [vmem:[#allocation12 + $0x1c8] sm:$0xff] }
  0x97   : > { %461 = vadd.xlane.f32.xlu0 %v460_v12  ;;  %903 = vmatprep.subr.mxu1 %v703_v27  ;;  %v699_v31 = vld [vmem:[#allocation12 + $0x1d8] sm:$0xff]  ;;  %v696_v32 = vld [vmem:[#allocation12 + $0x1c0] sm:$0xff]  ;;  %v698_v33 = vld [vmem:[#allocation12 + $0x1d0] sm:$0xff] }
  0x98   : > { %467 = vadd.xlane.f32.xlu1 %v466_v13  ;;  %791 = vmatpush1.msra.mxu0 %v700_v28  ;;  %v693_v34 = vld [vmem:[#allocation12 + $0x1a8] sm:$0xff]  ;;  %v695_v35 = vld [vmem:[#allocation12 + $0x1b8] sm:$0xff]  ;;  %v692_v36 = vld [vmem:[#allocation12 + $0x1a0] sm:$0xff] }
  0x99   : > { %904 = vmatpush1.msra.mxu1 %v702_v29  ;;  %792 = vmatprep.subr.mxu0 %v697_v30  ;;  %v694_v37 = vld [vmem:[#allocation12 + $0x1b0] sm:$0xff]  ;;  %v689_v38 = vld [vmem:[#allocation12 + $0x188] sm:$0xff]  ;;  %v691_v39 = vld [vmem:[#allocation12 + $0x198] sm:$0xff] }
  0x9a   : > { %905 = vmatprep.subr.mxu1 %v699_v31  ;;  %793 = vmatpush1.msra.mxu0 %v696_v32  ;;  %v688_v40 = vld [vmem:[#allocation12 + $0x180] sm:$0xff]  ;;  %v690_v41 = vld [vmem:[#allocation12 + $0x190] sm:$0xff]  ;;  %v685_v42 = vld [vmem:[#allocation12 + $0x168] sm:$0xff] }
  0x9b   : > { %470 = vadd.xlane.f32.xlu0 %v469_v18  ;;  %906 = vmatpush1.msra.mxu1 %v698_v33  ;;  %v687_v43 = vld [vmem:[#allocation12 + $0x178] sm:$0xff]  ;;  %v684_v44 = vld [vmem:[#allocation12 + $0x160] sm:$0xff]  ;;  %v686_v45 = vld [vmem:[#allocation12 + $0x170] sm:$0xff] }
  0x9c   : > { %473 = vadd.xlane.f32.xlu1 %v472_v19  ;;  %794 = vmatprep.subr.mxu0 %v693_v34  ;;  %v681_v46 = vld [vmem:[#allocation12 + $0x148] sm:$0xff]  ;;  %v683_v47 = vld [vmem:[#allocation12 + $0x158] sm:$0xff]  ;;  %v680_v48 = vld [vmem:[#allocation12 + $0x140] sm:$0xff] }
  0x9d   : > { %907 = vmatprep.subr.mxu1 %v695_v35  ;;  %795 = vmatpush1.msra.mxu0 %v692_v36  ;;  %v682_v49 = vld [vmem:[#allocation12 + $0x150] sm:$0xff]  ;;  %v677_v50 = vld [vmem:[#allocation12 + $0x128] sm:$0xff]  ;;  %v679_v51 = vld [vmem:[#allocation12 + $0x138] sm:$0xff] }
  0x9e   : > { %908 = vmatpush1.msra.mxu1 %v694_v37  ;;  %796 = vmatprep.subr.mxu0 %v689_v38  ;;  %v676_v52 = vld [vmem:[#allocation12 + $0x120] sm:$0xff]  ;;  %v678_v53 = vld [vmem:[#allocation12 + $0x130] sm:$0xff]  ;;  %v673_v54 = vld [vmem:[#allocation12 + $0x108] sm:$0xff] }
  0x9f   : > { %476 = vadd.xlane.f32.xlu0 %v475_v24  ;;  %909 = vmatprep.subr.mxu1 %v691_v39  ;;  %v675_v55 = vld [vmem:[#allocation12 + $0x118] sm:$0xff]  ;;  %v672_v56 = vld [vmem:[#allocation12 + $0x100] sm:$0xff]  ;;  %v674_v57 = vld [vmem:[#allocation12 + $0x110] sm:$0xff] }
  0xa0   : > { %479 = vadd.xlane.f32.xlu1 %v478_v25  ;;  %797 = vmatpush1.msra.mxu0 %v688_v40  ;;  %v669_v58 = vld [vmem:[#allocation12 + $0xe8] sm:$0xff]  ;;  %v671_v59 = vld [vmem:[#allocation12 + $0xf8] sm:$0xff]  ;;  %v668_v60 = vld [vmem:[#allocation12 + $0xe0] sm:$0xff] }
  0xa1   : > { %910 = vmatpush1.msra.mxu1 %v690_v41  ;;  %798 = vmatprep.subr.mxu0 %v685_v42  ;;  %v670_v61 = vld [vmem:[#allocation12 + $0xf0] sm:$0xff]  ;;  %v665_v62 = vld [vmem:[#allocation12 + $0xc8] sm:$0xff]  ;;  %v667_v63 = vld [vmem:[#allocation12 + $0xd8] sm:$0xff] }
  0xa2   : > { %911 = vmatprep.subr.mxu1 %v687_v43  ;;  %799 = vmatpush1.msra.mxu0 %v684_v44  ;;  %v664_v5 = vld [vmem:[#allocation12 + $0xc0] sm:$0xff]  ;;  %v666_v9 = vld [vmem:[#allocation12 + $0xd0] sm:$0xff]  ;;  %v661_v12 = vld [vmem:[#allocation12 + $0xa8] sm:$0xff] }
  0xa3   : > { %912 = vmatpush1.msra.mxu1 %v686_v45  ;;  %800 = vmatprep.subr.mxu0 %v681_v46  ;;  %v663_v13 = vld [vmem:[#allocation12 + $0xb8] sm:$0xff]  ;;  %v660_v18 = vld [vmem:[#allocation12 + $0xa0] sm:$0xff]  ;;  %v662_v19 = vld [vmem:[#allocation12 + $0xb0] sm:$0xff] }
  0xa4   : > { %913 = vmatprep.subr.mxu1 %v683_v47  ;;  %801 = vmatpush1.msra.mxu0 %v680_v48  ;;  %v657_v24 = vld [vmem:[#allocation12 + $0x88] sm:$0xff]  ;;  %v659_v25 = vld [vmem:[#allocation12 + $0x98] sm:$0xff]  ;;  %v656_v26 = vld [vmem:[#allocation12 + $0x80] sm:$0xff] }
  0xa5   : > { %914 = vmatpush1.msra.mxu1 %v682_v49  ;;  %802 = vmatprep.subr.mxu0 %v677_v50  ;;  %v658_v27 = vld [vmem:[#allocation12 + $0x90] sm:$0xff]  ;;  %v653_v28 = vld [vmem:[#allocation12 + $0x68] sm:$0xff]  ;;  %v655_v29 = vld [vmem:[#allocation12 + $0x78] sm:$0xff] }
  0xa6   : > { %915 = vmatprep.subr.mxu1 %v679_v51  ;;  %803 = vmatpush1.msra.mxu0 %v676_v52  ;;  %v652_v30 = vld [vmem:[#allocation12 + $0x60] sm:$0xff]  ;;  %v654_v31 = vld [vmem:[#allocation12 + $0x70] sm:$0xff]  ;;  %v649_v32 = vld [vmem:[#allocation12 + $0x48] sm:$0xff] }
  0xa7   : > { %916 = vmatpush1.msra.mxu1 %v678_v53  ;;  %804 = vmatprep.subr.mxu0 %v673_v54  ;;  %v651_v33 = vld [vmem:[#allocation12 + $0x58] sm:$0xff]  ;;  %v648_v34 = vld [vmem:[#allocation12 + $0x40] sm:$0xff]  ;;  %v650_v35 = vld [vmem:[#allocation12 + $0x50] sm:$0xff] }
  0xa8   : > { %917 = vmatprep.subr.mxu1 %v675_v55  ;;  %805 = vmatpush1.msra.mxu0 %v672_v56  ;;  %v645_v36 = vld [vmem:[#allocation12 + $0x28] sm:$0xff]  ;;  %v647_v37 = vld [vmem:[#allocation12 + $0x38] sm:$0xff]  ;;  %v644_v38 = vld [vmem:[#allocation12 + $0x20] sm:$0xff] }
  0xa9   : > { %918 = vmatpush1.msra.mxu1 %v674_v57  ;;  %806 = vmatprep.subr.mxu0 %v669_v58  ;;  %v646_v39 = vld [vmem:[#allocation12 + $0x30] sm:$0xff]  ;;  %v641_v40 = vld [vmem:[#allocation12 + $0x8] sm:$0xff]  ;;  %v643_v41 = vld [vmem:[#allocation12 + $0x18] sm:$0xff] }
  0xaa   : > { %919 = vmatprep.subr.mxu1 %v671_v59  ;;  %807 = vmatpush1.msra.mxu0 %v668_v60  ;;  %v640_v42 = vld [vmem:[#allocation12] sm:$0xff]  ;;  %v642_v43 = vld [vmem:[#allocation12 + $0x10] sm:$0xff]  ;;  %v765_v44 = vld [vmem:[#allocation12 + $0x3e8] sm:$0xff] }
  0xab   : > { %920 = vmatpush1.msra.mxu1 %v670_v61  ;;  %808 = vmatprep.subr.mxu0 %v665_v62  ;;  %v767_v45 = vld [vmem:[#allocation12 + $0x3f8] sm:$0xff]  ;;  %v764_v46 = vld [vmem:[#allocation12 + $0x3e0] sm:$0xff]  ;;  %v766_v47 = vld [vmem:[#allocation12 + $0x3f0] sm:$0xff] }
  0xac   : > { %921 = vmatprep.subr.mxu1 %v667_v63  ;;  %809 = vmatpush1.msra.mxu0 %v664_v5  ;;  %v761_v48 = vld [vmem:[#allocation12 + $0x3c8] sm:$0xff]  ;;  %v763_v49 = vld [vmem:[#allocation12 + $0x3d8] sm:$0xff]  ;;  %v760_v50 = vld [vmem:[#allocation12 + $0x3c0] sm:$0xff] }
  0xad   : > { %922 = vmatpush1.msra.mxu1 %v666_v9  ;;  %810 = vmatprep.subr.mxu0 %v661_v12  ;;  %v762_v51 = vld [vmem:[#allocation12 + $0x3d0] sm:$0xff]  ;;  %v757_v52 = vld [vmem:[#allocation12 + $0x3a8] sm:$0xff]  ;;  %v759_v53 = vld [vmem:[#allocation12 + $0x3b8] sm:$0xff] }
  0xae   : > { %923 = vmatprep.subr.mxu1 %v663_v13  ;;  %811 = vmatpush1.msra.mxu0 %v660_v18  ;;  %v756_v54 = vld [vmem:[#allocation12 + $0x3a0] sm:$0xff]  ;;  %v758_v55 = vld [vmem:[#allocation12 + $0x3b0] sm:$0xff]  ;;  %v753_v56 = vld [vmem:[#allocation12 + $0x388] sm:$0xff] }
  0xaf   : > { %924 = vmatpush1.msra.mxu1 %v662_v19  ;;  %812 = vmatprep.subr.mxu0 %v657_v24  ;;  %v755_v57 = vld [vmem:[#allocation12 + $0x398] sm:$0xff] }
  0xb0   : > { %925 = vmatprep.subr.mxu1 %v659_v25  ;;  %813 = vmatpush1.msra.mxu0 %v656_v26 }
  0xb1   : > { %926 = vmatpush1.msra.mxu1 %v658_v27  ;;  %814 = vmatprep.subr.mxu0 %v653_v28 }
  0xb2   : > { %927 = vmatprep.subr.mxu1 %v655_v29  ;;  %815 = vmatpush1.msra.mxu0 %v652_v30 }
  0xb3   : > { %928 = vmatpush1.msra.mxu1 %v654_v31  ;;  %816 = vmatprep.subr.mxu0 %v649_v32 }
  0xb4   : > { %929 = vmatprep.subr.mxu1 %v651_v33  ;;  %817 = vmatpush1.msra.mxu0 %v648_v34 }
  0xb5   : > { %930 = vmatpush1.msra.mxu1 %v650_v35  ;;  %818 = vmatprep.subr.mxu0 %v645_v36 }
  0xb6   : > { %931 = vmatprep.subr.mxu1 %v647_v37  ;;  %819 = vmatpush1.msra.mxu0 %v644_v38 }
  0xb7   : > { %932 = vmatpush1.msra.mxu1 %v646_v39  ;;  %820 = vmatprep.subr.mxu0 %v641_v40 }
  0xb8   : > { %933 = vmatprep.subr.mxu1 %v643_v41  ;;  %821 = vmatpush1.msra.mxu0 %v640_v42 }
  0xb9   : > { %934 = vmatpush1.msra.mxu1 %v642_v43  ;;  %822 = vmatprep.subr.mxu0 %v765_v44 }
  0xba   : > { %935 = vmatprep.subr.mxu1 %v767_v45  ;;  %823 = vmatpush2.msra.mxu0 %v764_v46 }
  0xbb   : > { %936 = vmatpush2.msra.mxu1 %v766_v47  ;;  %824 = vmatprep.subr.mxu0 %v761_v48 }
  0xbc   : > { %937 = vmatprep.subr.mxu1 %v763_v49  ;;  %825 = vmatpush2.msra.mxu0 %v760_v50 }
  0xbd   : > { %938 = vmatpush2.msra.mxu1 %v762_v51  ;;  %826 = vmatprep.subr.mxu0 %v757_v52  ;;  %v754_v52 = vld [vmem:[#allocation12 + $0x390] sm:$0xff] }
  0xbe   : > { %939 = vmatprep.subr.mxu1 %v759_v53  ;;  %827 = vmatpush2.msra.mxu0 %v756_v54  ;;  %v751_v54 = vld [vmem:[#allocation12 + $0x378] sm:$0xff] }
  0xbf   : > { %940 = vmatpush2.msra.mxu1 %v758_v55  ;;  %828 = vmatprep.subr.mxu0 %v753_v56  ;;  %v748_v55 = vld [vmem:[#allocation12 + $0x360] sm:$0xff]  ;;  %v750_v56 = vld [vmem:[#allocation12 + $0x370] sm:$0xff] }
  0xc0   : > { %941 = vmatprep.subr.mxu1 %v755_v57 }
  0xc1   : > { %942 = vmatpush2.msra.mxu1 %v754_v52  ;;  %v710_v52 = vld [vmem:[#allocation12 + $0x230] sm:$0xff] }
  0xc2   : > { %943 = vmatprep.subr.mxu1 %v751_v54  ;;  %v704_v54 = vld [vmem:[#allocation12 + $0x200] sm:$0xff] }
  0xc3   : > { %944 = vmatpush2.msra.mxu1 %v750_v56 }
 0x11c   : > { %v459_v58 = vpop.xlane.xlu0 %458 }
 0x11d   : > { %v482_v59 = vmul.f32 0.00390625, %v459_v58  ;;  %v465_v60 = vpop.xlane.xlu1 %464  ;;  %v745_v58 = vld [vmem:[#allocation12 + $0x348] sm:$0xff] }
 0x11e   : > { %v484_v61 = vmul.f32 0.00390625, %v465_v60  ;;  %v744_v60 = vld [vmem:[#allocation12 + $0x340] sm:$0xff] }
 0x11f   : > { %v7374_v62 = vsub.f32 %v7310_v2, %v482_v59  ;;  %v7377_v63 = vsub.f32 %v7313_v3, %v482_v59  ;;  %v747_v59 = vld [vmem:[#allocation12 + $0x358] sm:$0xff] }
 0x120   : > { %v7380_v5 = vsub.f32 %v7316_v4, %v484_v61  ;;  %v7383_v9 = vsub.f32 %v7321_v6, %v484_v61  ;;  %v462_v12 = vpop.xlane.xlu0 %461  ;;  %945 = vmatprep.subr.mxu1 %v747_v59  ;;  %v746_v61 = vld [vmem:[#allocation12 + $0x350] sm:$0xff] }
 0x121   : > { %v483_v13 = vmul.f32 0.00390625, %v462_v12  ;;  %v468_v18 = vpop.xlane.xlu1 %467  ;;  %v506_v19 = vmul.f32 %v7374_v62, %v7374_v62  ;;  %v507_v24 = vmul.f32 %v7377_v63, %v7377_v63  ;;  %946 = vmatpush2.msra.mxu1 %v746_v61  ;;  %v741_v12 = vld [vmem:[#allocation12 + $0x328] sm:$0xff]  ;;  %v587_v61 = vlaneseq }
 0x122   : > { %v485_v2 = vmul.f32 0.00390625, %v468_v18  ;;  %v510_v3 = vmul.f32 %v7380_v5, %v7380_v5  ;;  %v511_v4 = vmul.f32 %v7383_v9, %v7383_v9  ;;  %v740_v18 = vld [vmem:[#allocation12 + $0x320] sm:$0xff] }
 0x123   : > { %v7394_v25 = vsub.f32 %v7324_v7, %v483_v13  ;;  %v7397_v6 = vsub.f32 %v7327_v8, %v483_v13  ;;  %v522_v26 = vadd.f32 %v507_v24, %v506_v19  ;;  %v743_v13 = vld [vmem:[#allocation12 + $0x338] sm:$0xff]  ;;  %v742_v19 = vld [vmem:[#allocation12 + $0x330] sm:$0xff]  ;;  %v737_v24 = vld [vmem:[#allocation12 + $0x308] sm:$0xff] }
 0x124   : > { %v7400_v27 = vsub.f32 %v7332_v10, %v485_v2  ;;  %v7403_v28 = vsub.f32 %v7335_v11, %v485_v2  ;;  %v471_v29 = vpop.xlane.xlu0 %470  ;;  %v528_v32 = vadd.f32 %v511_v4, %v510_v3  ;;  %947 = vmatprep.subr.mxu1 %v743_v13  ;;  %v739_v2 = vld [vmem:[#allocation12 + $0x318] sm:$0xff]  ;;  %v736_v3 = vld [vmem:[#allocation12 + $0x300] sm:$0xff]  ;;  %v738_v4 = vld [vmem:[#allocation12 + $0x310] sm:$0xff] }
 0x125   : > { %v486_v30 = vmul.f32 0.00390625, %v471_v29  ;;  %523 = vadd.xlane.f32.xlu0 %v522_v26  ;;  %v474_v31 = vpop.xlane.xlu1 %473  ;;  %v508_v33 = vmul.f32 %v7394_v25, %v7394_v25  ;;  %v509_v7 = vmul.f32 %v7397_v6, %v7397_v6  ;;  %948 = vmatpush2.msra.mxu1 %v742_v19  ;;  %v733_v26 = vld [vmem:[#allocation12 + $0x2e8] sm:$0xff]  ;;  %v735_v29 = vld [vmem:[#allocation12 + $0x2f8] sm:$0xff] }
 0x126   : > { %v487_v8 = vmul.f32 0.00390625, %v474_v31  ;;  %v512_v34 = vmul.f32 %v7400_v27, %v7400_v27  ;;  %v513_v10 = vmul.f32 %v7403_v28, %v7403_v28  ;;  %949 = vmatprep.subr.mxu1 %v739_v2  ;;  %v734_v31 = vld [vmem:[#allocation12 + $0x2f0] sm:$0xff] }
 0x127   : > { %v7414_v11 = vsub.f32 %v7342_v14, %v486_v30  ;;  %v7417_v35 = vsub.f32 %v7345_v15, %v486_v30  ;;  %v525_v36 = vadd.f32 %v509_v7, %v508_v33  ;;  %950 = vmatpush2.msra.mxu1 %v738_v4  ;;  %v732_v30 = vld [vmem:[#allocation12 + $0x2e0] sm:$0xff]  ;;  %v731_v33 = vld [vmem:[#allocation12 + $0x2d8] sm:$0xff] }
 0x128   : > { %v7420_v37 = vsub.f32 %v7348_v16, %v487_v8  ;;  %v7423_v38 = vsub.f32 %v7351_v17, %v487_v8  ;;  %v477_v39 = vpop.xlane.xlu0 %476  ;;  %v531_v42 = vadd.f32 %v513_v10, %v512_v34  ;;  %951 = vmatprep.subr.mxu1 %v735_v29  ;;  %v728_v7 = vld [vmem:[#allocation12 + $0x2c0] sm:$0xff]  ;;  %v730_v8 = vld [vmem:[#allocation12 + $0x2d0] sm:$0xff]  ;;  %v725_v34 = vld [vmem:[#allocation12 + $0x2a8] sm:$0xff] }
 0x129   : > { %v488_v40 = vmul.f32 0.00390625, %v477_v39  ;;  %529 = vadd.xlane.f32.xlu0 %v528_v32  ;;  %526 = vadd.xlane.f32.xlu1 %v525_v36  ;;  %v480_v41 = vpop.xlane.xlu1 %479  ;;  %v514_v14 = vmul.f32 %v7414_v11, %v7414_v11  ;;  %v515_v15 = vmul.f32 %v7417_v35, %v7417_v35  ;;  %v729_v32 = vld [vmem:[#allocation12 + $0x2c8] sm:$0xff]  ;;  %v727_v10 = vld [vmem:[#allocation12 + $0x2b8] sm:$0xff]  ;;  %v724_v36 = vld [vmem:[#allocation12 + $0x2a0] sm:$0xff] }
 0x12a   : > { %v489_v43 = vmul.f32 0.00390625, %v480_v41  ;;  %v516_v16 = vmul.f32 %v7420_v37, %v7420_v37  ;;  %v517_v17 = vmul.f32 %v7423_v38, %v7423_v38  ;;  %952 = vmatpush2.msra.mxu1 %v734_v31  ;;  %v726_v39 = vld [vmem:[#allocation12 + $0x2b0] sm:$0xff]  ;;  %v723_v41 = vld [vmem:[#allocation12 + $0x298] sm:$0xff] }
 0x12b   : > { %v7434_v44 = vsub.f32 %v7358_v20, %v488_v40  ;;  %v7437_v45 = vsub.f32 %v7361_v21, %v488_v40  ;;  %v534_v46 = vadd.f32 %v515_v15, %v514_v14  ;;  %953 = vmatprep.subr.mxu1 %v731_v33  ;;  %v721_v40 = vld [vmem:[#allocation12 + $0x288] sm:$0xff]  ;;  %v722_v14 = vld [vmem:[#allocation12 + $0x290] sm:$0xff] }
 0x12c   : > { %v7440_v47 = vsub.f32 %v7364_v22, %v489_v43  ;;  %v7443_v48 = vsub.f32 %v7367_v23, %v489_v43  ;;  %v537_v49 = vadd.f32 %v517_v17, %v516_v16  ;;  %v752_v22 = vld [vmem:[#allocation12 + $0x380] sm:$0xff]  ;;  %v749_v23 = vld [vmem:[#allocation12 + $0x368] sm:$0xff]  ;;  %954 = vmatpush2.msra.mxu1 %v730_v8  ;;  %v719_v43 = vld [vmem:[#allocation12 + $0x278] sm:$0xff] }
 0x12d   : > { %532 = vadd.xlane.f32.xlu1 %v531_v42  ;;  %535 = vadd.xlane.f32.xlu0 %v534_v46  ;;  %v518_v50 = vmul.f32 %v7434_v44, %v7434_v44  ;;  %v519_v20 = vmul.f32 %v7437_v45, %v7437_v45  ;;  %v720_v42 = vld [vmem:[#allocation12 + $0x280] sm:$0xff]  ;;  %v717_v15 = vld [vmem:[#allocation12 + $0x268] sm:$0xff]  ;;  %v718_v17 = vld [vmem:[#allocation12 + $0x270] sm:$0xff] }
 0x12e   : > { %v520_v21 = vmul.f32 %v7440_v47, %v7440_v47  ;;  %v521_v51 = vmul.f32 %v7443_v48, %v7443_v48  ;;  %829 = vmatpush2.msra.mxu0 %v752_v22  ;;  %955 = vmatprep.subr.mxu1 %v727_v10  ;;  %v716_v16 = vld [vmem:[#allocation12 + $0x260] sm:$0xff]  ;;  %v713_v46 = vld [vmem:[#allocation12 + $0x248] sm:$0xff] }
 0x12f   : > { %v540_v53 = vadd.f32 %v519_v20, %v518_v50  ;;  %830 = vmatprep.subr.mxu0 %v749_v23  ;;  %956 = vmatpush2.msra.mxu1 %v726_v39  ;;  %v712_v50 = vld [vmem:[#allocation12 + $0x240] sm:$0xff]  ;;  %v714_v20 = vld [vmem:[#allocation12 + $0x250] sm:$0xff]  ;;  %v707_v23 = vld [vmem:[#allocation12 + $0x218] sm:$0xff] }
 0x130   : > { %v543_v57 = vadd.f32 %v521_v51, %v520_v21  ;;  %831 = vmatpush2.msra.mxu0 %v748_v55  ;;  %957 = vmatprep.subr.mxu1 %v723_v41  ;;  %v709_v21 = vld [vmem:[#allocation12 + $0x228] sm:$0xff]  ;;  %v711_v51 = vld [vmem:[#allocation12 + $0x238] sm:$0xff]  ;;  %v708_v22 = vld [vmem:[#allocation12 + $0x220] sm:$0xff] }
 0x131   : > { %538 = vadd.xlane.f32.xlu1 %v537_v49  ;;  %541 = vadd.xlane.f32.xlu0 %v540_v53  ;;  %v715_v49 = vld [vmem:[#allocation12 + $0x258] sm:$0xff]  ;;  %v705_v53 = vld [vmem:[#allocation12 + $0x208] sm:$0xff]  ;;  %v706_v55 = vld [vmem:[#allocation12 + $0x210] sm:$0xff] }
 0x132   : > { %832 = vmatprep.subr.mxu0 %v745_v58  ;;  %958 = vmatpush2.msra.mxu1 %v722_v14 }
 0x133   : > { %833 = vmatpush2.msra.mxu0 %v744_v60  ;;  %959 = vmatprep.subr.mxu1 %v719_v43 }
 0x134   : > { %834 = vmatprep.subr.mxu0 %v741_v12  ;;  %960 = vmatpush2.msra.mxu1 %v718_v17 }
 0x135   : > { %544 = vadd.xlane.f32.xlu1 %v543_v57  ;;  %835 = vmatpush2.msra.mxu0 %v740_v18 }
 0x136   : > { %836 = vmatprep.subr.mxu0 %v737_v24  ;;  %961 = vmatprep.subr.mxu1 %v715_v49 }
 0x137   : > { %837 = vmatpush2.msra.mxu0 %v736_v3  ;;  %962 = vmatpush2.msra.mxu1 %v714_v20  ;;  %v7453_v3 = vshrl.u32 %v587_v61, 7 }
 0x138   : > { %838 = vmatprep.subr.mxu0 %v733_v26  ;;  %963 = vmatprep.subr.mxu1 %v711_v51 }
 0x139   : > { %839 = vmatpush2.msra.mxu0 %v732_v30  ;;  %964 = vmatpush2.msra.mxu1 %v710_v52  ;;  %v7456_v33 = vsub.s32 1, %v7453_v3 }
 0x13a   : > { %840 = vmatprep.subr.mxu0 %v729_v32  ;;  %965 = vmatprep.subr.mxu1 %v707_v23 }
 0x13b   : > { %841 = vmatpush2.msra.mxu0 %v728_v7  ;;  %966 = vmatpush2.msra.mxu1 %v706_v55  ;;  %v7463_v39 = vrot.slane %v7299_v0, %v7456_v33  ;;  %v7472_v43 = vrot.slane %v7304_v1, %v7456_v33 }
 0x13c   : > { %842 = vmatprep.subr.mxu0 %v725_v34  ;;  %v7459_v34 = vsub.s32 0, %v7453_v3 }
 0x13d   : > { %843 = vmatpush2.msra.mxu0 %v724_v36 }
 0x13e   : > { %844 = vmatprep.subr.mxu0 %v721_v40  ;;  %v7477_v17 = vrot.slane %v7304_v1, %v7459_v34 }
 0x13f   : > { %845 = vmatpush2.msra.mxu0 %v720_v42  ;;  %v7467_v42 = vrot.slane %v7299_v0, %v7459_v34 }
 0x140   : > { %846 = vmatprep.subr.mxu0 %v717_v15 }
 0x141   : > { %847 = vmatpush2.msra.mxu0 %v716_v16 }
 0x142   : > { %848 = vmatprep.subr.mxu0 %v713_v46 }
 0x143   : > { %849 = vmatpush2.msra.mxu0 %v712_v50 }
 0x144   : > { %850 = vmatprep.subr.mxu0 %v709_v21 }
 0x145   : > { %851 = vmatpush2.msra.mxu0 %v708_v22 }
 0x146   : > { %852 = vmatprep.subr.mxu0 %v705_v53 }
 0x147   : > { %853 = vmatpush2.msra.mxu0 %v704_v54 }
 0x1ae   : > { %v524_v56 = vpop.xlane.xlu0 %523 }
 0x1af   : > { %v546_v57 = vmul.f32 0.00390625, %v524_v56 }
 0x1b1   : > { %v554_v58 = vadd.f32 1e-05, %v546_v57 }
 0x1b2   : > { %v527_v59 = vpop.xlane.xlu1 %526  ;;  %v530_v60 = vpop.xlane.xlu0 %529 }
 0x1b3   : > { %6625 = vrsqrt.f32 %v554_v58  ;;  %v547_v12 = vmul.f32 0.00390625, %v527_v59  ;;  %v548_v13 = vmul.f32 0.00390625, %v530_v60 }
 0x1b5   : > { %v555_v18 = vadd.f32 1e-05, %v547_v12  ;;  %v556_v19 = vadd.f32 1e-05, %v548_v13 }
 0x1b6   : > { %v533_v24 = vpop.xlane.xlu1 %532  ;;  %v536_v2 = vpop.xlane.xlu0 %535 }
 0x1b7   : > { %6627 = vrsqrt.f32 %v555_v18  ;;  %v549_v4 = vmul.f32 0.00390625, %v533_v24  ;;  %v550_v26 = vmul.f32 0.00390625, %v536_v2 }
 0x1b8   : > { %6629 = vrsqrt.f32 %v556_v19 }
 0x1b9   : > { %v557_v29 = vadd.f32 1e-05, %v549_v4  ;;  %v558_v30 = vadd.f32 1e-05, %v550_v26 }
 0x1ba   : > { %v539_v31 = vpop.xlane.xlu1 %538  ;;  %v542_v32 = vpop.xlane.xlu0 %541 }
 0x1bb   : > { %6631 = vrsqrt.f32 %v557_v29  ;;  %v551_v7 = vmul.f32 0.00390625, %v539_v31  ;;  %v552_v8 = vmul.f32 0.00390625, %v542_v32 }
 0x1bc   : > { %6633 = vrsqrt.f32 %v558_v30 }
 0x1bd   : > { %v559_v10 = vadd.f32 1e-05, %v551_v7  ;;  %v560_v40 = vadd.f32 1e-05, %v552_v8 }
 0x1be   : > { %v545_v36 = vpop.xlane.xlu1 %544 }
 0x1bf   : > { %6635 = vrsqrt.f32 %v559_v10  ;;  %v553_v41 = vmul.f32 0.00390625, %v545_v36 }
 0x1c0   : > { %v6626_v14 = vpop.eup %6625  ;;  %6637 = vrsqrt.f32 %v560_v40 }
 0x1c1   : > { %v571_v15 = vmul.f32 %v6626_v14, %v7377_v63  ;;  %v570_v16 = vmul.f32 %v6626_v14, %v7374_v62  ;;  %v561_v46 = vadd.f32 1e-05, %v553_v41 }
 0x1c3   : > { %v598_v49 = vmul.f32 %v7463_v39, %v571_v15  ;;  %v597_v50 = vmul.f32 %v7467_v42, %v570_v16  ;;  %6639 = vrsqrt.f32 %v561_v46  ;;  %v780_v16 = vsub.s32 2, %v7453_v3 }
 0x1c4   : > { %v6628_v20 = vpop.eup %6627  ;;  %v784_v46 = vsub.s32 3, %v7453_v3 }
 0x1c5   : > { %v6630_v21 = vpop.eup %6629  ;;  %v625_v63 = vadd.f32 %v7472_v43, %v598_v49  ;;  %v624_v51 = vadd.f32 %v7477_v17, %v597_v50  ;;  %v573_v22 = vmul.f32 %v6628_v20, %v7397_v6  ;;  %v572_v62 = vmul.f32 %v6628_v20, %v7394_v25 }
 0x1c6   : > { %v575_v52 = vmul.f32 %v6630_v21, %v7383_v9  ;;  %v574_v53 = vmul.f32 %v6630_v21, %v7380_v5 }
 0x1c7   : > { %854 = vmatprep.mubr.f32.mxu0 %v625_v63  ;;  %967 = vmatprep.mubr.f32.mxu1 %v625_v63  ;;  %v600_v23 = vmul.f32 %v7463_v39, %v573_v22  ;;  %v599_v54 = vmul.f32 %v7467_v42, %v572_v62 }
 0x1c8   : > { %v6632_v55 = vpop.eup %6631  ;;  %855 = vmatmul.mubr.f32.vlgmr.msra.gmra.mxu0 %v624_v51  ;;  %968 = vmatmul.mubr.f32.vlgmr.msra.gmra.mxu1 %v624_v51  ;;  %v602_v56 = vmul.f32 %v7463_v39, %v575_v52  ;;  %v601_v5 = vmul.f32 %v7467_v42, %v574_v53 }
 0x1c9   : > { %v6634_v57 = vpop.eup %6633  ;;  %v627_v6 = vadd.f32 %v7472_v43, %v600_v23  ;;  %v626_v25 = vadd.f32 %v7477_v17, %v599_v54  ;;  %v577_v9 = vmul.f32 %v6632_v55, %v7403_v28  ;;  %v576_v58 = vmul.f32 %v6632_v55, %v7400_v27 }
 0x1ca   : > { %v629_v59 = vadd.f32 %v7472_v43, %v602_v56  ;;  %v579_v61 = vmul.f32 %v6634_v57, %v7417_v35  ;;  %v628_v13 = vadd.f32 %v7477_v17, %v601_v5  ;;  %v578_v18 = vmul.f32 %v6634_v57, %v7414_v11 }
 0x1cb   : > { %860 = vmatprep.mubr.f32.mxu0 %v627_v6  ;;  %973 = vmatprep.mubr.f32.mxu1 %v627_v6  ;;  %v604_v60 = vmul.f32 %v7463_v39, %v577_v9  ;;  %v603_v28 = vmul.f32 %v7467_v42, %v576_v58 }
 0x1cc   : > { %v6636_v12 = vpop.eup %6635  ;;  %861 = vmatmul.mubr.f32.gmra.mxu0 %v626_v25  ;;  %974 = vmatmul.mubr.f32.gmra.mxu1 %v626_v25  ;;  %v606_v19 = vmul.f32 %v7463_v39, %v579_v61  ;;  %v605_v4 = vmul.f32 %v7467_v42, %v578_v18 }
 0x1cd   : > { %866 = vmatprep.mubr.f32.mxu0 %v629_v59  ;;  %979 = vmatprep.mubr.f32.mxu1 %v629_v59  ;;  %v631_v27 = vadd.f32 %v7472_v43, %v604_v60  ;;  %v581_v24 = vmul.f32 %v6636_v12, %v7423_v38  ;;  %v6638_v2 = vpop.eup %6637  ;;  %v630_v35 = vadd.f32 %v7477_v17, %v603_v28 }
 0x1ce   : > { %v580_v26 = vmul.f32 %v6636_v12, %v7420_v37  ;;  %v633_v29 = vadd.f32 %v7472_v43, %v606_v19  ;;  %v583_v30 = vmul.f32 %v6638_v2, %v7437_v45  ;;  %v632_v38 = vadd.f32 %v7477_v17, %v605_v4 }
 0x1cf   : > { %v608_v11 = vmul.f32 %v7463_v39, %v581_v24  ;;  %v582_v7 = vmul.f32 %v6638_v2, %v7434_v44 }
 0x1d0   : > { %867 = vmatmul.mubr.f32.gmra.mxu0 %v628_v13  ;;  %980 = vmatmul.mubr.f32.gmra.mxu1 %v628_v13  ;;  %v6640_v31 = vpop.eup %6639  ;;  %v607_v32 = vmul.f32 %v7467_v42, %v580_v26  ;;  %v610_v37 = vmul.f32 %v7463_v39, %v583_v30 }
 0x1d1   : > { %872 = vmatprep.mubr.f32.mxu0 %v631_v27  ;;  %985 = vmatprep.mubr.f32.mxu1 %v631_v27  ;;  %v635_v8 = vadd.f32 %v7472_v43, %v608_v11  ;;  %v585_v10 = vmul.f32 %v6640_v31, %v7443_v48  ;;  %v609_v36 = vmul.f32 %v7467_v42, %v582_v7 }
 0x1d2   : > { %v634_v45 = vadd.f32 %v7477_v17, %v607_v32  ;;  %v584_v40 = vmul.f32 %v6640_v31, %v7440_v47  ;;  %v637_v41 = vadd.f32 %v7472_v43, %v610_v37 }
 0x1d3   : > { %v612_v44 = vmul.f32 %v7463_v39, %v585_v10  ;;  %v636_v48 = vadd.f32 %v7477_v17, %v609_v36  ;;  %v768_v39 = vld [vmem:[%s9003_s6] sm:$0xf] }
 0x1d4   : > { %873 = vmatmul.mubr.f32.gmra.mxu0 %v630_v35  ;;  %986 = vmatmul.mubr.f32.gmra.mxu1 %v630_v35  ;;  %v611_v14 = vmul.f32 %v7467_v42, %v584_v40  ;;  %v7531_v42 = vrot.slane %v768_v39, %v7459_v34  ;;  %v7536_v49 = vrot.slane %v768_v39, %v7456_v33 }
 0x1d5   : > { %878 = vmatprep.mubr.f32.mxu0 %v633_v29  ;;  %991 = vmatprep.mubr.f32.mxu1 %v633_v29  ;;  %v639_v15 = vadd.f32 %v7472_v43, %v612_v44  ;;  %v7533_v43 = vrot.slane %v768_v39, %v780_v16  ;;  %v7538_v50 = vrot.slane %v768_v39, %v784_v46 }
 0x1d6   : > { %v638_v47 = vadd.f32 %v7477_v17, %v611_v14 }
 0x1d8   : > { %879 = vmatmul.mubr.f32.gmra.mxu0 %v632_v38  ;;  %992 = vmatmul.mubr.f32.gmra.mxu1 %v632_v38 }
 0x1d9   : > { %884 = vmatprep.mubr.f32.mxu0 %v635_v8  ;;  %997 = vmatprep.mubr.f32.mxu1 %v635_v8 }
 0x1dc   : > { %885 = vmatmul.mubr.f32.gmra.mxu0 %v634_v45  ;;  %998 = vmatmul.mubr.f32.gmra.mxu1 %v634_v45 }
 0x1dd   : > { %890 = vmatprep.mubr.f32.mxu0 %v637_v41  ;;  %1003 = vmatprep.mubr.f32.mxu1 %v637_v41 }
 0x1e0   : > { %891 = vmatmul.mubr.f32.gmra.mxu0 %v636_v48  ;;  %1004 = vmatmul.mubr.f32.gmra.mxu1 %v636_v48 }
 0x1e1   : > { %896 = vmatprep.mubr.f32.mxu0 %v639_v15  ;;  %1009 = vmatprep.mubr.f32.mxu1 %v639_v15 }
 0x1e4   : > { %897 = vmatmul.mubr.f32.gmra.mxu0 %v638_v47  ;;  %1010 = vmatmul.mubr.f32.gmra.mxu1 %v638_v47 }
 0x288   : > { %v856_v17 = vpop.f32.mrf.mxu0  ;;  %v969_v20 = vpop.f32.mrf.mxu1 }
 0x289   : > { %v7541_v21 = vadd.f32 %v856_v17, %v7531_v42  ;;  %v7544_v22 = vadd.f32 %v969_v20, %v7533_v43 }
 0x28a   : > { %v858_v63 = vpop.f32.mrf.mxu0  ;;  %v971_v51 = vpop.f32.mrf.mxu1 }
 0x28b   : > { %v7547_v34 = vadd.f32 %v858_v63, %v7536_v49  ;;  %v7550_v62 = vadd.f32 %v971_v51, %v7538_v50  ;;  %1024 = vrot.lane.b32.xlu0 %v7541_v21, %s7015_s22 }
 0x28c   : > { %v862_v33 = vpop.f32.mrf.mxu0  ;;  %v975_v52 = vpop.f32.mrf.mxu1 }
 0x28d   : > { %v1080_v53 = vcombine.low %v7541_v21, %v7547_v34  ;;  %v1081_v23 = vcombine.high %v7541_v21, %v7547_v34  ;;  %v1688_v54 = vcombine.low %v7544_v22, %v7550_v62  ;;  %v1689_v55 = vcombine.high %v7544_v22, %v7550_v62 }
 0x28e   : > { %v7563_v56 = vadd.f32 %v862_v33, %v7531_v42  ;;  %v864_v57 = vpop.f32.mrf.mxu0  ;;  %v977_v6 = vpop.f32.mrf.mxu1  ;;  %v7568_v25 = vadd.f32 %v975_v52, %v7533_v43 }
 0x28f   : > { %1632 = vrot.lane.b32.xlu0 %v7544_v22, %s7015_s22  ;;  %v7571_v9 = vadd.f32 %v864_v57, %v7536_v49  ;;  %v7574_v5 = vadd.f32 %v977_v6, %v7538_v50 }
 0x290   : > { %1026 = vrot.lane.b32.xlu1 %v7563_v56, %s7015_s22  ;;  %v868_v58 = vpop.f32.mrf.mxu0  ;;  %v981_v59 = vpop.f32.mrf.mxu1 }
 0x291   : > { %v1148_v60 = vcombine.low %v7563_v56, %v7571_v9  ;;  %v1149_v61 = vcombine.high %v7563_v56, %v7571_v9  ;;  %v1756_v12 = vcombine.low %v7568_v25, %v7574_v5  ;;  %v1757_v13 = vcombine.high %v7568_v25, %v7574_v5 }
 0x292   : > { %v870_v28 = vpop.f32.mrf.mxu0  ;;  %v983_v18 = vpop.f32.mrf.mxu1  ;;  %v7587_v27 = vadd.f32 %v868_v58, %v7531_v42  ;;  %v7590_v19 = vadd.f32 %v981_v59, %v7533_v43 }
 0x293   : > { %v7593_v24 = vadd.f32 %v870_v28, %v7536_v49  ;;  %v7596_v2 = vadd.f32 %v983_v18, %v7538_v50  ;;  %1056 = vrot.lane.b32.xlu0 %v7547_v34, %s7015_s22 }
 0x294   : > { %1634 = vrot.lane.b32.xlu1 %v7568_v25, %s7015_s22  ;;  %v874_v35 = vpop.f32.mrf.mxu0  ;;  %v987_v4 = vpop.f32.mrf.mxu1 }
 0x295   : > { %v1216_v26 = vcombine.low %v7587_v27, %v7593_v24  ;;  %v1217_v29 = vcombine.high %v7587_v27, %v7593_v24  ;;  %v1824_v11 = vcombine.low %v7590_v19, %v7596_v2  ;;  %v1825_v30 = vcombine.high %v7590_v19, %v7596_v2 }
 0x296   : > { %v876_v31 = vpop.f32.mrf.mxu0  ;;  %v989_v38 = vpop.f32.mrf.mxu1  ;;  %v7613_v32 = vadd.f32 %v874_v35, %v7531_v42  ;;  %v7616_v7 = vadd.f32 %v987_v4, %v7533_v43 }
 0x297   : > { %1664 = vrot.lane.b32.xlu0 %v7550_v62, %s7015_s22  ;;  %v7619_v8 = vadd.f32 %v876_v31, %v7536_v49  ;;  %v7622_v37 = vadd.f32 %v989_v38, %v7538_v50 }
 0x298   : > { %1058 = vrot.lane.b32.xlu1 %v7571_v9, %s7015_s22  ;;  %v880_v10 = vpop.f32.mrf.mxu0  ;;  %v993_v45 = vpop.f32.mrf.mxu1 }
 0x299   : > { %v1284_v36 = vcombine.low %v7613_v32, %v7619_v8  ;;  %v1285_v40 = vcombine.high %v7613_v32, %v7619_v8  ;;  %v1892_v41 = vcombine.low %v7616_v7, %v7622_v37  ;;  %v1893_v44 = vcombine.high %v7616_v7, %v7622_v37 }
 0x29a   : > { %v882_v48 = vpop.f32.mrf.mxu0  ;;  %v995_v14 = vpop.f32.mrf.mxu1  ;;  %v7635_v15 = vadd.f32 %v880_v10, %v7531_v42  ;;  %v7638_v47 = vadd.f32 %v993_v45, %v7533_v43 }
 0x29b   : > { %v7641_v39 = vadd.f32 %v882_v48, %v7536_v49  ;;  %v7644_v16 = vadd.f32 %v995_v14, %v7538_v50  ;;  %1636 = vrot.lane.b32.xlu0 %v7590_v19, %s7015_s22 }
 0x29c   : > { %1666 = vrot.lane.b32.xlu1 %v7574_v5, %s7015_s22  ;;  %v886_v46 = vpop.f32.mrf.mxu0  ;;  %v999_v17 = vpop.f32.mrf.mxu1 }
 0x29d   : > { %v1352_v20 = vcombine.low %v7635_v15, %v7641_v39  ;;  %v1353_v63 = vcombine.high %v7635_v15, %v7641_v39  ;;  %v7661_v6 = vadd.f32 %v886_v46, %v7531_v42  ;;  %v7664_v58 = vadd.f32 %v999_v17, %v7533_v43 }
 0x29e   : > { %v888_v52 = vpop.f32.mrf.mxu0  ;;  %v1001_v57 = vpop.f32.mrf.mxu1 }
 0x29f   : > { %1060 = vrot.lane.b32.xlu0 %v7593_v24, %s7015_s22  ;;  %v7667_v59 = vadd.f32 %v888_v52, %v7536_v49  ;;  %v7670_v28 = vadd.f32 %v1001_v57, %v7538_v50  ;;  %v9053_v24 = vcombine.high %v7638_v47, %v7644_v16 }
 0x2a0   : > { %1028 = vrot.lane.b32.xlu1 %v7587_v27, %s7015_s22  ;;  %v892_v18 = vpop.f32.mrf.mxu0  ;;  %v1005_v35 = vpop.f32.mrf.mxu1  ;;  %v9052_v27 = vcombine.low %v7638_v47, %v7644_v16 }
 0x2a1   : > { %v7683_v14 = vadd.f32 %v892_v18, %v7531_v42  ;;  %v7686_v46 = vadd.f32 %v1005_v35, %v7533_v43 }
 0x2a2   : > { %v894_v45 = vpop.f32.mrf.mxu0  ;;  %v1007_v48 = vpop.f32.mrf.mxu1 }
 0x2a3   : > { %v7689_v17 = vadd.f32 %v894_v45, %v7536_v49  ;;  %v7692_v52 = vadd.f32 %v1007_v48, %v7538_v50  ;;  %1668 = vrot.lane.b32.xlu0 %v7596_v2, %s7015_s22 }
 0x2a4   : > { %1030 = vrot.lane.b32.xlu1 %v7613_v32, %s7015_s22  ;;  %v898_v57 = vpop.f32.mrf.mxu0  ;;  %v1011_v10 = vpop.f32.mrf.mxu1 }
 0x2a5   : > { %v1489_v35 = vcombine.high %v7683_v14, %v7689_v17  ;;  %v7707_v4 = vadd.f32 %v898_v57, %v7531_v42  ;;  %v7710_v33 = vadd.f32 %v1011_v10, %v7533_v43  ;;  %v7017_v10 = vmov 1934713408  }
 0x2a6   : > { %v900_v38 = vpop.f32.mrf.mxu0  ;;  %v1013_v31 = vpop.f32.mrf.mxu1  ;;  %v1115_v57 = vunpack.c.l.s4 %v7017_v10 }
 0x2a7   : > { %v7713_v51 = vadd.f32 %v900_v38, %v7536_v49  ;;  %v7716_v18 = vadd.f32 %v1013_v31, %v7538_v50  ;;  %1032 = vrot.lane.b32.xlu0 %v7635_v15, %s7015_s22  ;;  %v7016_v50 = vmov 1983009808  }
 0x2a8   : > { %1638 = vrot.lane.b32.xlu1 %v7616_v7, %s7015_s22  ;;  %v1083_v31 = vunpack.c.l.s4 %v7016_v50  ;;  %v1116_v43 = vunpack.c.0.s8 %v1115_v57  ;;  %v9055_v7 = vcombine.high %v7661_v6, %v7667_v59 }
 0x2aa   : > { %v1084_v38 = vunpack.c.0.s8 %v1083_v31  ;;  %v7768_v42 = vsub.s32 %v1116_v43, %v7453_v3 }
 0x2ab   : > { %1640 = vrot.lane.b32.xlu0 %v7638_v47, %s7015_s22 }
 0x2ac   : > { %1062 = vrot.lane.b32.xlu1 %v7619_v8, %s7015_s22  ;;  %v7765_v49 = vsub.s32 %v1084_v38, %v7453_v3 }
 0x2ae   : > { %v1088_v48 = vrot.slane %v1080_v53, %v7765_v49  ;;  %v1095_v50 = vrot.slane %v1081_v23, %v7765_v49  ;;  %v7782_v38 = vrot.slane %v1688_v54, %v7765_v49  ;;  %v7788_v3 = vrot.slane %v1689_v55, %v7765_v49 }
 0x2af   : > { %1064 = vrot.lane.b32.xlu0 %v7641_v39, %s7015_s22  ;;  %v7794_v53 = vrot.slane %v1148_v60, %v7765_v49  ;;  %v7800_v21 = vrot.slane %v1149_v61, %v7765_v49  ;;  %v7806_v22 = vrot.slane %v1756_v12, %v7765_v49  ;;  %v7812_v62 = vrot.slane %v1757_v13, %v7765_v49 }
 0x2b0   : > { %1670 = vrot.lane.b32.xlu1 %v7622_v37, %s7015_s22  ;;  %v7818_v23 = vrot.slane %v1216_v26, %v7765_v49  ;;  %v7824_v54 = vrot.slane %v1217_v29, %v7765_v49  ;;  %v7830_v55 = vrot.slane %v1824_v11, %v7765_v49  ;;  %v7836_v56 = vrot.slane %v1825_v30, %v7765_v49 }
 0x2b1   : > { %v7842_v25 = vrot.slane %v1284_v36, %v7765_v49  ;;  %v7848_v9 = vrot.slane %v1285_v40, %v7765_v49  ;;  %v7854_v5 = vrot.slane %v1892_v41, %v7765_v49  ;;  %v7860_v60 = vrot.slane %v1893_v44, %v7765_v49 }
 0x2b2   : > { %v7866_v61 = vrot.slane %v1352_v20, %v7765_v49  ;;  %v7872_v12 = vrot.slane %v1353_v63, %v7765_v49  ;;  %v7878_v19 = vrot.slane %v9052_v27, %v7765_v49  ;;  %v7884_v2 = vrot.slane %v9053_v24, %v7765_v49 }
 0x2b3   : > { %1672 = vrot.lane.b32.xlu0 %v7644_v16, %s7015_s22  ;;  %v9054_v30 = vcombine.low %v7661_v6, %v7667_v59  ;;  %v7898_v8 = vrot.slane %v9055_v7, %v7765_v49  ;;  %v9056_v37 = vcombine.low %v7664_v58, %v7670_v28  ;;  %v9057_v40 = vcombine.high %v7664_v58, %v7670_v28 }
 0x2b4   : > { %1034 = vrot.lane.b32.xlu1 %v7661_v6, %s7015_s22  ;;  %v9058_v44 = vcombine.low %v7683_v14, %v7689_v17  ;;  %v7922_v47 = vrot.slane %v1489_v35, %v7765_v49  ;;  %v9059_v20 = vcombine.low %v7707_v4, %v7713_v51  ;;  %v9060_v6 = vcombine.high %v7707_v4, %v7713_v51 }
 0x2b5   : > { %v7892_v32 = vrot.slane %v9054_v30, %v7765_v49  ;;  %v7904_v36 = vrot.slane %v9056_v37, %v7765_v49  ;;  %v7910_v41 = vrot.slane %v9057_v40, %v7765_v49 }
 0x2b6   : > { %v7916_v15 = vrot.slane %v9058_v44, %v7765_v49  ;;  %v7930_v63 = vrot.slane %v9059_v20, %v7765_v49 }
 0x2b7   : > { %1036 = vrot.lane.b32.xlu0 %v7683_v14, %s7015_s22 }
 0x2b8   : > { %1642 = vrot.lane.b32.xlu1 %v7664_v58, %s7015_s22  ;;  %v7936_v58 = vrot.slane %v9060_v6, %v7765_v49 }
 0x2bb   : > { %1644 = vrot.lane.b32.xlu0 %v7686_v46, %s7015_s22 }
 0x2bc   : > { %1066 = vrot.lane.b32.xlu1 %v7667_v59, %s7015_s22 }
 0x2bf   : > { %1068 = vrot.lane.b32.xlu0 %v7689_v17, %s7015_s22  ;;  %v9062_v17 = vcombine.high %v7686_v46, %v7692_v52 }
 0x2c0   : > { %1674 = vrot.lane.b32.xlu1 %v7670_v28, %s7015_s22  ;;  %v9061_v28 = vcombine.low %v7686_v46, %v7692_v52 }
 0x2c1   : > { %v7948_v35 = vrot.slane %v9062_v17, %v7765_v49 }
 0x2c2   : > { %v7942_v14 = vrot.slane %v9061_v28, %v7765_v49 }
 0x2c3   : > { %1676 = vrot.lane.b32.xlu0 %v7692_v52, %s7015_s22 }
 0x2c4   : > { %1038 = vrot.lane.b32.xlu1 %v7707_v4, %s7015_s22 }
 0x2c8   : > { %1646 = vrot.lane.b32.xlu1 %v7710_v33, %s7015_s22 }
 0x2cc   : > { %1070 = vrot.lane.b32.xlu1 %v7713_v51, %s7015_s22 }
 0x2d0   : > { %1678 = vrot.lane.b32.xlu1 %v7716_v18, %s7015_s22 }
 0x2fd   : > { %v1025_v45 = vpop.permute.xlu0 %1024 }
 0x301   : > { %v1633_v31 = vpop.permute.xlu0 %1632 }
 0x302   : > { %v1027_v34 = vpop.permute.xlu1 %1026 }
 0x305   : > { %v1057_v13 = vpop.permute.xlu0 %1056 }
 0x306   : > { %v7886_v26 = vpop.permute.xlu1 %1634  ;;  %v1096_v29 = vcombine.low %v1025_v45, %v1057_v13  ;;  %v1097_v11 = vcombine.high %v1025_v45, %v1057_v13 }
 0x308   : > { %v1104_v39 = vrot.slane %v1096_v29, %v7765_v49  ;;  %v1111_v16 = vrot.slane %v1097_v11, %v7765_v49 }
 0x309   : > { %v1665_v59 = vpop.permute.xlu0 %1664 }
 0x30a   : > { %v1112_v45 = vcombine.low %v1088_v48, %v1104_v39  ;;  %v1113_v43 = vcombine.high %v1088_v48, %v1104_v39  ;;  %v1128_v10 = vcombine.low %v1095_v50, %v1111_v16  ;;  %v1129_v57 = vcombine.high %v1095_v50, %v1111_v16  ;;  %v1059_v51 = vpop.permute.xlu1 %1058 }
 0x30b   : > { %v1164_v4 = vcombine.low %v1027_v34, %v1059_v51  ;;  %v1165_v13 = vcombine.high %v1027_v34, %v1059_v51  ;;  %v1704_v27 = vcombine.low %v1633_v31, %v1665_v59  ;;  %v1705_v24 = vcombine.high %v1633_v31, %v1665_v59 }
 0x30c   : > { %v1120_v29 = vrot.slane %v1112_v45, %v7768_v42  ;;  %v1127_v11 = vrot.slane %v1113_v43, %v7768_v42  ;;  %v1136_v30 = vrot.slane %v1128_v10, %v7768_v42  ;;  %v1143_v7 = vrot.slane %v1129_v57, %v7768_v42 }
 0x30d   : > { %v1172_v46 = vrot.slane %v1164_v4, %v7765_v49  ;;  %v1179_v52 = vrot.slane %v1165_v13, %v7765_v49  ;;  %v1712_v48 = vrot.slane %v1704_v27, %v7765_v49  ;;  %v1719_v50 = vrot.slane %v1705_v24, %v7765_v49 }
 0x30e   : > { %v2232_v34 = vcombine.low %v1120_v29, %v1127_v11  ;;  %v6054_v37 = vcombine.high %v1120_v29, %v1127_v11  ;;  %v2248_v31 = vcombine.low %v1136_v30, %v1143_v7  ;;  %v6055_v40 = vcombine.high %v1136_v30, %v1143_v7  ;;  %v7962_v6 = vpop.permute.xlu1 %1666 }
 0x30f   : > { %v1180_v44 = vcombine.low %v7794_v53, %v1172_v46  ;;  %v1181_v39 = vcombine.high %v7794_v53, %v1172_v46  ;;  %v1196_v16 = vcombine.low %v7800_v21, %v1179_v52  ;;  %v1197_v20 = vcombine.high %v7800_v21, %v1179_v52 }
 0x310   : > { %v2239_v59 = vrot.slane %v2232_v34, %v7765_v49  ;;  %v2247_v28 = vrot.slane %v6054_v37, %v7765_v49  ;;  %v2255_v17 = vrot.slane %v2248_v31, %v7765_v49  ;;  %v2263_v45 = vrot.slane %v6055_v40, %v7765_v49  ;;  %v7976_v34 = vpop.permute.xlu0 %1636 }
 0x311   : > { %v1188_v43 = vrot.slane %v1180_v44, %v7768_v42  ;;  %v1195_v10 = vrot.slane %v1181_v39, %v7768_v42  ;;  %v1204_v53 = vrot.slane %v1196_v16, %v7768_v42  ;;  %v1211_v57 = vrot.slane %v1197_v20, %v7768_v42 }
 0x312   : > { %v2264_v51 = vcombine.low %v2239_v59, %v2247_v28  ;;  %v2265_v21 = vcombine.high %v2239_v59, %v2247_v28  ;;  %v2280_v4 = vcombine.low %v2255_v17, %v2263_v45  ;;  %v2281_v13 = vcombine.high %v2255_v17, %v2263_v45  ;;  %v1029_v39 = vpop.permute.xlu1 %1028 }
 0x313   : > { %v2300_v27 = vcombine.low %v1188_v43, %v1195_v10  ;;  %v6056_v24 = vcombine.high %v1188_v43, %v1195_v10  ;;  %v2316_v29 = vcombine.low %v1204_v53, %v1211_v57  ;;  %v6057_v11 = vcombine.high %v1204_v53, %v1211_v57 }
 0x314   : > { %v2272_v30 = vrot.slane %v2264_v51, %v7768_v42  ;;  %v2279_v7 = vrot.slane %v2265_v21, %v7768_v42  ;;  %v2288_v46 = vrot.slane %v2280_v4, %v7768_v42  ;;  %v2295_v52 = vrot.slane %v2281_v13, %v7768_v42 }
 0x315   : > { %v2307_v37 = vrot.slane %v2300_v27, %v7765_v49  ;;  %v2315_v31 = vrot.slane %v6056_v24, %v7765_v49  ;;  %v2323_v40 = vrot.slane %v2316_v29, %v7765_v49  ;;  %v2331_v44 = vrot.slane %v6057_v11, %v7765_v49 }
 0x316   : > { %v2296_v16 = vcombine.low %v2272_v30, %v2288_v46  ;;  %v2297_v20 = vcombine.high %v2272_v30, %v2288_v46  ;;  %v2298_v59 = vcombine.low %v2279_v7, %v2295_v52  ;;  %v2299_v28 = vcombine.high %v2279_v7, %v2295_v52  ;;  %v7998_v52 = vpop.permute.xlu1 %1030 }
 0x317   : > { %v2332_v17 = vcombine.low %v2307_v37, %v2315_v31  ;;  %v2333_v45 = vcombine.high %v2307_v37, %v2315_v31  ;;  %v2348_v43 = vcombine.low %v2323_v40, %v2331_v44  ;;  %v2349_v10 = vcombine.high %v2323_v40, %v2331_v44 }
 0x318   : > { %2777 = vst.msk [vmem:[#allocation2] sm:$0xff] %vm2776_vm0, %v2296_v16  ;;  %2785 = vst.msk [vmem:[#allocation2 + $0x40] sm:$0xff] %vm2776_vm0, %v2297_v20  ;;  %v1720_v53 = vcombine.low %v7782_v38, %v1712_v48  ;;  %v1721_v57 = vcombine.high %v7782_v38, %v1712_v48  ;;  %v1736_v51 = vcombine.low %v7788_v3, %v1719_v50  ;;  %v1061_v48 = vpop.permute.xlu0 %1060 }
 0x319   : > { %2793 = vst.msk [vmem:[#allocation2 + $0x80] sm:$0xff] %vm2776_vm0, %v2298_v59  ;;  %2801 = vst.msk [vmem:[#allocation2 + $0xc0] sm:$0xff] %vm2776_vm0, %v2299_v28  ;;  %v1737_v21 = vcombine.high %v7788_v3, %v1719_v50  ;;  %v2340_v4 = vrot.slane %v2332_v17, %v7768_v42  ;;  %v2347_v13 = vrot.slane %v2333_v45, %v7768_v42 }
 0x31a   : > { %v2356_v27 = vrot.slane %v2348_v43, %v7768_v42  ;;  %v2363_v24 = vrot.slane %v2349_v10, %v7768_v42  ;;  %v1728_v29 = vrot.slane %v1720_v53, %v7768_v42  ;;  %v1735_v11 = vrot.slane %v1721_v57, %v7768_v42 }
 0x31b   : > { %v1744_v30 = vrot.slane %v1736_v51, %v7768_v42  ;;  %v1751_v38 = vrot.slane %v1737_v21, %v7768_v42  ;;  %v1772_v16 = vcombine.low %v7886_v26, %v7962_v6  ;;  %v1773_v20 = vcombine.high %v7886_v26, %v7962_v6 }
 0x31c   : > { %v2364_v7 = vcombine.low %v2340_v4, %v2356_v27  ;;  %v2365_v46 = vcombine.high %v2340_v4, %v2356_v27  ;;  %v2366_v3 = vcombine.low %v2347_v13, %v2363_v24  ;;  %v2367_v50 = vcombine.high %v2347_v13, %v2363_v24 }
 0x31d   : > { %v2809_v37 = vcombine.low %v1728_v29, %v1735_v11  ;;  %v6070_v31 = vcombine.high %v1728_v29, %v1735_v11  ;;  %v2825_v40 = vcombine.low %v1744_v30, %v1751_v38  ;;  %v6071_v44 = vcombine.high %v1744_v30, %v1751_v38  ;;  %v8020_v11 = vpop.permute.xlu1 %1638 }
 0x31e   : > { %2778 = vst.msk [vmem:[#allocation2 + $0x8] sm:$0xff] %vm2776_vm0, %v2364_v7  ;;  %2786 = vst.msk [vmem:[#allocation2 + $0x48] sm:$0xff] %vm2776_vm0, %v2365_v46  ;;  %v1232_v59 = vcombine.low %v1029_v39, %v1061_v48  ;;  %v1233_v28 = vcombine.high %v1029_v39, %v1061_v48  ;;  %v1780_v53 = vrot.slane %v1772_v16, %v7765_v49 }
 0x31f   : > { %2794 = vst.msk [vmem:[#allocation2 + $0x88] sm:$0xff] %vm2776_vm0, %v2366_v3  ;;  %2802 = vst.msk [vmem:[#allocation2 + $0xc8] sm:$0xff] %vm2776_vm0, %v2367_v50  ;;  %v2816_v17 = vrot.slane %v2809_v37, %v7765_v49  ;;  %v2824_v45 = vrot.slane %v6070_v31, %v7765_v49  ;;  %v2832_v43 = vrot.slane %v2825_v40, %v7765_v49 }
 0x320   : > { %v2840_v10 = vrot.slane %v6071_v44, %v7765_v49  ;;  %v1787_v57 = vrot.slane %v1773_v20, %v7765_v49  ;;  %v1240_v51 = vrot.slane %v1232_v59, %v7765_v49  ;;  %v1247_v21 = vrot.slane %v1233_v28, %v7765_v49 }
 0x321   : > { %v2841_v4 = vcombine.low %v2816_v17, %v2824_v45  ;;  %v2842_v26 = vcombine.high %v2816_v17, %v2824_v45  ;;  %v1788_v13 = vcombine.low %v7806_v22, %v1780_v53  ;;  %v1789_v27 = vcombine.high %v7806_v22, %v1780_v53 }
 0x322   : > { %v2857_v6 = vcombine.low %v2832_v43, %v2840_v10  ;;  %v2858_v39 = vcombine.high %v2832_v43, %v2840_v10  ;;  %v1804_v24 = vcombine.low %v7812_v62, %v1787_v57  ;;  %v1805_v29 = vcombine.high %v7812_v62, %v1787_v57 }
 0x323   : > { %v2849_v30 = vrot.slane %v2841_v4, %v7768_v42  ;;  %v2856_v38 = vrot.slane %v2842_v26, %v7768_v42  ;;  %v1796_v46 = vrot.slane %v1788_v13, %v7768_v42  ;;  %v1803_v3 = vrot.slane %v1789_v27, %v7768_v42  ;;  %v1669_v26 = vpop.permute.xlu0 %1668 }
 0x324   : > { %v2865_v48 = vrot.slane %v2857_v6, %v7768_v42  ;;  %v2872_v7 = vrot.slane %v2858_v39, %v7768_v42  ;;  %v1812_v22 = vrot.slane %v1804_v24, %v7768_v42  ;;  %v1819_v50 = vrot.slane %v1805_v29, %v7768_v42  ;;  %v1063_v6 = vpop.permute.xlu1 %1062 }
 0x325   : > { %v2877_v44 = vcombine.low %v1796_v46, %v1803_v3  ;;  %v6072_v16 = vcombine.high %v1796_v46, %v1803_v3  ;;  %v1248_v28 = vcombine.low %v7818_v23, %v1240_v51  ;;  %v1249_v17 = vcombine.high %v7818_v23, %v1240_v51 }
 0x326   : > { %v2873_v37 = vcombine.low %v2849_v30, %v2865_v48  ;;  %v2874_v62 = vcombine.high %v2849_v30, %v2865_v48  ;;  %v2875_v31 = vcombine.low %v2856_v38, %v2872_v7  ;;  %v2876_v40 = vcombine.high %v2856_v38, %v2872_v7 }
 0x327   : > { %v2893_v20 = vcombine.low %v1812_v22, %v1819_v50  ;;  %v6073_v59 = vcombine.high %v1812_v22, %v1819_v50  ;;  %v1264_v45 = vcombine.low %v7824_v54, %v1247_v21  ;;  %v1265_v43 = vcombine.high %v7824_v54, %v1247_v21 }
 0x328   : > { %3353 = vst.msk [vmem:[#allocation3] sm:$0xff] %vm2776_vm0, %v2873_v37  ;;  %3361 = vst.msk [vmem:[#allocation3 + $0x40] sm:$0xff] %vm2776_vm0, %v2874_v62  ;;  %v2884_v10 = vrot.slane %v2877_v44, %v7765_v49  ;;  %v2892_v53 = vrot.slane %v6072_v16, %v7765_v49  ;;  %v1256_v39 = vrot.slane %v1248_v28, %v7768_v42  ;;  %v8056_v28 = vpop.permute.xlu1 %1670 }
 0x329   : > { %3369 = vst.msk [vmem:[#allocation3 + $0x80] sm:$0xff] %vm2776_vm0, %v2875_v31  ;;  %3377 = vst.msk [vmem:[#allocation3 + $0xc0] sm:$0xff] %vm2776_vm0, %v2876_v40  ;;  %v2900_v57 = vrot.slane %v2893_v20, %v7765_v49  ;;  %v2908_v4 = vrot.slane %v6073_v59, %v7765_v49  ;;  %v1263_v13 = vrot.slane %v1249_v17, %v7768_v42  ;;  %v8054_v59 = vpop.permute.xlu0 %1032 }
 0x32a   : > { %v1272_v23 = vrot.slane %v1264_v45, %v7768_v42  ;;  %v1279_v51 = vrot.slane %v1265_v43, %v7768_v42  ;;  %v2909_v27 = vcombine.low %v2884_v10, %v2892_v53  ;;  %v2910_v54 = vcombine.high %v2884_v10, %v2892_v53 }
 0x32b   : > { %v2925_v21 = vcombine.low %v2900_v57, %v2908_v4  ;;  %v2926_v24 = vcombine.high %v2900_v57, %v2908_v4  ;;  %v2368_v29 = vcombine.low %v1256_v39, %v1263_v13  ;;  %v6058_v30 = vcombine.high %v1256_v39, %v1263_v13 }
 0x32c   : > { %v2384_v38 = vcombine.low %v1272_v23, %v1279_v51  ;;  %v6059_v48 = vcombine.high %v1272_v23, %v1279_v51  ;;  %v2917_v7 = vrot.slane %v2909_v27, %v7768_v42  ;;  %v2924_v46 = vrot.slane %v2910_v54, %v7768_v42 }
 0x32d   : > { %v2933_v3 = vrot.slane %v2925_v21, %v7768_v42  ;;  %v2940_v22 = vrot.slane %v2926_v24, %v7768_v42  ;;  %v2375_v50 = vrot.slane %v2368_v29, %v7765_v49  ;;  %v2383_v37 = vrot.slane %v6058_v30, %v7765_v49 }
 0x32e   : > { %v2391_v62 = vrot.slane %v2384_v38, %v7765_v49  ;;  %v2399_v31 = vrot.slane %v6059_v48, %v7765_v49  ;;  %v1840_v53 = vcombine.low %v7976_v34, %v1669_v26  ;;  %v1841_v57 = vcombine.high %v7976_v34, %v1669_v26 }
 0x32f   : > { %v2941_v40 = vcombine.low %v2917_v7, %v2933_v3  ;;  %v2942_v44 = vcombine.high %v2917_v7, %v2933_v3  ;;  %v2943_v16 = vcombine.low %v2924_v46, %v2940_v22  ;;  %v2944_v20 = vcombine.high %v2924_v46, %v2940_v22  ;;  %v8078_v46 = vpop.permute.xlu0 %1640  ;;  %v8080_v3 = vpop.permute.xlu1 %1034 }
 0x330   : > { %v2400_v17 = vcombine.low %v2375_v50, %v2383_v37  ;;  %v2401_v45 = vcombine.high %v2375_v50, %v2383_v37  ;;  %v2416_v43 = vcombine.low %v2391_v62, %v2399_v31  ;;  %v2417_v10 = vcombine.high %v2391_v62, %v2399_v31 }
 0x331   : > { %3354 = vst.msk [vmem:[#allocation3 + $0x8] sm:$0xff] %vm2776_vm0, %v2941_v40  ;;  %3362 = vst.msk [vmem:[#allocation3 + $0x48] sm:$0xff] %vm2776_vm0, %v2942_v44  ;;  %v1300_v4 = vcombine.low %v7998_v52, %v1063_v6  ;;  %v1301_v39 = vcombine.high %v7998_v52, %v1063_v6  ;;  %v1848_v54 = vrot.slane %v1840_v53, %v7765_v49 }
 0x332   : > { %3370 = vst.msk [vmem:[#allocation3 + $0x88] sm:$0xff] %vm2776_vm0, %v2943_v16  ;;  %3378 = vst.msk [vmem:[#allocation3 + $0xc8] sm:$0xff] %vm2776_vm0, %v2944_v20  ;;  %v2408_v13 = vrot.slane %v2400_v17, %v7768_v42  ;;  %v2415_v23 = vrot.slane %v2401_v45, %v7768_v42  ;;  %v2424_v51 = vrot.slane %v2416_v43, %v7768_v42 }
 0x333   : > { %v2431_v27 = vrot.slane %v2417_v10, %v7768_v42  ;;  %v1855_v21 = vrot.slane %v1841_v57, %v7765_v49  ;;  %v1308_v24 = vrot.slane %v1300_v4, %v7765_v49  ;;  %v1315_v34 = vrot.slane %v1301_v39, %v7765_v49 }
 0x334   : > { %v2432_v26 = vcombine.low %v2408_v13, %v2424_v51  ;;  %v2433_v29 = vcombine.high %v2408_v13, %v2424_v51  ;;  %v1856_v6 = vcombine.low %v7830_v55, %v1848_v54  ;;  %v1857_v38 = vcombine.high %v7830_v55, %v1848_v54  ;;  %v8102_v54 = vpop.permute.xlu1 %1642 }
 0x335   : > { %v2434_v30 = vcombine.low %v2415_v23, %v2431_v27  ;;  %v2435_v52 = vcombine.high %v2415_v23, %v2431_v27  ;;  %v1872_v48 = vcombine.low %v7836_v56, %v1855_v21  ;;  %v1873_v7 = vcombine.high %v7836_v56, %v1855_v21  ;;  %v1065_v27 = vpop.permute.xlu0 %1064 }
 0x336   : > { %2779 = vst.msk [vmem:[#allocation2 + $0x10] sm:$0xff] %vm2776_vm0, %v2432_v26  ;;  %2787 = vst.msk [vmem:[#allocation2 + $0x50] sm:$0xff] %vm2776_vm0, %v2433_v29  ;;  %v1316_v22 = vcombine.low %v7842_v25, %v1308_v24  ;;  %v1317_v55 = vcombine.high %v7842_v25, %v1308_v24  ;;  %v1332_v50 = vcombine.low %v7848_v9, %v1315_v34 }
 0x337   : > { %2795 = vst.msk [vmem:[#allocation2 + $0x90] sm:$0xff] %vm2776_vm0, %v2434_v30  ;;  %2803 = vst.msk [vmem:[#allocation2 + $0xd0] sm:$0xff] %vm2776_vm0, %v2435_v52  ;;  %v1333_v56 = vcombine.high %v7848_v9, %v1315_v34  ;;  %v1864_v37 = vrot.slane %v1856_v6, %v7768_v42  ;;  %v1871_v62 = vrot.slane %v1857_v38, %v7768_v42 }
 0x338   : > { %v1880_v31 = vrot.slane %v1872_v48, %v7768_v42  ;;  %v1887_v40 = vrot.slane %v1873_v7, %v7768_v42  ;;  %v1324_v44 = vrot.slane %v1316_v22, %v7768_v42  ;;  %v1331_v16 = vrot.slane %v1317_v55, %v7768_v42 }
 0x339   : > { %v1340_v20 = vrot.slane %v1332_v50, %v7768_v42  ;;  %v1347_v25 = vrot.slane %v1333_v56, %v7768_v42  ;;  %v2945_v17 = vcombine.low %v1864_v37, %v1871_v62  ;;  %v6074_v45 = vcombine.high %v1864_v37, %v1871_v62 }
 0x33a   : > { %v2961_v43 = vcombine.low %v1880_v31, %v1887_v40  ;;  %v6075_v9 = vcombine.high %v1880_v31, %v1887_v40  ;;  %v2436_v10 = vcombine.low %v1324_v44, %v1331_v16  ;;  %v6060_v53 = vcombine.high %v1324_v44, %v1331_v16 }
 0x33b   : > { %v2452_v57 = vcombine.low %v1340_v20, %v1347_v25  ;;  %v6061_v4 = vcombine.high %v1340_v20, %v1347_v25  ;;  %v2952_v39 = vrot.slane %v2945_v17, %v7765_v49  ;;  %v2960_v13 = vrot.slane %v6074_v45, %v7765_v49  ;;  %v1673_v45 = vpop.permute.xlu0 %1672 }
 0x33c   : > { %v2968_v23 = vrot.slane %v2961_v43, %v7765_v49  ;;  %v2976_v51 = vrot.slane %v6075_v9, %v7765_v49  ;;  %v2443_v21 = vrot.slane %v2436_v10, %v7765_v49  ;;  %v2451_v24 = vrot.slane %v6060_v53, %v7765_v49  ;;  %v1067_v43 = vpop.permute.xlu1 %1066 }
 0x33d   : > { %v2459_v34 = vrot.slane %v2452_v57, %v7765_v49  ;;  %v2467_v26 = vrot.slane %v6061_v4, %v7765_v49  ;;  %v2977_v29 = vcombine.low %v2952_v39, %v2960_v13  ;;  %v2978_v30 = vcombine.high %v2952_v39, %v2960_v13 }
 0x33e   : > { %v2993_v52 = vcombine.low %v2968_v23, %v2976_v51  ;;  %v2994_v6 = vcombine.high %v2968_v23, %v2976_v51  ;;  %v2468_v38 = vcombine.low %v2443_v21, %v2451_v24  ;;  %v2469_v48 = vcombine.high %v2443_v21, %v2451_v24 }
 0x33f   : > { %v2484_v7 = vcombine.low %v2459_v34, %v2467_v26  ;;  %v2485_v22 = vcombine.high %v2459_v34, %v2467_v26  ;;  %v2985_v55 = vrot.slane %v2977_v29, %v7768_v42  ;;  %v2992_v50 = vrot.slane %v2978_v30, %v7768_v42 }
 0x340   : > { %v3001_v56 = vrot.slane %v2993_v52, %v7768_v42  ;;  %v3008_v37 = vrot.slane %v2994_v6, %v7768_v42  ;;  %v2476_v62 = vrot.slane %v2468_v38, %v7768_v42  ;;  %v2483_v31 = vrot.slane %v2469_v48, %v7768_v42 }
 0x341   : > { %v2492_v40 = vrot.slane %v2484_v7, %v7768_v42  ;;  %v2499_v44 = vrot.slane %v2485_v22, %v7768_v42  ;;  %v1908_v4 = vcombine.low %v8020_v11, %v8056_v28  ;;  %v1909_v39 = vcombine.high %v8020_v11, %v8056_v28 }
 0x342   : > { %v3009_v16 = vcombine.low %v2985_v55, %v3001_v56  ;;  %v3010_v20 = vcombine.high %v2985_v55, %v3001_v56  ;;  %v3011_v25 = vcombine.low %v2992_v50, %v3008_v37  ;;  %v3012_v17 = vcombine.high %v2992_v50, %v3008_v37 }
 0x343   : > { %v2500_v9 = vcombine.low %v2476_v62, %v2492_v40  ;;  %v2501_v10 = vcombine.high %v2476_v62, %v2492_v40  ;;  %v2502_v53 = vcombine.low %v2483_v31, %v2499_v44  ;;  %v2503_v57 = vcombine.high %v2483_v31, %v2499_v44 }
 0x344   : > { %3355 = vst.msk [vmem:[#allocation3 + $0x10] sm:$0xff] %vm2776_vm0, %v3009_v16  ;;  %3363 = vst.msk [vmem:[#allocation3 + $0x50] sm:$0xff] %vm2776_vm0, %v3010_v20  ;;  %v1368_v13 = vcombine.low %v8054_v59, %v1065_v27  ;;  %v1369_v23 = vcombine.high %v8054_v59, %v1065_v27  ;;  %v1976_v51 = vcombine.low %v8078_v46, %v1673_v45 }
 0x345   : > { %3371 = vst.msk [vmem:[#allocation3 + $0x90] sm:$0xff] %vm2776_vm0, %v3011_v25  ;;  %3379 = vst.msk [vmem:[#allocation3 + $0xd0] sm:$0xff] %vm2776_vm0, %v3012_v17  ;;  %v1977_v21 = vcombine.high %v8078_v46, %v1673_v45  ;;  %v1436_v24 = vcombine.low %v8080_v3, %v1067_v43  ;;  %v1437_v11 = vcombine.high %v8080_v3, %v1067_v43 }
 0x346   : > { %2780 = vst.msk [vmem:[#allocation2 + $0x18] sm:$0xff] %vm2776_vm0, %v2500_v9  ;;  %2788 = vst.msk [vmem:[#allocation2 + $0x58] sm:$0xff] %vm2776_vm0, %v2501_v10  ;;  %v1916_v28 = vrot.slane %v1908_v4, %v7765_v49  ;;  %v1923_v59 = vrot.slane %v1909_v39, %v7765_v49  ;;  %v1376_v27 = vrot.slane %v1368_v13, %v7765_v49 }
 0x347   : > { %2796 = vst.msk [vmem:[#allocation2 + $0x98] sm:$0xff] %vm2776_vm0, %v2502_v53  ;;  %2804 = vst.msk [vmem:[#allocation2 + $0xd8] sm:$0xff] %vm2776_vm0, %v2503_v57  ;;  %v1383_v34 = vrot.slane %v1369_v23, %v7765_v49  ;;  %v8139_v26 = vrot.slane %v1976_v51, %v7765_v49  ;;  %v8142_v29 = vrot.slane %v1977_v21, %v7765_v49 }
 0x348   : > { %v8145_v46 = vrot.slane %v1436_v24, %v7765_v49  ;;  %v8148_v30 = vrot.slane %v1437_v11, %v7765_v49  ;;  %v1924_v3 = vcombine.low %v7854_v5, %v1916_v28  ;;  %v1925_v52 = vcombine.high %v7854_v5, %v1916_v28  ;;  %v8174_v11 = vpop.permute.xlu0 %1036  ;;  %v8176_v28 = vpop.permute.xlu1 %1674 }
 0x349   : > { %v1940_v6 = vcombine.low %v7860_v60, %v1923_v59  ;;  %v1941_v38 = vcombine.high %v7860_v60, %v1923_v59  ;;  %v1384_v48 = vcombine.low %v7866_v61, %v1376_v27  ;;  %v1385_v7 = vcombine.high %v7866_v61, %v1376_v27 }
 0x34a   : > { %v1400_v22 = vcombine.low %v7872_v12, %v1383_v34  ;;  %v1401_v55 = vcombine.high %v7872_v12, %v1383_v34  ;;  %v1932_v50 = vrot.slane %v1924_v3, %v7768_v42  ;;  %v1939_v56 = vrot.slane %v1925_v52, %v7768_v42 }
 0x34b   : > { %v1948_v37 = vrot.slane %v1940_v6, %v7768_v42  ;;  %v1955_v5 = vrot.slane %v1941_v38, %v7768_v42  ;;  %v1392_v62 = vrot.slane %v1384_v48, %v7768_v42  ;;  %v1399_v60 = vrot.slane %v1385_v7, %v7768_v42 }
 0x34c   : > { %v1408_v31 = vrot.slane %v1400_v22, %v7768_v42  ;;  %v1415_v61 = vrot.slane %v1401_v55, %v7768_v42  ;;  %v3013_v40 = vcombine.low %v1932_v50, %v1939_v56  ;;  %v6076_v44 = vcombine.high %v1932_v50, %v1939_v56 }
 0x34d   : > { %v3029_v16 = vcombine.low %v1948_v37, %v1955_v5  ;;  %v6077_v12 = vcombine.high %v1948_v37, %v1955_v5  ;;  %v2504_v20 = vcombine.low %v1392_v62, %v1399_v60  ;;  %v6062_v25 = vcombine.high %v1392_v62, %v1399_v60 }
 0x34e   : > { %v2520_v17 = vcombine.low %v1408_v31, %v1415_v61  ;;  %v6063_v45 = vcombine.high %v1408_v31, %v1415_v61  ;;  %v3020_v43 = vrot.slane %v3013_v40, %v7765_v49  ;;  %v3028_v9 = vrot.slane %v6076_v44, %v7765_v49 }
 0x34f   : > { %v3036_v10 = vrot.slane %v3029_v16, %v7765_v49  ;;  %v3044_v53 = vrot.slane %v6077_v12, %v7765_v49  ;;  %v2511_v57 = vrot.slane %v2504_v20, %v7765_v49  ;;  %v2519_v4 = vrot.slane %v6062_v25, %v7765_v49  ;;  %v8198_v25 = vpop.permute.xlu0 %1644 }
 0x350   : > { %v2527_v39 = vrot.slane %v2520_v17, %v7765_v49  ;;  %v2535_v13 = vrot.slane %v6063_v45, %v7765_v49  ;;  %v3045_v23 = vcombine.low %v3020_v43, %v3028_v9  ;;  %v3046_v51 = vcombine.high %v3020_v43, %v3028_v9  ;;  %v8200_v17 = vpop.permute.xlu1 %1038 }
 0x351   : > { %v3061_v21 = vcombine.low %v3036_v10, %v3044_v53  ;;  %v3062_v24 = vcombine.high %v3036_v10, %v3044_v53  ;;  %v2536_v59 = vcombine.low %v2511_v57, %v2519_v4  ;;  %v2537_v27 = vcombine.high %v2511_v57, %v2519_v4 }
 0x352   : > { %v2552_v34 = vcombine.low %v2527_v39, %v2535_v13  ;;  %v2553_v3 = vcombine.high %v2527_v39, %v2535_v13  ;;  %v3053_v52 = vrot.slane %v3045_v23, %v7768_v42  ;;  %v3060_v6 = vrot.slane %v3046_v51, %v7768_v42 }
 0x353   : > { %v3069_v38 = vrot.slane %v3061_v21, %v7768_v42  ;;  %v3076_v48 = vrot.slane %v3062_v24, %v7768_v42  ;;  %v2544_v7 = vrot.slane %v2536_v59, %v7768_v42  ;;  %v2551_v22 = vrot.slane %v2537_v27, %v7768_v42 }
 0x354   : > { %v2560_v55 = vrot.slane %v2552_v34, %v7768_v42  ;;  %v2567_v50 = vrot.slane %v2553_v3, %v7768_v42  ;;  %v1992_v44 = vcombine.low %v7878_v19, %v8139_v26  ;;  %v1993_v16 = vcombine.high %v7878_v19, %v8139_v26  ;;  %v1069_v3 = vpop.permute.xlu0 %1068 }
 0x355   : > { %v3077_v56 = vcombine.low %v3053_v52, %v3069_v38  ;;  %v3078_v37 = vcombine.high %v3053_v52, %v3069_v38  ;;  %v3079_v5 = vcombine.low %v3060_v6, %v3076_v48  ;;  %v3080_v62 = vcombine.high %v3060_v6, %v3076_v48  ;;  %v8226_v52 = vpop.permute.xlu1 %1646 }
 0x356   : > { %v2568_v60 = vcombine.low %v2544_v7, %v2560_v55  ;;  %v2569_v31 = vcombine.high %v2544_v7, %v2560_v55  ;;  %v2570_v61 = vcombine.low %v2551_v22, %v2567_v50  ;;  %v2571_v40 = vcombine.high %v2551_v22, %v2567_v50 }
 0x357   : > { %3356 = vst.msk [vmem:[#allocation3 + $0x18] sm:$0xff] %vm2776_vm0, %v3077_v56  ;;  %3364 = vst.msk [vmem:[#allocation3 + $0x58] sm:$0xff] %vm2776_vm0, %v3078_v37  ;;  %v2008_v12 = vcombine.low %v7884_v2, %v8142_v29  ;;  %v2009_v20 = vcombine.high %v7884_v2, %v8142_v29  ;;  %v1452_v19 = vcombine.low %v7892_v32, %v8145_v46 }
 0x358   : > { %3372 = vst.msk [vmem:[#allocation3 + $0x98] sm:$0xff] %vm2776_vm0, %v3079_v5  ;;  %3380 = vst.msk [vmem:[#allocation3 + $0xd8] sm:$0xff] %vm2776_vm0, %v3080_v62  ;;  %v1453_v26 = vcombine.high %v7892_v32, %v8145_v46  ;;  %v1468_v2 = vcombine.low %v7898_v8, %v8148_v30  ;;  %v1469_v29 = vcombine.high %v7898_v8, %v8148_v30 }
 0x359   : > { %2781 = vst.msk [vmem:[#allocation2 + $0x20] sm:$0xff] %vm2776_vm0, %v2568_v60  ;;  %2789 = vst.msk [vmem:[#allocation2 + $0x60] sm:$0xff] %vm2776_vm0, %v2569_v31  ;;  %v2000_v45 = vrot.slane %v1992_v44, %v7768_v42  ;;  %v2007_v43 = vrot.slane %v1993_v16, %v7768_v42  ;;  %v2016_v9 = vrot.slane %v2008_v12, %v7768_v42 }
 0x35a   : > { %2797 = vst.msk [vmem:[#allocation2 + $0xa0] sm:$0xff] %vm2776_vm0, %v2570_v61  ;;  %2805 = vst.msk [vmem:[#allocation2 + $0xe0] sm:$0xff] %vm2776_vm0, %v2571_v40  ;;  %v2023_v10 = vrot.slane %v2009_v20, %v7768_v42  ;;  %v1460_v53 = vrot.slane %v1452_v19, %v7768_v42  ;;  %v1467_v57 = vrot.slane %v1453_v26, %v7768_v42 }
 0x35b   : > { %v1476_v32 = vrot.slane %v1468_v2, %v7768_v42  ;;  %v1483_v46 = vrot.slane %v1469_v29, %v7768_v42  ;;  %v3081_v4 = vcombine.low %v2000_v45, %v2007_v43  ;;  %v6078_v39 = vcombine.high %v2000_v45, %v2007_v43  ;;  %v1677_v43 = vpop.permute.xlu0 %1676 }
 0x35c   : > { %v3097_v13 = vcombine.low %v2016_v9, %v2023_v10  ;;  %v6079_v8 = vcombine.high %v2016_v9, %v2023_v10  ;;  %v2572_v30 = vcombine.low %v1460_v53, %v1467_v57  ;;  %v6064_v23 = vcombine.high %v1460_v53, %v1467_v57  ;;  %v1071_v9 = vpop.permute.xlu1 %1070 }
 0x35d   : > { %v2588_v51 = vcombine.low %v1476_v32, %v1483_v46  ;;  %v6065_v21 = vcombine.high %v1476_v32, %v1483_v46  ;;  %v3088_v24 = vrot.slane %v3081_v4, %v7765_v49  ;;  %v3096_v59 = vrot.slane %v6078_v39, %v7765_v49 }
 0x35e   : > { %v3104_v27 = vrot.slane %v3097_v13, %v7765_v49  ;;  %v3112_v34 = vrot.slane %v6079_v8, %v7765_v49  ;;  %v2579_v6 = vrot.slane %v2572_v30, %v7765_v49  ;;  %v2587_v38 = vrot.slane %v6064_v23, %v7765_v49 }
 0x35f   : > { %v2595_v48 = vrot.slane %v2588_v51, %v7765_v49  ;;  %v2603_v7 = vrot.slane %v6065_v21, %v7765_v49  ;;  %v3113_v22 = vcombine.low %v3088_v24, %v3096_v59  ;;  %v3114_v55 = vcombine.high %v3088_v24, %v3096_v59 }
 0x360   : > { %v3129_v50 = vcombine.low %v3104_v27, %v3112_v34  ;;  %v3130_v56 = vcombine.high %v3104_v27, %v3112_v34  ;;  %v2604_v37 = vcombine.low %v2579_v6, %v2587_v38  ;;  %v2605_v5 = vcombine.high %v2579_v6, %v2587_v38 }
 0x361   : > { %v2620_v62 = vcombine.low %v2595_v48, %v2603_v7  ;;  %v2621_v60 = vcombine.high %v2595_v48, %v2603_v7  ;;  %v3121_v31 = vrot.slane %v3113_v22, %v7768_v42  ;;  %v3128_v61 = vrot.slane %v3114_v55, %v7768_v42 }
 0x362   : > { %v3137_v40 = vrot.slane %v3129_v50, %v7768_v42  ;;  %v3144_v44 = vrot.slane %v3130_v56, %v7768_v42  ;;  %v2612_v16 = vrot.slane %v2604_v37, %v7768_v42  ;;  %v2619_v12 = vrot.slane %v2605_v5, %v7768_v42 }
 0x363   : > { %v2628_v20 = vrot.slane %v2620_v62, %v7768_v42  ;;  %v2635_v19 = vrot.slane %v2621_v60, %v7768_v42  ;;  %v2044_v46 = vcombine.low %v8102_v54, %v8176_v28  ;;  %v2045_v4 = vcombine.high %v8102_v54, %v8176_v28 }
 0x364   : > { %v3145_v26 = vcombine.low %v3121_v31, %v3137_v40  ;;  %v3146_v2 = vcombine.high %v3121_v31, %v3137_v40  ;;  %v3147_v29 = vcombine.low %v3128_v61, %v3144_v44  ;;  %v3148_v45 = vcombine.high %v3128_v61, %v3144_v44 }
 0x365   : > { %v2636_v10 = vcombine.low %v2612_v16, %v2628_v20  ;;  %v2637_v53 = vcombine.high %v2612_v16, %v2628_v20  ;;  %v2638_v57 = vcombine.low %v2619_v12, %v2635_v19  ;;  %v2639_v32 = vcombine.high %v2619_v12, %v2635_v19 }
 0x366   : > { %3357 = vst.msk [vmem:[#allocation3 + $0x20] sm:$0xff] %vm2776_vm0, %v3145_v26  ;;  %3365 = vst.msk [vmem:[#allocation3 + $0x60] sm:$0xff] %vm2776_vm0, %v3146_v2  ;;  %v1504_v39 = vcombine.low %v8174_v11, %v1069_v3  ;;  %v1505_v13 = vcombine.high %v8174_v11, %v1069_v3  ;;  %v2112_v8 = vcombine.low %v8198_v25, %v1677_v43 }
 0x367   : > { %3373 = vst.msk [vmem:[#allocation3 + $0xa0] sm:$0xff] %vm2776_vm0, %v3147_v29  ;;  %3381 = vst.msk [vmem:[#allocation3 + $0xe0] sm:$0xff] %vm2776_vm0, %v3148_v45  ;;  %v2113_v30 = vcombine.high %v8198_v25, %v1677_v43  ;;  %v1572_v23 = vcombine.low %v8200_v17, %v1071_v9  ;;  %v1573_v54 = vcombine.high %v8200_v17, %v1071_v9 }
 0x368   : > { %2782 = vst.msk [vmem:[#allocation2 + $0x28] sm:$0xff] %vm2776_vm0, %v2636_v10  ;;  %2790 = vst.msk [vmem:[#allocation2 + $0x68] sm:$0xff] %vm2776_vm0, %v2637_v53  ;;  %v2052_v28 = vrot.slane %v2044_v46, %v7765_v49  ;;  %v2059_v11 = vrot.slane %v2045_v4, %v7765_v49  ;;  %v1512_v51 = vrot.slane %v1504_v39, %v7765_v49 }
 0x369   : > { %2798 = vst.msk [vmem:[#allocation2 + $0xa8] sm:$0xff] %vm2776_vm0, %v2638_v57  ;;  %2806 = vst.msk [vmem:[#allocation2 + $0xe8] sm:$0xff] %vm2776_vm0, %v2639_v32  ;;  %v1519_v21 = vrot.slane %v1505_v13, %v7765_v49  ;;  %v8263_v24 = vrot.slane %v2112_v8, %v7765_v49  ;;  %v8266_v59 = vrot.slane %v2113_v30, %v7765_v49 }
 0x36a   : > { %v8269_v25 = vrot.slane %v1572_v23, %v7765_v49  ;;  %v8272_v27 = vrot.slane %v1573_v54, %v7765_v49  ;;  %v2060_v17 = vcombine.low %v7904_v36, %v2052_v28  ;;  %v2061_v34 = vcombine.high %v7904_v36, %v2052_v28 }
 0x36b   : > { %v2076_v3 = vcombine.low %v7910_v41, %v2059_v11  ;;  %v2077_v6 = vcombine.high %v7910_v41, %v2059_v11  ;;  %v1520_v38 = vcombine.low %v7916_v15, %v1512_v51  ;;  %v1521_v48 = vcombine.high %v7916_v15, %v1512_v51 }
 0x36c   : > { %v1536_v7 = vcombine.low %v7922_v47, %v1519_v21  ;;  %v1537_v22 = vcombine.high %v7922_v47, %v1519_v21  ;;  %v2068_v55 = vrot.slane %v2060_v17, %v7768_v42  ;;  %v2075_v50 = vrot.slane %v2061_v34, %v7768_v42 }
 0x36d   : > { %v2084_v56 = vrot.slane %v2076_v3, %v7768_v42  ;;  %v2091_v36 = vrot.slane %v2077_v6, %v7768_v42  ;;  %v1528_v37 = vrot.slane %v1520_v38, %v7768_v42  ;;  %v1535_v41 = vrot.slane %v1521_v48, %v7768_v42 }
 0x36e   : > { %v1544_v5 = vrot.slane %v1536_v7, %v7768_v42  ;;  %v1551_v15 = vrot.slane %v1537_v22, %v7768_v42  ;;  %v3149_v62 = vcombine.low %v2068_v55, %v2075_v50  ;;  %v6080_v60 = vcombine.high %v2068_v55, %v2075_v50 }
 0x36f   : > { %v3165_v31 = vcombine.low %v2084_v56, %v2091_v36  ;;  %v6081_v47 = vcombine.high %v2084_v56, %v2091_v36  ;;  %v2640_v61 = vcombine.low %v1528_v37, %v1535_v41  ;;  %v6066_v40 = vcombine.high %v1528_v37, %v1535_v41 }
 0x370   : > { %v2656_v44 = vcombine.low %v1544_v5, %v1551_v15  ;;  %v6067_v16 = vcombine.high %v1544_v5, %v1551_v15  ;;  %v3156_v12 = vrot.slane %v3149_v62, %v7765_v49  ;;  %v3164_v20 = vrot.slane %v6080_v60, %v7765_v49 }
 0x371   : > { %v3172_v19 = vrot.slane %v3165_v31, %v7765_v49  ;;  %v3180_v26 = vrot.slane %v6081_v47, %v7765_v49  ;;  %v2647_v2 = vrot.slane %v2640_v61, %v7765_v49  ;;  %v2655_v29 = vrot.slane %v6066_v40, %v7765_v49 }
 0x372   : > { %v2663_v45 = vrot.slane %v2656_v44, %v7765_v49  ;;  %v2671_v43 = vrot.slane %v6067_v16, %v7765_v49  ;;  %v3181_v9 = vcombine.low %v3156_v12, %v3164_v20  ;;  %v3182_v10 = vcombine.high %v3156_v12, %v3164_v20 }
 0x373   : > { %v3197_v53 = vcombine.low %v3172_v19, %v3180_v26  ;;  %v3198_v57 = vcombine.high %v3172_v19, %v3180_v26  ;;  %v2672_v32 = vcombine.low %v2647_v2, %v2655_v29  ;;  %v2673_v46 = vcombine.high %v2647_v2, %v2655_v29 }
 0x374   : > { %v2688_v4 = vcombine.low %v2663_v45, %v2671_v43  ;;  %v2689_v39 = vcombine.high %v2663_v45, %v2671_v43  ;;  %v3189_v13 = vrot.slane %v3181_v9, %v7768_v42  ;;  %v3196_v8 = vrot.slane %v3182_v10, %v7768_v42 }
 0x375   : > { %v3205_v30 = vrot.slane %v3197_v53, %v7768_v42  ;;  %v3212_v23 = vrot.slane %v3198_v57, %v7768_v42  ;;  %v2680_v54 = vrot.slane %v2672_v32, %v7768_v42  ;;  %v2687_v28 = vrot.slane %v2673_v46, %v7768_v42 }
 0x376   : > { %v2696_v11 = vrot.slane %v2688_v4, %v7768_v42  ;;  %v2703_v51 = vrot.slane %v2689_v39, %v7768_v42  ;;  %v2128_v22 = vcombine.low %v7942_v14, %v8263_v24  ;;  %v2129_v55 = vcombine.high %v7942_v14, %v8263_v24 }
 0x377   : > { %v3213_v21 = vcombine.low %v3189_v13, %v3205_v30  ;;  %v3214_v17 = vcombine.high %v3189_v13, %v3205_v30  ;;  %v3215_v34 = vcombine.low %v3196_v8, %v3212_v23  ;;  %v3216_v3 = vcombine.high %v3196_v8, %v3212_v23 }
 0x378   : > { %v2704_v6 = vcombine.low %v2680_v54, %v2696_v11  ;;  %v2705_v38 = vcombine.high %v2680_v54, %v2696_v11  ;;  %v2706_v48 = vcombine.low %v2687_v28, %v2703_v51  ;;  %v2707_v7 = vcombine.high %v2687_v28, %v2703_v51  ;;  %v1679_v51 = vpop.permute.xlu1 %1678 }
 0x379   : > { %3358 = vst.msk [vmem:[#allocation3 + $0x28] sm:$0xff] %vm2776_vm0, %v3213_v21  ;;  %3366 = vst.msk [vmem:[#allocation3 + $0x68] sm:$0xff] %vm2776_vm0, %v3214_v17  ;;  %v2144_v50 = vcombine.low %v7948_v35, %v8266_v59  ;;  %v2145_v56 = vcombine.high %v7948_v35, %v8266_v59  ;;  %v1588_v36 = vcombine.low %v7930_v63, %v8269_v25 }
 0x37a   : > { %3374 = vst.msk [vmem:[#allocation3 + $0xa8] sm:$0xff] %vm2776_vm0, %v3215_v34  ;;  %3382 = vst.msk [vmem:[#allocation3 + $0xe8] sm:$0xff] %vm2776_vm0, %v3216_v3  ;;  %v1589_v14 = vcombine.high %v7930_v63, %v8269_v25  ;;  %v1604_v24 = vcombine.low %v7936_v58, %v8272_v27  ;;  %v1605_v35 = vcombine.high %v7936_v58, %v8272_v27 }
 0x37b   : > { %2783 = vst.msk [vmem:[#allocation2 + $0x30] sm:$0xff] %vm2776_vm0, %v2704_v6  ;;  %2791 = vst.msk [vmem:[#allocation2 + $0x70] sm:$0xff] %vm2776_vm0, %v2705_v38  ;;  %v2136_v59 = vrot.slane %v2128_v22, %v7768_v42  ;;  %v2143_v37 = vrot.slane %v2129_v55, %v7768_v42  ;;  %v2152_v41 = vrot.slane %v2144_v50, %v7768_v42 }
 0x37c   : > { %2799 = vst.msk [vmem:[#allocation2 + $0xb0] sm:$0xff] %vm2776_vm0, %v2706_v48  ;;  %2807 = vst.msk [vmem:[#allocation2 + $0xf0] sm:$0xff] %vm2776_vm0, %v2707_v7  ;;  %v2159_v5 = vrot.slane %v2145_v56, %v7768_v42  ;;  %v1596_v15 = vrot.slane %v1588_v36, %v7768_v42  ;;  %v1603_v62 = vrot.slane %v1589_v14, %v7768_v42 }
 0x37d   : > { %v1612_v63 = vrot.slane %v1604_v24, %v7768_v42  ;;  %v1619_v25 = vrot.slane %v1605_v35, %v7768_v42  ;;  %v3217_v60 = vcombine.low %v2136_v59, %v2143_v37  ;;  %v6082_v31 = vcombine.high %v2136_v59, %v2143_v37 }
 0x37e   : > { %v3233_v47 = vcombine.low %v2152_v41, %v2159_v5  ;;  %v6083_v58 = vcombine.high %v2152_v41, %v2159_v5  ;;  %v2708_v27 = vcombine.low %v1596_v15, %v1603_v62  ;;  %v6068_v61 = vcombine.high %v1596_v15, %v1603_v62 }
 0x37f   : > { %v2724_v40 = vcombine.low %v1612_v63, %v1619_v25  ;;  %v6069_v44 = vcombine.high %v1612_v63, %v1619_v25  ;;  %v3224_v16 = vrot.slane %v3217_v60, %v7765_v49  ;;  %v3232_v12 = vrot.slane %v6082_v31, %v7765_v49 }
 0x380   : > { %v3240_v20 = vrot.slane %v3233_v47, %v7765_v49  ;;  %v3248_v19 = vrot.slane %v6083_v58, %v7765_v49  ;;  %v2715_v26 = vrot.slane %v2708_v27, %v7765_v49  ;;  %v2723_v2 = vrot.slane %v6068_v61, %v7765_v49 }
 0x381   : > { %v2731_v29 = vrot.slane %v2724_v40, %v7765_v49  ;;  %v2739_v45 = vrot.slane %v6069_v44, %v7765_v49  ;;  %v3249_v43 = vcombine.low %v3224_v16, %v3232_v12  ;;  %v3250_v9 = vcombine.high %v3224_v16, %v3232_v12 }
 0x382   : > { %v3265_v10 = vcombine.low %v3240_v20, %v3248_v19  ;;  %v3266_v53 = vcombine.high %v3240_v20, %v3248_v19  ;;  %v2740_v57 = vcombine.low %v2715_v26, %v2723_v2  ;;  %v2741_v32 = vcombine.high %v2715_v26, %v2723_v2 }
 0x383   : > { %v2756_v46 = vcombine.low %v2731_v29, %v2739_v45  ;;  %v2757_v4 = vcombine.high %v2731_v29, %v2739_v45  ;;  %v3257_v39 = vrot.slane %v3249_v43, %v7768_v42  ;;  %v3264_v13 = vrot.slane %v3250_v9, %v7768_v42 }
 0x384   : > { %v3273_v8 = vrot.slane %v3265_v10, %v7768_v42  ;;  %v3280_v30 = vrot.slane %v3266_v53, %v7768_v42  ;;  %v2748_v23 = vrot.slane %v2740_v57, %v7768_v42  ;;  %v2755_v54 = vrot.slane %v2741_v32, %v7768_v42 }
 0x385   : > { %v2764_v28 = vrot.slane %v2756_v46, %v7768_v42  ;;  %v2771_v11 = vrot.slane %v2757_v4, %v7768_v42  ;;  %v2180_v22 = vcombine.low %v8226_v52, %v1679_v51  ;;  %v2181_v55 = vcombine.high %v8226_v52, %v1679_v51 }
 0x386   : > { %v3281_v21 = vcombine.low %v3257_v39, %v3273_v8  ;;  %v3282_v17 = vcombine.high %v3257_v39, %v3273_v8  ;;  %v3283_v34 = vcombine.low %v3264_v13, %v3280_v30  ;;  %v3284_v3 = vcombine.high %v3264_v13, %v3280_v30 }
 0x387   : > { %v2772_v6 = vcombine.low %v2748_v23, %v2764_v28  ;;  %v2773_v38 = vcombine.high %v2748_v23, %v2764_v28  ;;  %v2774_v48 = vcombine.low %v2755_v54, %v2771_v11  ;;  %v2775_v7 = vcombine.high %v2755_v54, %v2771_v11 }
 0x388   : > { %3359 = vst.msk [vmem:[#allocation3 + $0x30] sm:$0xff] %vm2776_vm0, %v3281_v21  ;;  %3367 = vst.msk [vmem:[#allocation3 + $0x70] sm:$0xff] %vm2776_vm0, %v3282_v17  ;;  %v9063_v50 = vcombine.low %v7710_v33, %v7716_v18  ;;  %v9064_v36 = vcombine.high %v7710_v33, %v7716_v18  ;;  %v2188_v52 = vrot.slane %v2180_v22, %v7765_v49 }
 0x389   : > { %3375 = vst.msk [vmem:[#allocation3 + $0xb0] sm:$0xff] %vm2776_vm0, %v3283_v34  ;;  %3383 = vst.msk [vmem:[#allocation3 + $0xf0] sm:$0xff] %vm2776_vm0, %v3284_v3  ;;  %v2195_v24 = vrot.slane %v2181_v55, %v7765_v49 }
 0x38a   : > { %2784 = vst.msk [vmem:[#allocation2 + $0x38] sm:$0xff] %vm2776_vm0, %v2772_v6  ;;  %2792 = vst.msk [vmem:[#allocation2 + $0x78] sm:$0xff] %vm2776_vm0, %v2773_v38  ;;  %v2172_v56 = vrot.slane %v9063_v50, %v7765_v49  ;;  %v2179_v14 = vrot.slane %v9064_v36, %v7765_v49 }
 0x38b   : > { %2800 = vst.msk [vmem:[#allocation2 + $0xb8] sm:$0xff] %vm2776_vm0, %v2774_v48  ;;  %2808 = vst.msk [vmem:[#allocation2 + $0xf8] sm:$0xff] %vm2776_vm0, %v2775_v7 }
 0x38c   : > { %v2196_v35 = vcombine.low %v2172_v56, %v2188_v52  ;;  %v2197_v59 = vcombine.high %v2172_v56, %v2188_v52  ;;  %v2212_v37 = vcombine.low %v2179_v14, %v2195_v24  ;;  %v2213_v41 = vcombine.high %v2179_v14, %v2195_v24 }
 0x38e   : > { %v2204_v5 = vrot.slane %v2196_v35, %v7768_v42  ;;  %v2211_v15 = vrot.slane %v2197_v59, %v7768_v42  ;;  %v2220_v62 = vrot.slane %v2212_v37, %v7768_v42  ;;  %v2227_v63 = vrot.slane %v2213_v41, %v7768_v42 }
 0x390   : > { %v3285_v25 = vcombine.low %v2204_v5, %v2211_v15  ;;  %v6084_v60 = vcombine.high %v2204_v5, %v2211_v15  ;;  %v3301_v33 = vcombine.low %v2220_v62, %v2227_v63  ;;  %v6085_v18 = vcombine.high %v2220_v62, %v2227_v63 }
 0x392   : > { %v3292_v31 = vrot.slane %v3285_v25, %v7765_v49  ;;  %v3300_v47 = vrot.slane %v6084_v60, %v7765_v49  ;;  %v3308_v58 = vrot.slane %v3301_v33, %v7765_v49  ;;  %v3316_v27 = vrot.slane %v6085_v18, %v7765_v49 }
 0x394   : > { %v3317_v61 = vcombine.low %v3292_v31, %v3300_v47  ;;  %v3318_v40 = vcombine.high %v3292_v31, %v3300_v47  ;;  %v3333_v44 = vcombine.low %v3308_v58, %v3316_v27  ;;  %v3334_v16 = vcombine.high %v3308_v58, %v3316_v27 }
 0x396   : > { %v3325_v12 = vrot.slane %v3317_v61, %v7768_v42  ;;  %v3332_v20 = vrot.slane %v3318_v40, %v7768_v42  ;;  %v3341_v19 = vrot.slane %v3333_v44, %v7768_v42  ;;  %v3348_v26 = vrot.slane %v3334_v16, %v7768_v42 }
 0x398   : > { %v3349_v2 = vcombine.low %v3325_v12, %v3341_v19  ;;  %v3350_v29 = vcombine.high %v3325_v12, %v3341_v19  ;;  %v3351_v45 = vcombine.low %v3332_v20, %v3348_v26  ;;  %v3352_v43 = vcombine.high %v3332_v20, %v3348_v26 }
 0x39a   : > { %3360 = vst.msk [vmem:[#allocation3 + $0x38] sm:$0xff] %vm2776_vm0, %v3349_v2  ;;  %3368 = vst.msk [vmem:[#allocation3 + $0x78] sm:$0xff] %vm2776_vm0, %v3350_v29 }
 0x39b   : > { %3376 = vst.msk [vmem:[#allocation3 + $0xb8] sm:$0xff] %vm2776_vm0, %v3351_v45  ;;  %3384 = vst.msk [vmem:[#allocation3 + $0xf8] sm:$0xff] %vm2776_vm0, %v3352_v43 }
 0x39c PF: > { %s6086_s27 = sshll.u32 %s6987_s15, 5  ;;  %v3533_v30 = vld [vmem:[#allocation9 + $0xf8] sm:$0xff]  ;;  %v3532_v23 = vld [vmem:[#allocation9 + $0xf0] sm:$0xff]  ;;  %v3531_v54 = vld [vmem:[#allocation9 + $0xe8] sm:$0xff]  ;;  %vm4307_vm1 = vcmask 523264   ;;  %s7019_s7 = smov 64  }
 0x39d   : > { %s3386_s16 = sshra.s32 %s6086_s27, 3  ;;  %3578 = vmatprep.subr.mxu0 %v3533_v30  ;;  %v3530_v28 = vld [vmem:[#allocation9 + $0xe0] sm:$0xff]  ;;  %v3529_v11 = vld [vmem:[#allocation9 + $0xd8] sm:$0xff]  ;;  %v3528_v51 = vld [vmem:[#allocation9 + $0xd0] sm:$0xff]  ;;  %s9065_s17 = sld [smem:[#allocation32_spill]] }
 0x39e   : > { %s6185_s4 = sshll.u32 %s3386_s16, 4  ;;  %3579 = vmatpush1.msra.mxu0 %v3532_v23  ;;  %v3527_v21 = vld [vmem:[#allocation9 + $0xc8] sm:$0xff]  ;;  %v3526_v17 = vld [vmem:[#allocation9 + $0xc0] sm:$0xff]  ;;  %v3525_v34 = vld [vmem:[#allocation9 + $0xb8] sm:$0xff]  ;;  %s9066_s20 = sld [smem:[#allocation21_spill]] }
 0x39f   : > { %s3390_s29 = scalar_lea.vmem %s7278_s24, %s6185_s4 [#allocation4]  ;;  %3580 = vmatprep.subr.mxu0 %v3531_v54  ;;  %v3524_v3 = vld [vmem:[#allocation9 + $0xb0] sm:$0xff]  ;;  %v3523_v6 = vld [vmem:[#allocation9 + $0xa8] sm:$0xff]  ;;  %v3522_v38 = vld [vmem:[#allocation9 + $0xa0] sm:$0xff]  ;;  %s6186_s24 = sshll.u32 %s6987_s15, 3 }
 0x3a0   : > { %v8392_v42 = vld [vmem:[%s3390_s29] sm:$0xff]  ;;  %v8394_v49 = vld [vmem:[%s3390_s29 + $0x8] sm:$0xff]  ;;  %v8402_v57 = vld [vmem:[%s3390_s29 + $0x10] sm:$0xff]  ;;  %3581 = vmatpush1.msra.mxu0 %v3530_v28  ;;  %s5896_s15 = sshll.u32 %s7306_s26, 4  ;;  %s9067_s22 = sld [smem:[#allocation33_spill]]  ;;  %s8926_s15 = int_to_ptr.vmem [resolvable:$true] %s5896_s15 }
 0x3a1   : > { %v8396_v9 = vld [vmem:[%s3390_s29 + $0x20] sm:$0xff]  ;;  %v3399_v10 = vadd.f32 %v8394_v49, %v8392_v42  ;;  %v8400_v53 = vld [vmem:[%s3390_s29 + $0x28] sm:$0xff]  ;;  %v8404_v32 = vld [vmem:[%s3390_s29 + $0x18] sm:$0xff]  ;;  %3582 = vmatprep.subr.mxu0 %v3529_v11  ;;  %s8937_s16 = scalar_lea.sflag [#allocation6], %s431_s18  ;;  %s6871_s4 = scalar_lea.vmem %s8926_s15, 1024 }
 0x3a2   : > { %v3405_v46 = vadd.f32 %v8400_v53, %v8396_v9  ;;  %v8408_v4 = vld [vmem:[%s3390_s29 + $0x30] sm:$0xff]  ;;  %v8410_v39 = vld [vmem:[%s3390_s29 + $0x38] sm:$0xff]  ;;  %v3402_v13 = vadd.f32 %v8404_v32, %v8402_v57  ;;  %3583 = vmatpush1.msra.mxu0 %v3528_v51  ;;  %v3518_v55 = vld [vmem:[#allocation9 + $0x80] sm:$0xff]  ;;  %p6872_p6 = scmp.ne.s32.totalorder %s8926_s15, %s6871_s4  ;;  %s7022_s29 = smov [#allocation15]  }
 0x3a3   : > { %3400 = vadd.xlane.f32.xlu0 %v3399_v10  ;;  %v3408_v8 = vadd.f32 %v8410_v39, %v8408_v4  ;;  %3584 = vmatprep.subr.mxu0 %v3527_v21  ;;  %v3521_v48 = vld [vmem:[#allocation9 + $0x98] sm:$0xff]  ;;  %v3520_v7 = vld [vmem:[#allocation9 + $0x90] sm:$0xff]  ;;  %v3519_v22 = vld [vmem:[#allocation9 + $0x88] sm:$0xff] }
 0x3a4   : > { %3406 = vadd.xlane.f32.xlu1 %v3405_v46  ;;  %3585 = vmatpush1.msra.mxu0 %v3526_v17  ;;  %v3517_v50 = vld [vmem:[#allocation9 + $0x78] sm:$0xff]  ;;  %v3516_v56 = vld [vmem:[#allocation9 + $0x70] sm:$0xff]  ;;  %v3515_v36 = vld [vmem:[#allocation9 + $0x68] sm:$0xff]  ;;  %s6180_s23 = sshll.u32 %s9066_s20, 4  ;;  %p6873_p9 = pnand %p6872_p6, %p7242_p3 }
 0x3a5   : > { %3586 = vmatprep.subr.mxu0 %v3525_v34  ;;  %v3514_v14 = vld [vmem:[#allocation9 + $0x60] sm:$0xff]  ;;  %v3513_v52 = vld [vmem:[#allocation9 + $0x58] sm:$0xff]  ;;  %v3512_v24 = vld [vmem:[#allocation9 + $0x50] sm:$0xff]  ;;  %s5893_s8 = sadd.s32 %s6186_s24, %s6180_s23 }
 0x3a6   : > { %3587 = vmatpush1.msra.mxu0 %v3524_v3  ;;  %v3511_v35 = vld [vmem:[#allocation9 + $0x48] sm:$0xff]  ;;  %v3510_v59 = vld [vmem:[#allocation9 + $0x40] sm:$0xff]  ;;  %v3509_v37 = vld [vmem:[#allocation9 + $0x38] sm:$0xff]  ;;  %s6181_s25 = sshll.u32 %s5893_s8, 7  ;;  %p6874_p11 = pneg %p6873_p9 }
 0x3a7   : > { %3403 = vadd.xlane.f32.xlu0 %v3402_v13  ;;  %3588 = vmatprep.subr.mxu0 %v3523_v6  ;;  %v3508_v41 = vld [vmem:[#allocation9 + $0x30] sm:$0xff]  ;;  %v3507_v5 = vld [vmem:[#allocation9 + $0x28] sm:$0xff]  ;;  %v3506_v15 = vld [vmem:[#allocation9 + $0x20] sm:$0xff]  ;;  %s8932_s27 = scalar_lea.hbm %s9067_s22, %s6181_s25 }
 0x3a8   : > { %3409 = vadd.xlane.f32.xlu1 %v3408_v8  ;;  %3589 = vmatpush1.msra.mxu0 %v3522_v38  ;;  %v3505_v62 = vld [vmem:[#allocation9 + $0x18] sm:$0xff]  ;;  %v3504_v63 = vld [vmem:[#allocation9 + $0x10] sm:$0xff]  ;;  %v3503_v25 = vld [vmem:[#allocation9 + $0x8] sm:$0xff] }
 0x3a9   : > { %3590 = vmatprep.subr.mxu0 %v3521_v48  ;;  %v3502_v60 = vld [vmem:[#allocation9] sm:$0xff]  ;;  %v3565_v33 = vld [vmem:[#allocation9 + $0x1f8] sm:$0xff]  ;;  %v3564_v18 = vld [vmem:[#allocation9 + $0x1f0] sm:$0xff] }
 0x3aa   : > { %3591 = vmatpush1.msra.mxu0 %v3520_v7  ;;  %v3563_v31 = vld [vmem:[#allocation9 + $0x1e8] sm:$0xff]  ;;  %v3562_v47 = vld [vmem:[#allocation9 + $0x1e0] sm:$0xff]  ;;  %v3561_v58 = vld [vmem:[#allocation9 + $0x1d8] sm:$0xff] }
 0x3ab   : > { %3592 = vmatprep.subr.mxu0 %v3519_v22  ;;  %v3560_v27 = vld [vmem:[#allocation9 + $0x1d0] sm:$0xff]  ;;  %v3559_v61 = vld [vmem:[#allocation9 + $0x1c8] sm:$0xff]  ;;  %v3557_v21 = vld [vmem:[#allocation9 + $0x1b8] sm:$0xff] }
 0x3ac   : > { %3593 = vmatpush1.msra.mxu0 %v3518_v55  ;;  %v3556_v17 = vld [vmem:[#allocation9 + $0x1b0] sm:$0xff]  ;;  %v3555_v34 = vld [vmem:[#allocation9 + $0x1a8] sm:$0xff]  ;;  %v3554_v3 = vld [vmem:[#allocation9 + $0x1a0] sm:$0xff] }
 0x3ad   : > { %3594 = vmatprep.subr.mxu0 %v3517_v50  ;;  %v3553_v6 = vld [vmem:[#allocation9 + $0x198] sm:$0xff]  ;;  %v3552_v38 = vld [vmem:[#allocation9 + $0x190] sm:$0xff]  ;;  %v3551_v48 = vld [vmem:[#allocation9 + $0x188] sm:$0xff] }
 0x3ae   : > { %3595 = vmatpush1.msra.mxu0 %v3516_v56  ;;  %v3550_v7 = vld [vmem:[#allocation9 + $0x180] sm:$0xff]  ;;  %v3549_v22 = vld [vmem:[#allocation9 + $0x178] sm:$0xff]  ;;  %v3548_v55 = vld [vmem:[#allocation9 + $0x170] sm:$0xff] }
 0x3af   : > { %3596 = vmatprep.subr.mxu0 %v3515_v36  ;;  %v3547_v50 = vld [vmem:[#allocation9 + $0x168] sm:$0xff]  ;;  %v3546_v56 = vld [vmem:[#allocation9 + $0x160] sm:$0xff]  ;;  %v3545_v36 = vld [vmem:[#allocation9 + $0x158] sm:$0xff] }
 0x3b0   : > { %3597 = vmatpush1.msra.mxu0 %v3514_v14  ;;  %v3544_v14 = vld [vmem:[#allocation9 + $0x150] sm:$0xff] }
 0x3b1   : > { %3598 = vmatprep.subr.mxu0 %v3513_v52  ;;  %v3543_v52 = vld [vmem:[#allocation9 + $0x148] sm:$0xff] }
 0x3b2   : > { %3599 = vmatpush1.msra.mxu0 %v3512_v24  ;;  %v3542_v24 = vld [vmem:[#allocation9 + $0x140] sm:$0xff] }
 0x3b3   : > { %3600 = vmatprep.subr.mxu0 %v3511_v35  ;;  %v3541_v35 = vld [vmem:[#allocation9 + $0x138] sm:$0xff] }
 0x3b4   : > { %3601 = vmatpush1.msra.mxu0 %v3510_v59  ;;  %v3540_v59 = vld [vmem:[#allocation9 + $0x130] sm:$0xff] }
 0x3b5   : > { %3602 = vmatprep.subr.mxu0 %v3509_v37  ;;  %v3539_v37 = vld [vmem:[#allocation9 + $0x128] sm:$0xff] }
 0x3b6   : > { %3603 = vmatpush1.msra.mxu0 %v3508_v41  ;;  %v3538_v41 = vld [vmem:[#allocation9 + $0x120] sm:$0xff] }
 0x3b7   : > { %3604 = vmatprep.subr.mxu0 %v3507_v5  ;;  %v3537_v5 = vld [vmem:[#allocation9 + $0x118] sm:$0xff] }
 0x3b8   : > { %3605 = vmatpush1.msra.mxu0 %v3506_v15  ;;  %v3536_v15 = vld [vmem:[#allocation9 + $0x110] sm:$0xff] }
 0x3b9   : > { %3606 = vmatprep.subr.mxu0 %v3505_v62  ;;  %v3535_v62 = vld [vmem:[#allocation9 + $0x108] sm:$0xff] }
 0x3ba   : > { %3607 = vmatpush1.msra.mxu0 %v3504_v63  ;;  %v3534_v63 = vld [vmem:[#allocation9 + $0x100] sm:$0xff] }
 0x3bb   : > { %3608 = vmatprep.subr.mxu0 %v3503_v25 }
 0x3bc   : > { %3609 = vmatpush1.msra.mxu0 %v3502_v60 }
 0x3bd   : > { %3610 = vmatprep.subr.mxu0 %v3565_v33 }
 0x3be   : > { %3611 = vmatpush2.msra.mxu0 %v3564_v18 }
 0x3bf   : > { %3612 = vmatprep.subr.mxu0 %v3563_v31 }
 0x3c0   : > { %3613 = vmatpush2.msra.mxu0 %v3562_v47 }
 0x3c1   : > { %3614 = vmatprep.subr.mxu0 %v3561_v58 }
 0x3c2   : > { %3615 = vmatpush2.msra.mxu0 %v3560_v27  ;;  %v3465_v27 = vlaneseq }
 0x3c3   : > { %3616 = vmatprep.subr.mxu0 %v3559_v61 }
 0x42c   : > { %v3401_v40 = vpop.xlane.xlu0 %3400 }
 0x42d   : > { %v3412_v44 = vmul.f32 0.00390625, %v3401_v40  ;;  %v3407_v16 = vpop.xlane.xlu1 %3406 }
 0x42e   : > { %v3414_v12 = vmul.f32 0.00390625, %v3407_v16 }
 0x42f   : > { %v8417_v20 = vsub.f32 %v8392_v42, %v3412_v44  ;;  %v8420_v19 = vsub.f32 %v8394_v49, %v3412_v44 }
 0x430   : > { %v8423_v26 = vsub.f32 %v8396_v9, %v3414_v12  ;;  %v8426_v2 = vsub.f32 %v8400_v53, %v3414_v12  ;;  %v3404_v29 = vpop.xlane.xlu0 %3403  ;;  %v8456_v12 = vshrl.u32 %v3465_v27, 7 }
 0x431   : > { %v3413_v45 = vmul.f32 0.00390625, %v3404_v29  ;;  %v3410_v43 = vpop.xlane.xlu1 %3409  ;;  %v3424_v10 = vmul.f32 %v8417_v20, %v8417_v20  ;;  %v3425_v46 = vmul.f32 %v8420_v19, %v8420_v19 }
 0x432   : > { %v3415_v42 = vmul.f32 0.00390625, %v3410_v43  ;;  %v3428_v49 = vmul.f32 %v8423_v26, %v8423_v26  ;;  %v3429_v9 = vmul.f32 %v8426_v2, %v8426_v2  ;;  %v8462_v43 = vsub.s32 0, %v8456_v12 }
 0x433   : > { %v8437_v13 = vsub.f32 %v8402_v57, %v3413_v45  ;;  %v8440_v53 = vsub.f32 %v8404_v32, %v3413_v45  ;;  %v3432_v8 = vadd.f32 %v3425_v46, %v3424_v10  ;;  %v8459_v45 = vsub.s32 1, %v8456_v12 }
 0x434   : > { %v8443_v30 = vsub.f32 %v8408_v4, %v3415_v42  ;;  %v8446_v23 = vsub.f32 %v8410_v39, %v3415_v42  ;;  %v3438_v54 = vadd.f32 %v3429_v9, %v3428_v49  ;;  %v3558_v39 = vld [vmem:[#allocation9 + $0x1c0] sm:$0xff]  ;;  %v3468_v46 = vrot.slane %v7299_v0, %v8462_v43 }
 0x435   : > { %3433 = vadd.xlane.f32.xlu0 %v3432_v8  ;;  %v3426_v28 = vmul.f32 %v8437_v13, %v8437_v13  ;;  %v3427_v11 = vmul.f32 %v8440_v53, %v8440_v53  ;;  %3617 = vmatpush2.msra.mxu0 %v3558_v39  ;;  %v3472_v10 = vrot.slane %v7299_v0, %v8459_v45 }
 0x436   : > { %v3430_v57 = vmul.f32 %v8443_v30, %v8443_v30  ;;  %v3431_v32 = vmul.f32 %v8446_v23, %v8446_v23  ;;  %3618 = vmatprep.subr.mxu0 %v3557_v21  ;;  %v3491_v9 = vrot.slane %v7304_v1, %v8459_v45 }
 0x437   : > { %v3435_v51 = vadd.f32 %v3427_v11, %v3426_v28  ;;  %3619 = vmatpush2.msra.mxu0 %v3556_v17 }
 0x438   : > { %v3441_v4 = vadd.f32 %v3431_v32, %v3430_v57  ;;  %3620 = vmatprep.subr.mxu0 %v3555_v34 }
 0x439   : > { %3439 = vadd.xlane.f32.xlu0 %v3438_v54  ;;  %3436 = vadd.xlane.f32.xlu1 %v3435_v51  ;;  %v3487_v54 = vrot.slane %v7304_v1, %v8462_v43 }
 0x43a   : > { %3621 = vmatpush2.msra.mxu0 %v3554_v3 }
 0x43b   : > { %3622 = vmatprep.subr.mxu0 %v3553_v6 }
 0x43c   : > { %3623 = vmatpush2.msra.mxu0 %v3552_v38 }
 0x43d   : > { %3442 = vadd.xlane.f32.xlu1 %v3441_v4  ;;  %3624 = vmatprep.subr.mxu0 %v3551_v48 }
 0x43e   : > { %3625 = vmatpush2.msra.mxu0 %v3550_v7 }
 0x43f   : > { %3626 = vmatprep.subr.mxu0 %v3549_v22 }
 0x440   : > { %3627 = vmatpush2.msra.mxu0 %v3548_v55 }
 0x441   : > { %3628 = vmatprep.subr.mxu0 %v3547_v50  ;;  %v4250_v50 = vld [vmem:[#allocation2 + $0x38] sm:$0xff] }
 0x442   : > { %3629 = vmatpush2.msra.mxu0 %v3546_v56  ;;  %v4266_v56 = vld [vmem:[#allocation2 + $0xb8] sm:$0xff]  ;;  %6283 = vmatprep.subr.msk.mxu1 %vm4307_vm1, %v4250_v50 }
 0x443   : > { %3630 = vmatprep.subr.mxu0 %v3545_v36  ;;  %v4249_v36 = vld [vmem:[#allocation2 + $0x30] sm:$0xff]  ;;  %6284 = vmatpush3.xpose.msk.msra.mxu1 %vm4307_vm1, %v4250_v50 }
 0x444   : > { %3631 = vmatpush2.msra.mxu0 %v3544_v14  ;;  %6285 = vmatprep.subr.msk.mxu1 %vm4307_vm1, %v4249_v36  ;;  %v3566_v14 = vld [vmem:[#allocation10] sm:$0x3] }
 0x445   : > { %3632 = vmatprep.subr.mxu0 %v3543_v52  ;;  %v4264_v52 = vld [vmem:[#allocation2 + $0xa8] sm:$0xff] }
 0x446   : > { %3633 = vmatpush2.msra.mxu0 %v3542_v24  ;;  %v7018_v24 = vmov 1983009808  }
 0x447   : > { %3634 = vmatprep.subr.mxu0 %v3541_v35  ;;  %6286 = vmatpush3.xpose.msk.msra.mxu1 %vm4307_vm1, %v4249_v36  ;;  %v3702_v35 = vunpack.c.l.s4 %v7018_v24 }
 0x448   : > { %3635 = vmatpush2.msra.mxu0 %v3540_v59  ;;  %v3571_v59 = vrot.slane %v3566_v14, %v8462_v43 }
 0x449   : > { %3636 = vmatprep.subr.mxu0 %v3539_v37  ;;  %v4247_v37 = vld [vmem:[#allocation2 + $0x20] sm:$0xff] }
 0x44a   : > { %3637 = vmatpush2.msra.mxu0 %v3538_v41  ;;  %v4263_v41 = vld [vmem:[#allocation2 + $0xa0] sm:$0xff] }
 0x44b   : > { %3638 = vmatprep.subr.mxu0 %v3537_v5  ;;  %v3703_v5 = vunpack.c.0.s8 %v3702_v35 }
 0x44c   : > { %3639 = vmatpush2.msra.mxu0 %v3536_v15  ;;  %v3575_v15 = vrot.slane %v3566_v14, %v8459_v45 }
 0x44d   : > { %3640 = vmatprep.subr.mxu0 %v3535_v62 }
 0x44e   : > { %3641 = vmatpush2.msra.mxu0 %v3534_v63 }
 0x44f   : > { %6327 = vmatprep.subr.msk.mxu0 %vm4307_vm1, %v4266_v56 }
 0x4be   : > { %v3434_v25 = vpop.xlane.xlu0 %3433 }
 0x4bf   : > { %v3444_v60 = vmul.f32 0.00390625, %v3434_v25  ;;  %v4246_v25 = vld [vmem:[#allocation2 + $0x18] sm:$0xff] }
 0x4c1   : > { %v3448_v33 = vadd.f32 1e-05, %v3444_v60 }
 0x4c2   : > { %v3437_v18 = vpop.xlane.xlu1 %3436  ;;  %v3440_v31 = vpop.xlane.xlu0 %3439 }
 0x4c3   : > { %6641 = vrsqrt.f32 %v3448_v33  ;;  %v3445_v47 = vmul.f32 0.00390625, %v3437_v18  ;;  %v3446_v58 = vmul.f32 0.00390625, %v3440_v31  ;;  %v4262_v33 = vld [vmem:[#allocation2 + $0x98] sm:$0xff]  ;;  %v8500_v18 = vsub.s32 %v3703_v5, %v8456_v12 }
 0x4c5   : > { %v3449_v61 = vadd.f32 1e-05, %v3445_v47  ;;  %v3450_v40 = vadd.f32 1e-05, %v3446_v58 }
 0x4c6   : > { %v3443_v44 = vpop.xlane.xlu1 %3442 }
 0x4c7   : > { %6643 = vrsqrt.f32 %v3449_v61  ;;  %v3447_v16 = vmul.f32 0.00390625, %v3443_v44  ;;  %v4245_v61 = vld [vmem:[#allocation2 + $0x10] sm:$0xff] }
 0x4c8   : > { %6645 = vrsqrt.f32 %v3450_v40 }
 0x4c9   : > { %v3451_v29 = vadd.f32 1e-05, %v3447_v16  ;;  %v4261_v16 = vld [vmem:[#allocation2 + $0x90] sm:$0xff] }
 0x4cb   : > { %6647 = vrsqrt.f32 %v3451_v29 }
 0x4d0   : > { %v6642_v42 = vpop.eup %6641 }
 0x4d1   : > { %v3457_v49 = vmul.f32 %v6642_v42, %v8420_v19  ;;  %v3456_v8 = vmul.f32 %v6642_v42, %v8417_v20 }
 0x4d3   : > { %v3476_v28 = vmul.f32 %v3472_v10, %v3457_v49  ;;  %v3475_v11 = vmul.f32 %v3468_v46, %v3456_v8 }
 0x4d4   : > { %v6644_v57 = vpop.eup %6643 }
 0x4d5   : > { %v6646_v32 = vpop.eup %6645  ;;  %v3495_v51 = vadd.f32 %v3491_v9, %v3476_v28  ;;  %v3494_v4 = vadd.f32 %v3487_v54, %v3475_v11  ;;  %v3459_v39 = vmul.f32 %v6644_v57, %v8440_v53  ;;  %v3458_v0 = vmul.f32 %v6644_v57, %v8437_v13 }
 0x4d6   : > { %v3461_v19 = vmul.f32 %v6646_v32, %v8426_v2  ;;  %v3460_v21 = vmul.f32 %v6646_v32, %v8423_v26 }
 0x4d7   : > { %3642 = vmatprep.mubr.f32.mxu0 %v3495_v51  ;;  %v3478_v17 = vmul.f32 %v3472_v10, %v3459_v39  ;;  %v3477_v20 = vmul.f32 %v3468_v46, %v3458_v0  ;;  %v4244_v51 = vld [vmem:[#allocation2 + $0x8] sm:$0xff] }
 0x4d8   : > { %v6648_v34 = vpop.eup %6647  ;;  %3643 = vmatmul.mubr.f32.vlgmr.msra.gmra.mxu0 %v3494_v4  ;;  %v3480_v1 = vmul.f32 %v3472_v10, %v3461_v19  ;;  %v3479_v48 = vmul.f32 %v3468_v46, %v3460_v21 }
 0x4d9   : > { %v3497_v3 = vadd.f32 %v3491_v9, %v3478_v17  ;;  %v3496_v6 = vadd.f32 %v3487_v54, %v3477_v20  ;;  %v3463_v38 = vmul.f32 %v6648_v34, %v8446_v23  ;;  %v3462_v7 = vmul.f32 %v6648_v34, %v8443_v30  ;;  %6328 = vmatpush3.xpose.msk.msra.mxu0 %vm4307_vm1, %v4266_v56  ;;  %v4265_v30 = vld [vmem:[#allocation2 + $0xb0] sm:$0xff]  ;;  %v4248_v23 = vld [vmem:[#allocation2 + $0x28] sm:$0xff] }
 0x4da   : > { %v3499_v53 = vadd.f32 %v3491_v9, %v3480_v1  ;;  %v3498_v2 = vadd.f32 %v3487_v54, %v3479_v48  ;;  %6329 = vmatprep.subr.msk.mxu0 %vm4307_vm1, %v4265_v30  ;;  %6287 = vmatprep.subr.msk.mxu1 %vm4307_vm1, %v4248_v23  ;;  %v4243_v48 = vld [vmem:[#allocation2] sm:$0xff] }
 0x4db   : > { %3648 = vmatprep.mubr.f32.mxu0 %v3497_v3  ;;  %v3482_v13 = vmul.f32 %v3472_v10, %v3463_v38  ;;  %v3481_v26 = vmul.f32 %v3468_v46, %v3462_v7  ;;  %6288 = vmatpush3.xpose.msk.msra.mxu1 %vm4307_vm1, %v4248_v23  ;;  %v4260_v38 = vld [vmem:[#allocation2 + $0x88] sm:$0xff]  ;;  %v4259_v7 = vld [vmem:[#allocation2 + $0x80] sm:$0xff] }
 0x4dc   : > { %3649 = vmatmul.mubr.f32.gmra.mxu0 %v3496_v6  ;;  %6289 = vmatprep.subr.msk.mxu1 %vm4307_vm1, %v4247_v37 }
 0x4dd   : > { %3654 = vmatprep.mubr.f32.mxu0 %v3499_v53  ;;  %v3501_v22 = vadd.f32 %v3491_v9, %v3482_v13  ;;  %v3500_v55 = vadd.f32 %v3487_v54, %v3481_v26  ;;  %6330 = vmatpush3.xpose.msk.msra.mxu0 %vm4307_vm1, %v4265_v30  ;;  %v8544_v53 = vld [vmem:[#allocation2 + $0x78] sm:$0xff]  ;;  %v7020_v13 = vmov 1934713408  }
 0x4de   : > { %6331 = vmatprep.subr.msk.mxu0 %vm4307_vm1, %v4264_v52 }
 0x4df   : > { %6290 = vmatpush3.xpose.msk.msra.mxu1 %vm4307_vm1, %v4247_v37 }
 0x4e0   : > { %3655 = vmatmul.mubr.f32.gmra.mxu0 %v3498_v2  ;;  %6291 = vmatprep.subr.msk.mxu1 %vm4307_vm1, %v4246_v25  ;;  %v3734_v2 = vunpack.c.l.s4 %v7020_v13 }
 0x4e1   : > { %3660 = vmatprep.mubr.f32.mxu0 %v3501_v22  ;;  %6332 = vmatpush3.xpose.msk.msra.mxu0 %vm4307_vm1, %v4264_v52 }
 0x4e2   : > { %6333 = vmatprep.subr.msk.mxu0 %vm4307_vm1, %v4263_v41  ;;  %v3735_v26 = vunpack.c.0.s8 %v3734_v2 }
 0x4e3   : > { %6292 = vmatpush3.xpose.msk.msra.mxu1 %vm4307_vm1, %v4246_v25 }
 0x4e4   : > { %3661 = vmatmul.mubr.f32.gmra.mxu0 %v3500_v55  ;;  %6293 = vmatprep.subr.msk.mxu1 %vm4307_vm1, %v4245_v61  ;;  %v8554_v36 = vsub.s32 %v3735_v26, %v8456_v12 }
 0x4e5   : > { %6334 = vmatpush3.xpose.msk.msra.mxu0 %vm4307_vm1, %v4263_v41 }
 0x4e6   : > { %6335 = vmatprep.subr.msk.mxu0 %vm4307_vm1, %v4262_v33 }
 0x4e7   : > { %6294 = vmatpush3.xpose.msk.msra.mxu1 %vm4307_vm1, %v4245_v61 }
 0x4e8   : > { %6295 = vmatprep.subr.msk.mxu1 %vm4307_vm1, %v4244_v51 }
 0x4e9   : > { %6336 = vmatpush3.xpose.msk.msra.mxu0 %vm4307_vm1, %v4262_v33 }
 0x4ea   : > { %6337 = vmatprep.subr.msk.mxu0 %vm4307_vm1, %v4261_v16 }
 0x4eb   : > { %6296 = vmatpush3.xpose.msk.msra.mxu1 %vm4307_vm1, %v4244_v51 }
 0x4ec   : > { %6297 = vmatprep.subr.msk.mxu1 %vm4307_vm1, %v4243_v48 }
 0x4ed   : > { %6338 = vmatpush3.xpose.msk.msra.mxu0 %vm4307_vm1, %v4261_v16 }
 0x4ee   : > { %6339 = vmatprep.subr.msk.mxu0 %vm4307_vm1, %v4260_v38 }
 0x4ef   : > { %6298 = vmatpush3.xpose.msk.msra.mxu1 %vm4307_vm1, %v4243_v48 }
 0x4f0   : > { %6305 = vmatprep.subr.msk.mxu1 %vm4307_vm1, %v8544_v53 }
 0x4f1   : > { %6340 = vmatpush3.xpose.msk.msra.mxu0 %vm4307_vm1, %v4260_v38 }
 0x4f2   : > { %6341 = vmatprep.subr.msk.mxu0 %vm4307_vm1, %v4259_v7 }
 0x4f5   : > { %6342 = vmatpush3.xpose.msk.msra.mxu0 %vm4307_vm1, %v4259_v7 }
 0x598   : > { %v3644_v62 = vpop.f32.mrf.mxu0 }
 0x599   : > { %v3645_v63 = vadd.f32 %v3644_v62, %v3571_v59 }
 0x59a   : > { %v3646_v60 = vpop.f32.mrf.mxu0 }
 0x59b   : > { %v3647_v31 = vadd.f32 %v3646_v60, %v3575_v15  ;;  %3671 = vrot.lane.b32.xlu0 %v3645_v63, %s7019_s7 }
 0x59c   : > { %v3650_v47 = vpop.f32.mrf.mxu0 }
 0x59d   : > { %v3699_v58 = vcombine.low %v3645_v63, %v3647_v31  ;;  %v3700_v27 = vcombine.high %v3645_v63, %v3647_v31  ;;  %3687 = vrot.lane.b32.xlu1 %v3647_v31, %s7019_s7  ;;  %v3651_v40 = vadd.f32 %v3650_v47, %v3571_v59 }
 0x59e   : > { %v3652_v44 = vpop.f32.mrf.mxu0 }
 0x59f   : > { %v8509_v29 = vrot.slane %v3699_v58, %v8500_v18  ;;  %v8512_v10 = vrot.slane %v3700_v27, %v8500_v18  ;;  %v3653_v46 = vadd.f32 %v3652_v44, %v3575_v15 }
 0x5a0   : > { %v3656_v42 = vpop.f32.mrf.mxu0 }
 0x5a1   : > { %v3767_v49 = vcombine.low %v3651_v40, %v3653_v46  ;;  %v3768_v9 = vcombine.high %v3651_v40, %v3653_v46  ;;  %v3657_v8 = vadd.f32 %v3656_v42, %v3571_v59  ;;  %3673 = vrot.lane.b32.xlu1 %v3651_v40, %s7019_s7 }
 0x5a2   : > { %v3658_v54 = vpop.f32.mrf.mxu0 }
 0x5a3   : > { %v8519_v28 = vrot.slane %v3767_v49, %v8500_v18  ;;  %v8522_v11 = vrot.slane %v3768_v9, %v8500_v18  ;;  %v3659_v57 = vadd.f32 %v3658_v54, %v3575_v15  ;;  %3675 = vrot.lane.b32.xlu0 %v3657_v8, %s7019_s7 }
 0x5a4   : > { %v3662_v32 = vpop.f32.mrf.mxu0 }
 0x5a5   : > { %v3835_v4 = vcombine.low %v3657_v8, %v3659_v57  ;;  %v3836_v39 = vcombine.high %v3657_v8, %v3659_v57  ;;  %v3663_v0 = vadd.f32 %v3662_v32, %v3571_v59  ;;  %3689 = vrot.lane.b32.xlu1 %v3653_v46, %s7019_s7 }
 0x5a6   : > { %v3664_v19 = vpop.f32.mrf.mxu0 }
 0x5a7   : > { %v8529_v21 = vrot.slane %v3835_v4, %v8500_v18  ;;  %v8532_v17 = vrot.slane %v3836_v39, %v8500_v18  ;;  %v3665_v20 = vadd.f32 %v3664_v19, %v3575_v15  ;;  %3677 = vrot.lane.b32.xlu0 %v3663_v0, %s7019_s7 }
 0x5a9   : > { %v3903_v34 = vcombine.low %v3663_v0, %v3665_v20  ;;  %v3904_v1 = vcombine.high %v3663_v0, %v3665_v20  ;;  %3691 = vrot.lane.b32.xlu1 %v3659_v57, %s7019_s7 }
 0x5ab   : > { %v8537_v3 = vrot.slane %v3903_v34, %v8500_v18  ;;  %v8540_v6 = vrot.slane %v3904_v1, %v8500_v18 }
 0x5ad   : > { %3693 = vrot.lane.b32.xlu1 %v3665_v20, %s7019_s7  ;;  %s6875_s7 = sshll.u32 %s7022_s29, 4  ;;  %s6876_s7 = int_to_ptr.vmem [resolvable:$false] %s6875_s7 }
 0x5ae   : > { %s6877_s28 = scalar_lea.vmem %s6876_s7, 2048  ;;  %p6878_p13 = scmp.lt.s32.totalorder %s8926_s15, %s6876_s7 }
 0x5af   : > { %p6879_p2 = scmp.lt.s32.totalorder %s6877_s28, %s6871_s4 }
 0x5b1   : > { %p6880_p4 = por %p6879_p2, %p6878_p13 }
 0x5b3   : > { %p6881_p10 = pnand %p6880_p4, %p6874_p11 }
 0x60d   : > { %v3672_v22 = vpop.permute.xlu0 %3671 }
 0x60f   : > { %v3688_v55 = vpop.permute.xlu1 %3687 }
 0x610   : > { %v3715_v50 = vcombine.low %v3672_v22, %v3688_v55  ;;  %v3716_v56 = vcombine.high %v3672_v22, %v3688_v55 }
 0x612   : > { %v3723_v30 = vrot.slane %v3715_v50, %v8500_v18  ;;  %v3730_v23 = vrot.slane %v3716_v56, %v8500_v18 }
 0x613   : > { %v3674_v14 = vpop.permute.xlu1 %3673 }
 0x614   : > { %v3731_v52 = vcombine.low %v8509_v29, %v3723_v30  ;;  %v3732_v24 = vcombine.high %v8509_v29, %v3723_v30  ;;  %v3747_v35 = vcombine.low %v8512_v10, %v3730_v23  ;;  %v3748_v59 = vcombine.high %v8512_v10, %v3730_v23 }
 0x615   : > { %v3676_v29 = vpop.permute.xlu0 %3675 }
 0x616   : > { %v3739_v37 = vrot.slane %v3731_v52, %v8554_v36  ;;  %v3746_v41 = vrot.slane %v3732_v24, %v8554_v36  ;;  %v3755_v12 = vrot.slane %v3747_v35, %v8554_v36  ;;  %v3762_v5 = vrot.slane %v3748_v59, %v8554_v36 }
 0x617   : > { %v3690_v15 = vpop.permute.xlu1 %3689 }
 0x618   : > { %v3783_v62 = vcombine.low %v3674_v14, %v3690_v15  ;;  %v3784_v63 = vcombine.high %v3674_v14, %v3690_v15  ;;  %v3971_v25 = vcombine.low %v3739_v37, %v3746_v41  ;;  %v6089_v60 = vcombine.high %v3739_v37, %v3746_v41 }
 0x619   : > { %v3987_v33 = vcombine.low %v3755_v12, %v3762_v5  ;;  %v6090_v31 = vcombine.high %v3755_v12, %v3762_v5  ;;  %v3678_v30 = vpop.permute.xlu0 %3677 }
 0x61a   : > { %v3791_v47 = vrot.slane %v3783_v62, %v8500_v18  ;;  %v3798_v58 = vrot.slane %v3784_v63, %v8500_v18  ;;  %v8569_v27 = vrot.slane %v3971_v25, %v8500_v18  ;;  %v3986_v61 = vrot.slane %v6089_v60, %v8500_v18 }
 0x61b   : > { %v3692_v40 = vpop.permute.xlu1 %3691  ;;  %v8573_v44 = vrot.slane %v3987_v33, %v8500_v18  ;;  %v8576_v16 = vrot.slane %v6090_v31, %v8500_v18 }
 0x61c   : > { %v3799_v10 = vcombine.low %v8519_v28, %v3791_v47  ;;  %v3800_v46 = vcombine.high %v8519_v28, %v3791_v47  ;;  %v3815_v42 = vcombine.low %v8522_v11, %v3798_v58  ;;  %v3816_v49 = vcombine.high %v8522_v11, %v3798_v58 }
 0x61d   : > { %v3851_v9 = vcombine.low %v3676_v29, %v3692_v40  ;;  %v3852_v8 = vcombine.high %v3676_v29, %v3692_v40  ;;  %v4003_v54 = vcombine.low %v8569_v27, %v3986_v61  ;;  %v4004_v57 = vcombine.high %v8569_v27, %v3986_v61 }
 0x61e   : > { %v3807_v32 = vrot.slane %v3799_v10, %v8554_v36  ;;  %v3814_v51 = vrot.slane %v3800_v46, %v8554_v36  ;;  %v3823_v4 = vrot.slane %v3815_v42, %v8554_v36  ;;  %v3830_v39 = vrot.slane %v3816_v49, %v8554_v36 }
 0x61f   : > { %v3859_v28 = vrot.slane %v3851_v9, %v8500_v18  ;;  %v3866_v0 = vrot.slane %v3852_v8, %v8500_v18  ;;  %v8591_v11 = vrot.slane %v4003_v54, %v8554_v36  ;;  %v4019_v19 = vcombine.low %v8573_v44, %v8576_v16  ;;  %v3694_v26 = vpop.permute.xlu1 %3693 }
 0x620   : > { %v4039_v20 = vcombine.low %v3807_v32, %v3814_v51  ;;  %v6091_v34 = vcombine.high %v3807_v32, %v3814_v51  ;;  %v4055_v1 = vcombine.low %v3823_v4, %v3830_v39  ;;  %v6092_v38 = vcombine.high %v3823_v4, %v3830_v39 }
 0x621   : > { %v3867_v48 = vcombine.low %v8529_v21, %v3859_v28  ;;  %v3868_v7 = vcombine.high %v8529_v21, %v3859_v28  ;;  %v3883_v13 = vcombine.low %v8532_v17, %v3866_v0  ;;  %v3884_v2 = vcombine.high %v8532_v17, %v3866_v0 }
 0x622   : > { %v4046_v22 = vrot.slane %v4039_v20, %v8500_v18  ;;  %v4054_v55 = vrot.slane %v6091_v34, %v8500_v18  ;;  %v4062_v50 = vrot.slane %v4055_v1, %v8500_v18  ;;  %v4070_v56 = vrot.slane %v6092_v38, %v8500_v18 }
 0x623   : > { %v3875_v23 = vrot.slane %v3867_v48, %v8554_v36  ;;  %v3882_v14 = vrot.slane %v3868_v7, %v8554_v36  ;;  %v3891_v21 = vrot.slane %v3883_v13, %v8554_v36  ;;  %v3898_v52 = vrot.slane %v3884_v2, %v8554_v36 }
 0x624   : > { %v4072_v24 = vcombine.high %v4046_v22, %v4054_v55  ;;  %v4088_v17 = vcombine.high %v4062_v50, %v4070_v56  ;;  %v3919_v35 = vcombine.low %v3678_v30, %v3694_v26  ;;  %v3920_v59 = vcombine.high %v3678_v30, %v3694_v26 }
 0x625   : > { %v4107_v37 = vcombine.low %v3875_v23, %v3882_v14  ;;  %v6093_v41 = vcombine.high %v3875_v23, %v3882_v14  ;;  %v4123_v12 = vcombine.low %v3891_v21, %v3898_v52  ;;  %v6094_v5 = vcombine.high %v3891_v21, %v3898_v52  ;;  %v4257_v23 = vld [vmem:[#allocation2 + $0x70] sm:$0xff] }
 0x626   : > { %v8608_v15 = vrot.slane %v4072_v24, %v8554_v36  ;;  %v8611_v62 = vrot.slane %v4088_v17, %v8554_v36  ;;  %v3927_v63 = vrot.slane %v3919_v35, %v8500_v18  ;;  %v3934_v25 = vrot.slane %v3920_v59, %v8500_v18 }
 0x627   : > { %v4114_v60 = vrot.slane %v4107_v37, %v8500_v18  ;;  %v4122_v33 = vrot.slane %v6093_v41, %v8500_v18  ;;  %v4130_v31 = vrot.slane %v4123_v12, %v8500_v18  ;;  %v4138_v47 = vrot.slane %v6094_v5, %v8500_v18 }
 0x628   : > { %v3935_v58 = vcombine.low %v8537_v3, %v3927_v63  ;;  %v3936_v27 = vcombine.high %v8537_v3, %v3927_v63  ;;  %v3951_v61 = vcombine.low %v8540_v6, %v3934_v25  ;;  %v3952_v40 = vcombine.high %v8540_v6, %v3934_v25 }
 0x629   : > { %v4020_v29 = vcombine.high %v8573_v44, %v8576_v16  ;;  %v8626_v10 = vrot.slane %v4019_v19, %v8554_v36  ;;  %v8629_v46 = vrot.slane %v4004_v57, %v8554_v36  ;;  %v4071_v42 = vcombine.low %v4046_v22, %v4054_v55 }
 0x62a   : > { %v3943_v49 = vrot.slane %v3935_v58, %v8554_v36  ;;  %v3950_v9 = vrot.slane %v3936_v27, %v8554_v36  ;;  %v3959_v3 = vrot.slane %v3951_v61, %v8554_v36  ;;  %v3966_v8 = vrot.slane %v3952_v40, %v8554_v36  ;;  %v4251_v58 = vld [vmem:[#allocation2 + $0x40] sm:$0xff]  ;;  %v4274_v27 = vld [vmem:[#allocation2 + $0xf8] sm:$0xff]  ;;  %v4273_v61 = vld [vmem:[#allocation2 + $0xf0] sm:$0xff] }
 0x62b   : > { %v4035_v6 = vcombine.low %v8591_v11, %v8626_v10  ;;  %v4036_v44 = vcombine.high %v8591_v11, %v8626_v10  ;;  %v8640_v16 = vrot.slane %v4020_v29, %v8554_v36  ;;  %v8643_v54 = vrot.slane %v4071_v42, %v8554_v36  ;;  %v4272_v40 = vld [vmem:[#allocation2 + $0xe8] sm:$0xff]  ;;  %v4271_v29 = vld [vmem:[#allocation2 + $0xe0] sm:$0xff]  ;;  %v4270_v10 = vld [vmem:[#allocation2 + $0xd8] sm:$0xff] }
 0x62c   : > { %v4175_v57 = vcombine.low %v3943_v49, %v3950_v9  ;;  %v6095_v32 = vcombine.high %v3943_v49, %v3950_v9  ;;  %v4191_v51 = vcombine.low %v3959_v3, %v3966_v8  ;;  %v6096_v4 = vcombine.high %v3959_v3, %v3966_v8  ;;  %v4268_v42 = vld [vmem:[#allocation2 + $0xc8] sm:$0xff]  ;;  %v4267_v49 = vld [vmem:[#allocation2 + $0xc0] sm:$0xff] }
 0x62d   : > { %6299 = vmatprep.mubr.msk.f32.mxu1 %vm4307_vm1, %v4035_v6  ;;  %v4037_v39 = vcombine.low %v8629_v46, %v8640_v16  ;;  %v4087_v28 = vcombine.low %v4062_v50, %v4070_v56  ;;  %v4105_v0 = vcombine.low %v8608_v15, %v8611_v62  ;;  %v4139_v11 = vcombine.low %v4114_v60, %v4122_v33 }
 0x62e   : > { %v4182_v19 = vrot.slane %v4175_v57, %v8500_v18  ;;  %v4190_v20 = vrot.slane %v6095_v32, %v8500_v18  ;;  %v4198_v34 = vrot.slane %v4191_v51, %v8500_v18  ;;  %v4206_v1 = vrot.slane %v6096_v4, %v8500_v18 }
 0x62f   : > { %6343 = vmatprep.mubr.msk.f32.mxu0 %vm4307_vm1, %v4037_v39  ;;  %v4095_v38 = vrot.slane %v4087_v28, %v8554_v36  ;;  %v4147_v48 = vrot.slane %v4139_v11, %v8554_v36  ;;  %v4155_v7 = vcombine.low %v4130_v31, %v4138_v47  ;;  %v4140_v13 = vcombine.high %v4114_v60, %v4122_v33 }
 0x630   : > { %6344 = vmatmul.mubr.msk.f32.vlgmr.msra.gmra.mxu0 %vm4307_vm1, %v4105_v0  ;;  %v4156_v2 = vcombine.high %v4130_v31, %v4138_v47  ;;  %v4207_v26 = vcombine.low %v4182_v19, %v4190_v20  ;;  %v4223_v22 = vcombine.low %v4198_v34, %v4206_v1  ;;  %v4208_v55 = vcombine.high %v4182_v19, %v4190_v20  ;;  %v4252_v47 = vld [vmem:[#allocation2 + $0x48] sm:$0xff] }
 0x631   : > { %v4103_v50 = vcombine.low %v8643_v54, %v4095_v38  ;;  %v4104_v56 = vcombine.high %v8643_v54, %v4095_v38  ;;  %v4163_v18 = vrot.slane %v4155_v7, %v8554_v36  ;;  %v8662_v30 = vrot.slane %v4140_v13, %v8554_v36 }
 0x632   : > { %v8665_v14 = vrot.slane %v4156_v2, %v8554_v36  ;;  %v4215_v21 = vrot.slane %v4207_v26, %v8554_v36  ;;  %v4231_v52 = vrot.slane %v4223_v22, %v8554_v36  ;;  %v8670_v24 = vrot.slane %v4208_v55, %v8554_v36 }
 0x633   : > { %6300 = vmatmul.mubr.msk.f32.vlgmr.msra.gmra.mxu1 %vm4307_vm1, %v4103_v50  ;;  %v4171_v17 = vcombine.low %v4147_v48, %v4163_v18  ;;  %v4224_v35 = vcombine.high %v4198_v34, %v4206_v1  ;;  %v4172_v59 = vcombine.high %v4147_v48, %v4163_v18  ;;  %v4038_v37 = vcombine.high %v8629_v46, %v8640_v16  ;;  %v4269_v46 = vld [vmem:[#allocation2 + $0xd0] sm:$0xff] }
 0x634   : > { %6306 = vmatpush3.xpose.msk.msra.mxu1 %vm4307_vm1, %v8544_v53  ;;  %v4173_v41 = vcombine.low %v8662_v30, %v8665_v14  ;;  %v4239_v12 = vcombine.low %v4215_v21, %v4231_v52  ;;  %v4240_v5 = vcombine.high %v4215_v21, %v4231_v52  ;;  %v4106_v63 = vcombine.high %v8608_v15, %v8611_v62  ;;  %v4256_v53 = vld [vmem:[#allocation2 + $0x68] sm:$0xff]  ;;  %v4254_v15 = vld [vmem:[#allocation2 + $0x58] sm:$0xff]  ;;  %v4253_v62 = vld [vmem:[#allocation2 + $0x50] sm:$0xff] }
 0x635   : > { %6307 = vmatprep.subr.msk.mxu1 %vm4307_vm1, %v4257_v23  ;;  %6302 = vmatprep.mubr.msk.f32.mxu1 %vm4307_vm1, %v4171_v17  ;;  %v4238_v25 = vrot.slane %v4224_v35, %v8554_v36  ;;  %v4174_v60 = vcombine.high %v8662_v30, %v8665_v14  ;;  %v4255_v36 = vld [vmem:[#allocation2 + $0x60] sm:$0xff] }
 0x636   : > { %6346 = vmatprep.mubr.msk.f32.mxu0 %vm4307_vm1, %v4173_v41 }
 0x637   : > { %6303 = vmatmul.mubr.msk.f32.gmra.mxu1 %vm4307_vm1, %v4239_v12  ;;  %v4241_v33 = vcombine.low %v8670_v24, %v4238_v25  ;;  %v4242_v31 = vcombine.high %v8670_v24, %v4238_v25 }
 0x638   : > { %6308 = vmatpush3.xpose.msk.msra.mxu1 %vm4307_vm1, %v4257_v23  ;;  %6321 = vmatprep.mubr.msk.f32.mxu1 %vm4307_vm1, %v4036_v44 }
 0x639   : > { %6309 = vmatprep.subr.msk.mxu1 %vm4307_vm1, %v4256_v53  ;;  %6347 = vmatmul.mubr.msk.f32.gmra.mxu0 %vm4307_vm1, %v4241_v33 }
 0x63c   : > { %6310 = vmatpush3.xpose.msk.msra.mxu1 %vm4307_vm1, %v4256_v53 }
 0x63d   : > { %6311 = vmatprep.subr.msk.mxu1 %vm4307_vm1, %v4255_v36 }
 0x640   : > { %6312 = vmatpush3.xpose.msk.msra.mxu1 %vm4307_vm1, %v4255_v36 }
 0x641   : > { %6313 = vmatprep.subr.msk.mxu1 %vm4307_vm1, %v4254_v15 }
 0x644   : > { %6314 = vmatpush3.xpose.msk.msra.mxu1 %vm4307_vm1, %v4254_v15 }
 0x645   : > { %6315 = vmatprep.subr.msk.mxu1 %vm4307_vm1, %v4253_v62 }
 0x648   : > { %6316 = vmatpush3.xpose.msk.msra.mxu1 %vm4307_vm1, %v4253_v62 }
 0x649   : > { %6317 = vmatprep.subr.msk.mxu1 %vm4307_vm1, %v4252_v47 }
 0x64c   : > { %6318 = vmatpush3.xpose.msk.msra.mxu1 %vm4307_vm1, %v4252_v47 }
 0x64d   : > { %6319 = vmatprep.subr.msk.mxu1 %vm4307_vm1, %v4251_v58 }
 0x650   : > { %6320 = vmatpush3.xpose.msk.msra.mxu1 %vm4307_vm1, %v4251_v58 }
 0x651   : > { %6349 = vmatprep.subr.msk.mxu1 %vm4307_vm1, %v4274_v27 }
 0x653   : > { %6322 = vmatmul.mubr.msk.f32.vlgmr.msra.gmra.mxu1 %vm4307_vm1, %v4104_v56 }
 0x654   : > { %6324 = vmatprep.mubr.msk.f32.mxu1 %vm4307_vm1, %v4172_v59  ;;  %6350 = vmatpush3.xpose.msk.msra.mxu1 %vm4307_vm1, %v4274_v27 }
 0x655   : > { %6351 = vmatprep.subr.msk.mxu1 %vm4307_vm1, %v4273_v61 }
 0x657   : > { %6325 = vmatmul.mubr.msk.f32.gmra.mxu1 %vm4307_vm1, %v4240_v5 }
 0x658   : > { %6352 = vmatpush3.xpose.msk.msra.mxu1 %vm4307_vm1, %v4273_v61  ;;  %6365 = vmatprep.mubr.msk.f32.mxu1 %vm4307_vm1, %v4038_v37 }
 0x659   : > { %6353 = vmatprep.subr.msk.mxu1 %vm4307_vm1, %v4272_v40 }
 0x65c   : > { %6354 = vmatpush3.xpose.msk.msra.mxu1 %vm4307_vm1, %v4272_v40 }
 0x65d   : > { %6355 = vmatprep.subr.msk.mxu1 %vm4307_vm1, %v4271_v29 }
 0x660   : > { %6356 = vmatpush3.xpose.msk.msra.mxu1 %vm4307_vm1, %v4271_v29 }
 0x661   : > { %6357 = vmatprep.subr.msk.mxu1 %vm4307_vm1, %v4270_v10 }
 0x664   : > { %6358 = vmatpush3.xpose.msk.msra.mxu1 %vm4307_vm1, %v4270_v10  ;;  %v4282_v10 = vld [vmem:[#allocation3 + $0x38] sm:$0xff] }
 0x665   : > { %6359 = vmatprep.subr.msk.mxu1 %vm4307_vm1, %v4269_v46  ;;  %6371 = vmatprep.subr.mxu0 %v4282_v10 }
 0x666   : > { %6372 = vmatpush3.msra.mxu0 %v4282_v10 }
 0x668   : > { %6360 = vmatpush3.xpose.msk.msra.mxu1 %vm4307_vm1, %v4269_v46 }
 0x669   : > { %6361 = vmatprep.subr.msk.mxu1 %vm4307_vm1, %v4268_v42 }
 0x66c   : > { %6362 = vmatpush3.xpose.msk.msra.mxu1 %vm4307_vm1, %v4268_v42 }
 0x66d   : > { %6363 = vmatprep.subr.msk.mxu1 %vm4307_vm1, %v4267_v49 }
 0x670   : > { %6364 = vmatpush3.xpose.msk.msra.mxu1 %vm4307_vm1, %v4267_v49 }
 0x673   : > { %6366 = vmatmul.mubr.msk.f32.vlgmr.msra.gmra.mxu1 %vm4307_vm1, %v4106_v63 }
 0x674   : > { %6368 = vmatprep.mubr.msk.f32.mxu1 %vm4307_vm1, %v4174_v60 }
 0x677   : > { %6369 = vmatmul.mubr.msk.f32.gmra.mxu1 %vm4307_vm1, %v4242_v31 }
 0x6f0   : > { %v8736_v0 = vpop.f32.mrf.mxu0 }
 0x6f1   : > { %v4819_v19 = vsel %vm4307_vm1, %v8736_v0, -inf }
 0x6f2   : > { %v8746_v1 = vpop.f32.mrf.mxu0 }
 0x6f3   : > { %v6301_v9 = vpop.f32.mrf.mxu1  ;;  %v4816_v38 = vsel %vm4307_vm1, %v8746_v1, -inf }
 0x6f4   : > { %v4795_v3 = vsel %vm4307_vm1, %v6301_v9, -inf }
 0x6f5   : > { %4796 = vmax.xlane.f32.xlu1 %v4795_v3  ;;  %v4410_v8 = vpop.f32.mrf.mxu1  ;;  %v4280_v3 = vld [vmem:[#allocation3 + $0x28] sm:$0xff] }
 0x6f6   : > { %v4792_v6 = vsel %vm4307_vm1, %v4410_v8, -inf }
 0x6f7   : > { %4793 = vmax.xlane.f32.xlu0 %v4792_v6  ;;  %v6304_v44 = vpop.f32.mrf.mxu1  ;;  %v4279_v6 = vld [vmem:[#allocation3 + $0x20] sm:$0xff] }
 0x6f8   : > { %v4801_v16 = vsel %vm4307_vm1, %v6304_v44, -inf }
 0x6f9   : > { %4802 = vmax.xlane.f32.xlu1 %v4801_v16  ;;  %v8731_v54 = vpop.f32.mrf.mxu1  ;;  %v8750_v48 = vpop.f32.mrf.mxu0 }
 0x6fa   : > { %v4798_v11 = vsel %vm4307_vm1, %v8731_v54, -inf  ;;  %v4825_v50 = vsel %vm4307_vm1, %v8750_v48, -inf }
 0x6fb   : > { %v8760_v22 = vpop.f32.mrf.mxu0 }
 0x6fc   : > { %v4822_v56 = vsel %vm4307_vm1, %v8760_v22, -inf }
 0x713   : > { %v6323_v57 = vpop.f32.mrf.mxu1 }
 0x714   : > { %v4807_v32 = vsel %vm4307_vm1, %v6323_v57, -inf }
 0x715   : > { %4808 = vmax.xlane.f32.xlu0 %v4807_v32  ;;  %v4531_v51 = vpop.f32.mrf.mxu1 }
 0x716   : > { %v4804_v39 = vsel %vm4307_vm1, %v4531_v51, -inf }
 0x717   : > { %v6326_v4 = vpop.f32.mrf.mxu1 }
 0x718   : > { %v4813_v28 = vsel %vm4307_vm1, %v6326_v4, -inf }
 0x719   : > { %4805 = vmax.xlane.f32.xlu0 %v4804_v39  ;;  %4814 = vmax.xlane.f32.xlu1 %v4813_v28  ;;  %v8742_v20 = vpop.f32.mrf.mxu1 }
 0x71a   : > { %v4810_v34 = vsel %vm4307_vm1, %v8742_v20, -inf }
 0x71d   : > { %4799 = vmax.xlane.f32.xlu0 %v4798_v11  ;;  %4820 = vmax.xlane.f32.xlu1 %v4819_v19  ;;  %v4275_v11 = vld [vmem:[#allocation3] sm:$0xff] }
 0x721   : > { %4811 = vmax.xlane.f32.xlu0 %v4810_v34 }
 0x725   : > { %4817 = vmax.xlane.f32.xlu0 %v4816_v38 }
 0x733   : > { %v8752_v7 = vpop.f32.mrf.mxu1 }
 0x734   : > { %v4831_v13 = vsel %vm4307_vm1, %v8752_v7, -inf }
 0x735   : > { %4832 = vmax.xlane.f32.xlu1 %v4831_v13  ;;  %v8756_v2 = vpop.f32.mrf.mxu1 }
 0x736   : > { %v4828_v26 = vsel %vm4307_vm1, %v8756_v2, -inf }
 0x737   : > { %4829 = vmax.xlane.f32.xlu0 %v4828_v26  ;;  %v8762_v55 = vpop.f32.mrf.mxu1 }
 0x738   : > { %v4837_v30 = vsel %vm4307_vm1, %v8762_v55, -inf }
 0x739   : > { %4826 = vmax.xlane.f32.xlu1 %v4825_v50  ;;  %v8768_v18 = vpop.f32.mrf.mxu1 }
 0x73a   : > { %v4834_v23 = vsel %vm4307_vm1, %v8768_v18, -inf }
 0x73b   : > { %4823 = vmax.xlane.f32.xlu0 %v4822_v56 }
 0x73d   : > { %4838 = vmax.xlane.f32.xlu1 %v4837_v30 }
 0x73f   : > { %4835 = vmax.xlane.f32.xlu0 %v4834_v23 }
 0x77e   : > { %v4797_v14 = vpop.xlane.xlu1 %4796 }
 0x77f   : > { %v4841_v21 = vsub.f32 %v6301_v9, %v4797_v14  ;;  %v4281_v9 = vld [vmem:[#allocation3 + $0x30] sm:$0xff] }
 0x780   : > { %v4794_v52 = vpop.xlane.xlu0 %4793  ;;  %6373 = vmatprep.subr.mxu0 %v4281_v9 }
 0x781   : > { %v4858_v24 = vmul.f32 1.442695, %v4841_v21  ;;  %v4840_v17 = vsub.f32 %v4410_v8, %v4794_v52  ;;  %6374 = vmatpush3.msra.mxu0 %v4281_v9 }
 0x782   : > { %v4803_v5 = vpop.xlane.xlu1 %4802  ;;  %6375 = vmatprep.subr.mxu0 %v4280_v3 }
 0x783   : > { %6649 = vpow2.f32 %v4858_v24  ;;  %v4856_v35 = vmul.f32 1.442695, %v4840_v17  ;;  %v4843_v63 = vsub.f32 %v6304_v44, %v4803_v5  ;;  %6376 = vmatpush3.msra.mxu0 %v4280_v3  ;;  %v4283_v3 = vld [vmem:[#allocation3 + $0x40] sm:$0xff] }
 0x784   : > { %6377 = vmatprep.subr.mxu0 %v4279_v6 }
 0x785   : > { %6651 = vpow2.f32 %v4856_v35  ;;  %v4862_v53 = vmul.f32 1.442695, %v4843_v63  ;;  %6378 = vmatpush3.msra.mxu0 %v4279_v6 }
 0x790   : > { %v8774_v59 = vpop.eup %6649 }
 0x791   : > { %v4891_v37 = vsel %vm4307_vm1, %v8774_v59, 0.0 }
 0x792   : > { %v8778_v41 = vpop.eup %6651  ;;  %4892 = vadd.xlane.f32.xlu1 %v4891_v37 }
 0x793   : > { %v4888_v12 = vsel %vm4307_vm1, %v8778_v41, 0.0 }
 0x794   : > { %4889 = vadd.xlane.f32.xlu0 %v4888_v12 }
 0x79e   : > { %v4809_v25 = vpop.xlane.xlu0 %4808 }
 0x79f   : > { %v4845_v60 = vsub.f32 %v6323_v57, %v4809_v25 }
 0x7a1   : > { %v4866_v33 = vmul.f32 1.442695, %v4845_v60 }
 0x7a2   : > { %v4815_v31 = vpop.xlane.xlu1 %4814  ;;  %v4806_v36 = vpop.xlane.xlu0 %4805 }
 0x7a3   : > { %6653 = vpow2.f32 %v4866_v33  ;;  %v4847_v15 = vsub.f32 %v6326_v4, %v4815_v31  ;;  %v4844_v62 = vsub.f32 %v4531_v51, %v4806_v36  ;;  %v4277_v51 = vld [vmem:[#allocation3 + $0x10] sm:$0xff] }
 0x7a4   : > { %6655 = vpow2.f32 %v4862_v53 }
 0x7a5   : > { %v4870_v47 = vmul.f32 1.442695, %v4847_v15  ;;  %v4864_v58 = vmul.f32 1.442695, %v4844_v62  ;;  %v4290_v62 = vld [vmem:[#allocation3 + $0x78] sm:$0xff] }
 0x7a6   : > { %v4821_v27 = vpop.xlane.xlu1 %4820  ;;  %v4800_v61 = vpop.xlane.xlu0 %4799  ;;  %6393 = vmatprep.subr.mxu1 %v4290_v62 }
 0x7a7   : > { %v4849_v40 = vsub.f32 %v8736_v0, %v4821_v27  ;;  %v4842_v29 = vsub.f32 %v8731_v54, %v4800_v61  ;;  %6657 = vpow2.f32 %v4864_v58  ;;  %v4278_v54 = vld [vmem:[#allocation3 + $0x18] sm:$0xff]  ;;  %v4276_v0 = vld [vmem:[#allocation3 + $0x8] sm:$0xff]  ;;  %6394 = vmatpush3.msra.mxu1 %v4290_v62 }
 0x7a8   : > { %6659 = vpow2.f32 %v4870_v47  ;;  %6379 = vmatprep.subr.mxu0 %v4278_v54  ;;  %v4289_v47 = vld [vmem:[#allocation3 + $0x70] sm:$0xff]  ;;  %v4288_v58 = vld [vmem:[#allocation3 + $0x68] sm:$0xff] }
 0x7a9   : > { %v4874_v46 = vmul.f32 1.442695, %v4849_v40  ;;  %v4860_v42 = vmul.f32 1.442695, %v4842_v29  ;;  %6380 = vmatpush3.msra.mxu0 %v4278_v54  ;;  %6395 = vmatprep.subr.mxu1 %v4289_v47  ;;  %v4285_v29 = vld [vmem:[#allocation3 + $0x50] sm:$0xff] }
 0x7aa   : > { %v4812_v49 = vpop.xlane.xlu0 %4811  ;;  %6381 = vmatprep.subr.mxu0 %v4277_v51  ;;  %6396 = vmatpush3.msra.mxu1 %v4289_v47 }
 0x7ab   : > { %v4846_v8 = vsub.f32 %v8742_v20, %v4812_v49  ;;  %6661 = vpow2.f32 %v4860_v42  ;;  %6382 = vmatpush3.msra.mxu0 %v4277_v51  ;;  %6397 = vmatprep.subr.mxu1 %v4288_v58  ;;  %v4284_v42 = vld [vmem:[#allocation3 + $0x48] sm:$0xff]  ;;  %v4298_v49 = vld [vmem:[#allocation3 + $0xb8] sm:$0xff] }
 0x7ac   : > { %6663 = vpow2.f32 %v4874_v46  ;;  %6383 = vmatprep.subr.mxu0 %v4276_v0  ;;  %6398 = vmatpush3.msra.mxu1 %v4288_v58  ;;  %v4302_v58 = vld [vmem:[#allocation3 + $0xd8] sm:$0xff] }
 0x7ad   : > { %v4868_v44 = vmul.f32 1.442695, %v4846_v8  ;;  %6384 = vmatpush3.msra.mxu0 %v4276_v0 }
 0x7ae   : > { %v4818_v16 = vpop.xlane.xlu0 %4817  ;;  %6385 = vmatprep.subr.mxu0 %v4275_v11 }
 0x7af   : > { %6665 = vpow2.f32 %v4868_v44  ;;  %v4848_v57 = vsub.f32 %v8746_v1, %v4818_v16  ;;  %6386 = vmatpush3.msra.mxu0 %v4275_v11 }
 0x7b0   : > { %v8786_v32 = vpop.eup %6653  ;;  %6415 = vmatprep.subr.mxu0 %v4298_v49 }
 0x7b1   : > { %v4872_v4 = vmul.f32 1.442695, %v4848_v57  ;;  %v4903_v39 = vsel %vm4307_vm1, %v8786_v32, 0.0  ;;  %v8790_v28 = vpop.eup %6655  ;;  %v4306_v57 = vld [vmem:[#allocation3 + $0xf8] sm:$0xff] }
 0x7b2   : > { %4904 = vadd.xlane.f32.xlu1 %v4903_v39  ;;  %v4897_v20 = vsel %vm4307_vm1, %v8790_v28, 0.0 }
 0x7b3   : > { %6667 = vpow2.f32 %v4872_v4 }
 0x7b4   : > { %v8792_v19 = vpop.eup %6657 }
 0x7b5   : > { %v8796_v34 = vpop.eup %6659  ;;  %v4900_v1 = vsel %vm4307_vm1, %v8792_v19, 0.0 }
 0x7b6   : > { %4898 = vadd.xlane.f32.xlu1 %v4897_v20  ;;  %4901 = vadd.xlane.f32.xlu0 %v4900_v1  ;;  %v4909_v13 = vsel %vm4307_vm1, %v8796_v34, 0.0  ;;  %v4297_v1 = vld [vmem:[#allocation3 + $0xb0] sm:$0xff] }
 0x7b8   : > { %v8800_v38 = vpop.eup %6661 }
 0x7b9   : > { %v8804_v26 = vpop.eup %6663  ;;  %v4894_v50 = vsel %vm4307_vm1, %v8800_v38, 0.0 }
 0x7ba   : > { %4910 = vadd.xlane.f32.xlu1 %v4909_v13  ;;  %4895 = vadd.xlane.f32.xlu0 %v4894_v50  ;;  %v4915_v30 = vsel %vm4307_vm1, %v8804_v26, 0.0  ;;  %v4296_v13 = vld [vmem:[#allocation3 + $0xa8] sm:$0xff]  ;;  %v4295_v50 = vld [vmem:[#allocation3 + $0xa0] sm:$0xff] }
 0x7bc   : > { %v8808_v56 = vpop.eup %6665 }
 0x7bd   : > { %v4906_v23 = vsel %vm4307_vm1, %v8808_v56, 0.0 }
 0x7be   : > { %v4833_v14 = vpop.xlane.xlu1 %4832  ;;  %4916 = vadd.xlane.f32.xlu1 %v4915_v30  ;;  %4907 = vadd.xlane.f32.xlu0 %v4906_v23  ;;  %v4294_v30 = vld [vmem:[#allocation3 + $0x98] sm:$0xff]  ;;  %v4293_v23 = vld [vmem:[#allocation3 + $0x90] sm:$0xff] }
 0x7bf   : > { %v4853_v21 = vsub.f32 %v8752_v7, %v4833_v14 }
 0x7c0   : > { %v8815_v52 = vpop.eup %6667  ;;  %v4830_v24 = vpop.xlane.xlu0 %4829 }
 0x7c1   : > { %v4882_v17 = vmul.f32 1.442695, %v4853_v21  ;;  %v4852_v35 = vsub.f32 %v8756_v2, %v4830_v24  ;;  %v4912_v37 = vsel %vm4307_vm1, %v8815_v52, 0.0  ;;  %v5383_v21 = vld [vmem:[#allocation13 + $0x78] sm:$0xff] }
 0x7c2   : > { %v4827_v12 = vpop.xlane.xlu1 %4826  ;;  %4913 = vadd.xlane.f32.xlu0 %v4912_v37 }
 0x7c3   : > { %6669 = vpow2.f32 %v4882_v17  ;;  %v4880_v5 = vmul.f32 1.442695, %v4852_v35  ;;  %v4851_v63 = vsub.f32 %v8750_v48, %v4827_v12 }
 0x7c4   : > { %v4824_v25 = vpop.xlane.xlu0 %4823 }
 0x7c5   : > { %6671 = vpow2.f32 %v4880_v5  ;;  %v4878_v60 = vmul.f32 1.442695, %v4851_v63  ;;  %v4850_v7 = vsub.f32 %v8760_v22, %v4824_v25  ;;  %v4287_v22 = vld [vmem:[#allocation3 + $0x60] sm:$0xff] }
 0x7c6   : > { %v4839_v53 = vpop.xlane.xlu1 %4838  ;;  %6399 = vmatprep.subr.mxu1 %v4287_v22 }
 0x7c7   : > { %6673 = vpow2.f32 %v4878_v60  ;;  %v4876_v33 = vmul.f32 1.442695, %v4850_v7  ;;  %v4855_v31 = vsub.f32 %v8762_v55, %v4839_v53  ;;  %6400 = vmatpush3.msra.mxu1 %v4287_v22 }
 0x7c8   : > { %v4836_v2 = vpop.xlane.xlu0 %4835 }
 0x7c9   : > { %6675 = vpow2.f32 %v4876_v33  ;;  %v4886_v36 = vmul.f32 1.442695, %v4855_v31  ;;  %v4854_v15 = vsub.f32 %v8768_v18, %v4836_v2  ;;  %v4286_v18 = vld [vmem:[#allocation3 + $0x58] sm:$0xff]  ;;  %v4305_v31 = vld [vmem:[#allocation3 + $0xf0] sm:$0xff] }
 0x7ca   : > { %6401 = vmatprep.subr.mxu1 %v4286_v18 }
 0x7cb   : > { %6677 = vpow2.f32 %v4886_v36  ;;  %v4884_v48 = vmul.f32 1.442695, %v4854_v15  ;;  %6402 = vmatpush3.msra.mxu1 %v4286_v18  ;;  %v4304_v15 = vld [vmem:[#allocation3 + $0xe8] sm:$0xff] }
 0x7cc   : > { %6403 = vmatprep.subr.mxu1 %v4285_v29 }
 0x7cd   : > { %6679 = vpow2.f32 %v4884_v48  ;;  %6404 = vmatpush3.msra.mxu1 %v4285_v29  ;;  %v4300_v29 = vld [vmem:[#allocation3 + $0xc8] sm:$0xff] }
 0x7ce   : > { %6405 = vmatprep.subr.mxu1 %v4284_v42 }
 0x7cf   : > { %6406 = vmatpush3.msra.mxu1 %v4284_v42  ;;  %v4299_v42 = vld [vmem:[#allocation3 + $0xc0] sm:$0xff] }
 0x7d0   : > { %v8824_v27 = vpop.eup %6669  ;;  %6407 = vmatprep.subr.mxu1 %v4283_v3 }
 0x7d1   : > { %v4927_v55 = vsel %vm4307_vm1, %v8824_v27, 0.0  ;;  %6408 = vmatpush3.msra.mxu1 %v4283_v3  ;;  %v5380_v3 = vld [vmem:[#allocation13 + $0x60] sm:$0xff] }
 0x7d2   : > { %v8828_v61 = vpop.eup %6671  ;;  %4928 = vadd.xlane.f32.xlu1 %v4927_v55  ;;  %6437 = vmatprep.subr.mxu1 %v4306_v57 }
 0x7d3   : > { %v4924_v40 = vsel %vm4307_vm1, %v8828_v61, 0.0 }
 0x7d4   : > { %v8832_v10 = vpop.eup %6673  ;;  %4925 = vadd.xlane.f32.xlu0 %v4924_v40 }
 0x7d5   : > { %v4921_v46 = vsel %vm4307_vm1, %v8832_v10, 0.0 }
 0x7d6   : > { %v8836_v9 = vpop.eup %6675  ;;  %4922 = vadd.xlane.f32.xlu1 %v4921_v46  ;;  %v5382_v46 = vld [vmem:[#allocation13 + $0x70] sm:$0xff] }
 0x7d7   : > { %v4918_v8 = vsel %vm4307_vm1, %v8836_v9, 0.0 }
 0x7d8   : > { %v8840_v6 = vpop.eup %6677  ;;  %4919 = vadd.xlane.f32.xlu0 %v4918_v8 }
 0x7d9   : > { %v4933_v44 = vsel %vm4307_vm1, %v8840_v6, 0.0 }
 0x7da   : > { %v8844_v16 = vpop.eup %6679  ;;  %4934 = vadd.xlane.f32.xlu1 %v4933_v44 }
 0x7db   : > { %v4930_v54 = vsel %vm4307_vm1, %v8844_v16, 0.0 }
 0x7dc   : > { %4931 = vadd.xlane.f32.xlu0 %v4930_v54  ;;  %v5377_v54 = vld [vmem:[#allocation13 + $0x48] sm:$0xff] }
 0x81b   : > { %v4893_v51 = vpop.xlane.xlu1 %4892 }
 0x81c   : > { %6681 = vrcp.f32 %v4893_v51 }
 0x81d   : > { %v4890_v4 = vpop.xlane.xlu0 %4889 }
 0x81e   : > { %6683 = vrcp.f32 %v4890_v4  ;;  %v5375_v4 = vld [vmem:[#allocation13 + $0x38] sm:$0xff] }
 0x829   : > { %v6682_v39 = vpop.eup %6681 }
 0x82a   : > { %v4953_v20 = vmul.f32 %v6682_v39, %v8774_v59  ;;  %v4291_v59 = vld [vmem:[#allocation3 + $0x80] sm:$0xff]  ;;  %v5374_v39 = vld [vmem:[#allocation13 + $0x30] sm:$0xff] }
 0x82b   : > { %v6684_v0 = vpop.eup %6683 }
 0x82c   : > { %v4952_v11 = vmul.f32 %v6684_v0, %v8778_v41  ;;  %v4292_v41 = vld [vmem:[#allocation3 + $0x88] sm:$0xff] }
 0x82e   : > { %6387 = vmatprep.mubr.msk.f32.mxu0 %vm4307_vm1, %v4952_v11  ;;  %v5373_v11 = vld [vmem:[#allocation13 + $0x28] sm:$0xff] }
 0x82f   : > { %6388 = vmatmul.mubr.msk.f32.vlgmr.msra.gmra.mxu0 %vm4307_vm1, %v4953_v20  ;;  %v5372_v20 = vld [vmem:[#allocation13 + $0x20] sm:$0xff] }
 0x830   : > { %6416 = vmatpush3.msra.mxu0 %v4298_v49  ;;  %v5381_v49 = vld [vmem:[#allocation13 + $0x68] sm:$0xff] }
 0x831   : > { %6417 = vmatprep.subr.mxu0 %v4297_v1 }
 0x832   : > { %6418 = vmatpush3.msra.mxu0 %v4297_v1  ;;  %v5371_v1 = vld [vmem:[#allocation13 + $0x18] sm:$0xff] }
 0x833   : > { %6419 = vmatprep.subr.mxu0 %v4296_v13 }
 0x834   : > { %6420 = vmatpush3.msra.mxu0 %v4296_v13 }
 0x835   : > { %6421 = vmatprep.subr.mxu0 %v4295_v50 }
 0x836   : > { %6422 = vmatpush3.msra.mxu0 %v4295_v50 }
 0x837   : > { %6423 = vmatprep.subr.mxu0 %v4294_v30 }
 0x838   : > { %6424 = vmatpush3.msra.mxu0 %v4294_v30 }
 0x839   : > { %6425 = vmatprep.subr.mxu0 %v4293_v23 }
 0x83a   : > { %6426 = vmatpush3.msra.mxu0 %v4293_v23 }
 0x83b   : > { %v4905_v14 = vpop.xlane.xlu1 %4904  ;;  %6427 = vmatprep.subr.mxu0 %v4292_v41 }
 0x83c   : > { %6428 = vmatpush3.msra.mxu0 %v4292_v41  ;;  %6685 = vrcp.f32 %v4905_v14  ;;  %v5370_v14 = vld [vmem:[#allocation13 + $0x10] sm:$0xff] }
 0x83d   : > { %6429 = vmatprep.subr.mxu0 %v4291_v59 }
 0x83e   : > { %6430 = vmatpush3.msra.mxu0 %v4291_v59 }
 0x83f   : > { %v4899_v24 = vpop.xlane.xlu1 %4898  ;;  %5412 = vmatprep.subr.mxu0 %v5383_v21  ;;  %v4902_v17 = vpop.xlane.xlu0 %4901  ;;  %v5369_v21 = vld [vmem:[#allocation13 + $0x8] sm:$0xff] }
 0x840   : > { %6687 = vrcp.f32 %v4902_v17 }
 0x841   : > { %6689 = vrcp.f32 %v4899_v24 }
 0x843   : > { %v4911_v35 = vpop.xlane.xlu1 %4910  ;;  %v4896_v37 = vpop.xlane.xlu0 %4895 }
 0x844   : > { %6691 = vrcp.f32 %v4896_v37 }
 0x845   : > { %6693 = vrcp.f32 %v4911_v35  ;;  %v5368_v35 = vld [vmem:[#allocation13] sm:$0xff] }
 0x847   : > { %v4908_v12 = vpop.xlane.xlu0 %4907  ;;  %v4917_v5 = vpop.xlane.xlu1 %4916 }
 0x848   : > { %6695 = vrcp.f32 %v4908_v12  ;;  %v7021_v12 = vmov 0.0  }
 0x849   : > { %6697 = vrcp.f32 %v4917_v5  ;;  %v6686_v25 = vpop.eup %6685 }
 0x84a   : > { %v4957_v53 = vmul.f32 %v6686_v25, %v8786_v32  ;;  %v5506_v25 = vld [vmem:[#allocation13 + $0xe0] sm:$0xff] }
 0x84b   : > { %v4914_v63 = vpop.xlane.xlu0 %4913 }
 0x84c   : > { %6699 = vrcp.f32 %v4914_v63  ;;  %v5507_v63 = vld [vmem:[#allocation13 + $0xe8] sm:$0xff] }
 0x84d   : > { %v6688_v60 = vpop.eup %6687 }
 0x84e   : > { %v4956_v7 = vmul.f32 %v6688_v60, %v8792_v19  ;;  %v6690_v33 = vpop.eup %6689  ;;  %v4303_v19 = vld [vmem:[#allocation3 + $0xe0] sm:$0xff] }
 0x84f   : > { %v4955_v62 = vmul.f32 %v6690_v33, %v8790_v28  ;;  %v4301_v28 = vld [vmem:[#allocation3 + $0xd0] sm:$0xff]  ;;  %v5505_v60 = vld [vmem:[#allocation13 + $0xd8] sm:$0xff] }
 0x850   : > { %6409 = vmatprep.mubr.msk.f32.mxu1 %vm4307_vm1, %v4956_v7  ;;  %v5503_v7 = vld [vmem:[#allocation13 + $0xc8] sm:$0xff]  ;;  %v5501_v33 = vld [vmem:[#allocation13 + $0xb8] sm:$0xff] }
 0x851   : > { %v6692_v2 = vpop.eup %6691  ;;  %6410 = vmatmul.mubr.msk.f32.vlgmr.msra.gmra.mxu1 %vm4307_vm1, %v4957_v53  ;;  %v5635_v53 = vld [vmem:[#allocation13 + $0x178] sm:$0xff] }
 0x852   : > { %v4954_v36 = vmul.f32 %v6692_v2, %v8800_v38  ;;  %6438 = vmatpush3.msra.mxu1 %v4306_v57  ;;  %v6694_v47 = vpop.eup %6693  ;;  %v5376_v57 = vld [vmem:[#allocation13 + $0x40] sm:$0xff]  ;;  %v5499_v2 = vld [vmem:[#allocation13 + $0xa8] sm:$0xff] }
 0x853   : > { %6439 = vmatprep.subr.mxu1 %v4305_v31  ;;  %v4959_v38 = vmul.f32 %v6694_v47, %v8796_v34  ;;  %v5495_v47 = vld [vmem:[#allocation13 + $0x88] sm:$0xff] }
 0x854   : > { %6390 = vmatprep.mubr.msk.f32.mxu0 %vm4307_vm1, %v4954_v36  ;;  %6440 = vmatpush3.msra.mxu1 %v4305_v31  ;;  %v5500_v31 = vld [vmem:[#allocation13 + $0xb0] sm:$0xff]  ;;  %v5498_v36 = vld [vmem:[#allocation13 + $0xa0] sm:$0xff] }
 0x855   : > { %v6696_v32 = vpop.eup %6695  ;;  %6391 = vmatmul.mubr.msk.f32.gmra.mxu0 %vm4307_vm1, %v4955_v62  ;;  %6441 = vmatprep.subr.mxu1 %v4304_v15  ;;  %v5496_v62 = vld [vmem:[#allocation13 + $0x90] sm:$0xff] }
 0x856   : > { %v4958_v48 = vmul.f32 %v6696_v32, %v8808_v56  ;;  %6442 = vmatpush3.msra.mxu1 %v4304_v15  ;;  %v6698_v22 = vpop.eup %6697  ;;  %v5497_v15 = vld [vmem:[#allocation13 + $0x98] sm:$0xff] }
 0x857   : > { %6443 = vmatprep.subr.mxu1 %v4303_v19  ;;  %v4961_v56 = vmul.f32 %v6698_v22, %v8804_v26  ;;  %v5378_v26 = vld [vmem:[#allocation13 + $0x50] sm:$0xff]  ;;  %v5761_v32 = vld [vmem:[#allocation13 + $0x1f8] sm:$0xff]  ;;  %v5633_v22 = vld [vmem:[#allocation13 + $0x168] sm:$0xff] }
 0x858   : > { %6412 = vmatprep.mubr.msk.f32.mxu1 %vm4307_vm1, %v4958_v48  ;;  %6444 = vmatpush3.msra.mxu1 %v4303_v19  ;;  %v5494_v19 = vld [vmem:[#allocation13 + $0x80] sm:$0xff] }
 0x859   : > { %v6700_v55 = vpop.eup %6699  ;;  %6413 = vmatmul.mubr.msk.f32.gmra.mxu1 %vm4307_vm1, %v4959_v38  ;;  %6445 = vmatprep.subr.mxu1 %v4302_v58 }
 0x85a   : > { %v4960_v40 = vmul.f32 %v6700_v55, %v8815_v52  ;;  %6446 = vmatpush3.msra.mxu1 %v4302_v58  ;;  %v5379_v52 = vld [vmem:[#allocation13 + $0x58] sm:$0xff]  ;;  %v5634_v58 = vld [vmem:[#allocation13 + $0x170] sm:$0xff] }
 0x85b   : > { %v4929_v18 = vpop.xlane.xlu1 %4928  ;;  %6447 = vmatprep.subr.mxu1 %v4301_v28  ;;  %v5631_v55 = vld [vmem:[#allocation13 + $0x158] sm:$0xff] }
 0x85c   : > { %6701 = vrcp.f32 %v4929_v18  ;;  %6431 = vmatprep.mubr.msk.f32.mxu0 %vm4307_vm1, %v4960_v40  ;;  %6448 = vmatpush3.msra.mxu1 %v4301_v28  ;;  %v5632_v28 = vld [vmem:[#allocation13 + $0x160] sm:$0xff]  ;;  %v5630_v18 = vld [vmem:[#allocation13 + $0x150] sm:$0xff]  ;;  %v5629_v40 = vld [vmem:[#allocation13 + $0x148] sm:$0xff] }
 0x85d   : > { %v4926_v34 = vpop.xlane.xlu0 %4925  ;;  %6432 = vmatmul.mubr.msk.f32.vlgmr.msra.gmra.mxu0 %vm4307_vm1, %v4961_v56  ;;  %6449 = vmatprep.subr.mxu1 %v4300_v29  ;;  %v5627_v56 = vld [vmem:[#allocation13 + $0x138] sm:$0xff] }
 0x85e   : > { %6703 = vrcp.f32 %v4926_v34  ;;  %6450 = vmatpush3.msra.mxu1 %v4300_v29  ;;  %5413 = vmatpush1.msra.mxu0 %v5382_v46  ;;  %v5628_v29 = vld [vmem:[#allocation13 + $0x140] sm:$0xff]  ;;  %v5626_v46 = vld [vmem:[#allocation13 + $0x130] sm:$0xff]  ;;  %v5625_v34 = vld [vmem:[#allocation13 + $0x128] sm:$0xff] }
 0x85f   : > { %v4923_v8 = vpop.xlane.xlu1 %4922  ;;  %6451 = vmatprep.subr.mxu1 %v4299_v42  ;;  %5414 = vmatprep.subr.mxu0 %v5381_v49  ;;  %v5623_v49 = vld [vmem:[#allocation13 + $0x118] sm:$0xff] }
 0x860   : > { %6705 = vrcp.f32 %v4923_v8  ;;  %6452 = vmatpush3.msra.mxu1 %v4299_v42  ;;  %5415 = vmatpush1.msra.mxu0 %v5380_v3  ;;  %v5624_v42 = vld [vmem:[#allocation13 + $0x120] sm:$0xff]  ;;  %v5622_v3 = vld [vmem:[#allocation13 + $0x110] sm:$0xff]  ;;  %v5621_v8 = vld [vmem:[#allocation13 + $0x108] sm:$0xff] }
 0x861   : > { %v4920_v44 = vpop.xlane.xlu0 %4919  ;;  %5416 = vmatprep.subr.mxu0 %v5379_v52  ;;  %v5620_v52 = vld [vmem:[#allocation13 + $0x100] sm:$0xff] }
 0x862   : > { %6707 = vrcp.f32 %v4920_v44  ;;  %5417 = vmatpush1.msra.mxu0 %v5378_v26  ;;  %v5760_v44 = vld [vmem:[#allocation13 + $0x1f0] sm:$0xff] }
 0x863   : > { %v4935_v51 = vpop.xlane.xlu1 %4934  ;;  %5418 = vmatprep.subr.mxu0 %v5377_v54 }
 0x864   : > { %6709 = vrcp.f32 %v4935_v51  ;;  %5419 = vmatpush1.msra.mxu0 %v5376_v57  ;;  %v5759_v57 = vld [vmem:[#allocation13 + $0x1e8] sm:$0xff]  ;;  %v5758_v51 = vld [vmem:[#allocation13 + $0x1e0] sm:$0xff] }
 0x865   : > { %v4932_v0 = vpop.xlane.xlu0 %4931  ;;  %5420 = vmatprep.subr.mxu0 %v5375_v4 }
 0x866   : > { %6711 = vrcp.f32 %v4932_v0  ;;  %5421 = vmatpush1.msra.mxu0 %v5374_v39  ;;  %v5757_v0 = vld [vmem:[#allocation13 + $0x1d8] sm:$0xff] }
 0x867   : > { %5422 = vmatprep.subr.mxu0 %v5373_v11  ;;  %v5756_v11 = vld [vmem:[#allocation13 + $0x1d0] sm:$0xff] }
 0x868   : > { %5423 = vmatpush1.msra.mxu0 %v5372_v20 }
 0x869   : > { %v6702_v13 = vpop.eup %6701  ;;  %5424 = vmatprep.subr.mxu0 %v5371_v1 }
 0x86a   : > { %v4965_v23 = vmul.f32 %v6702_v13, %v8824_v27  ;;  %5425 = vmatpush1.msra.mxu0 %v5370_v14  ;;  %v5755_v13 = vld [vmem:[#allocation13 + $0x1c8] sm:$0xff] }
 0x86b   : > { %v6704_v50 = vpop.eup %6703  ;;  %5426 = vmatprep.subr.mxu0 %v5369_v21  ;;  %v5751_v14 = vld [vmem:[#allocation13 + $0x1a8] sm:$0xff]  ;;  %v5750_v21 = vld [vmem:[#allocation13 + $0x1a0] sm:$0xff] }
 0x86c   : > { %v4964_v30 = vmul.f32 %v6704_v50, %v8828_v61  ;;  %5427 = vmatpush1.msra.mxu0 %v5368_v35  ;;  %v5754_v50 = vld [vmem:[#allocation13 + $0x1c0] sm:$0xff]  ;;  %v5747_v35 = vld [vmem:[#allocation13 + $0x188] sm:$0xff] }
 0x86d   : > { %v6706_v41 = vpop.eup %6705  ;;  %5664 = vmatprep.subr.mxu0 %v5635_v53 }
 0x86e   : > { %6453 = vmatprep.mubr.msk.f32.mxu1 %vm4307_vm1, %v4964_v30  ;;  %v4963_v17 = vmul.f32 %v6706_v41, %v8832_v10  ;;  %v5508_v10 = vld [vmem:[#allocation13 + $0xf0] sm:$0xff] }
 0x86f   : > { %v6708_v59 = vpop.eup %6707  ;;  %6454 = vmatmul.mubr.msk.f32.vlgmr.msra.gmra.mxu1 %vm4307_vm1, %v4965_v23  ;;  %v5753_v23 = vld [vmem:[#allocation13 + $0x1b8] sm:$0xff] }
 0x870   : > { %v4962_v24 = vmul.f32 %v6708_v59, %v8836_v9  ;;  %v5509_v9 = vld [vmem:[#allocation13 + $0xf8] sm:$0xff]  ;;  %v5752_v59 = vld [vmem:[#allocation13 + $0x1b0] sm:$0xff] }
 0x871   : > { %v6710_v37 = vpop.eup %6709  ;;  %5538 = vmatprep.subr.mxu1 %v5509_v9 }
 0x872   : > { %6434 = vmatprep.mubr.msk.f32.mxu0 %vm4307_vm1, %v4962_v24  ;;  %v4967_v5 = vmul.f32 %v6710_v37, %v8840_v6  ;;  %5539 = vmatpush1.msra.mxu1 %v5508_v10  ;;  %v5502_v6 = vld [vmem:[#allocation13 + $0xc0] sm:$0xff]  ;;  %v5749_v24 = vld [vmem:[#allocation13 + $0x198] sm:$0xff] }
 0x873   : > { %v6712_v27 = vpop.eup %6711  ;;  %6435 = vmatmul.mubr.msk.f32.gmra.mxu0 %vm4307_vm1, %v4963_v17  ;;  %5540 = vmatprep.subr.mxu1 %v5507_v63  ;;  %v5748_v17 = vld [vmem:[#allocation13 + $0x190] sm:$0xff]  ;;  %v5746_v37 = vld [vmem:[#allocation13 + $0x180] sm:$0xff] }
 0x874   : > { %v4966_v61 = vmul.f32 %v6712_v27, %v8844_v16  ;;  %5460 = vmatprep.mubr.f32.mxu0 %v7021_v12  ;;  %v5504_v16 = vld [vmem:[#allocation13 + $0xd0] sm:$0xff]  ;;  %5541 = vmatpush1.msra.mxu1 %v5506_v25 }
 0x875   : > { %5542 = vmatprep.subr.mxu1 %v5505_v60 }
 0x876   : > { %6456 = vmatprep.mubr.msk.f32.mxu1 %vm4307_vm1, %v4966_v61  ;;  %5543 = vmatpush1.msra.mxu1 %v5504_v16 }
 0x877   : > { %6457 = vmatmul.mubr.msk.f32.gmra.mxu1 %vm4307_vm1, %v4967_v5  ;;  %5544 = vmatprep.subr.mxu1 %v5503_v7 }
 0x878   : > { %5586 = vmatprep.mubr.f32.mxu1 %v7021_v12  ;;  %5545 = vmatpush1.msra.mxu1 %v5502_v6 }
 0x879   : > { %5546 = vmatprep.subr.mxu1 %v5501_v33 }
 0x87a   : > { %5547 = vmatpush1.msra.mxu1 %v5500_v31 }
 0x87b   : > { %5548 = vmatprep.subr.mxu1 %v5499_v2 }
 0x87c   : > { %5549 = vmatpush1.msra.mxu1 %v5498_v36 }
 0x87d   : > { %5550 = vmatprep.subr.mxu1 %v5497_v15 }
 0x87e   : > { %5551 = vmatpush1.msra.mxu1 %v5496_v62 }
 0x87f   : > { %5552 = vmatprep.subr.mxu1 %v5495_v47 }
 0x880   : > { %5553 = vmatpush1.msra.mxu1 %v5494_v19  ;;  %v5356_v19 = vld [vmem:[%s9065_s17] sm:$0x3] }
 0x881   : > { %5790 = vmatprep.subr.mxu1 %v5761_v32 }
 0x8ef   : > { %v6389_v48 = vpop.f32.mrf.mxu0 }
 0x8f1   : > { %v5046_v38 = vpop.f32.mrf.mxu0 }
 0x8f2   : > { %6161 = vmatmul.mubr.msk.f32.vlgmr.msra.gmra.mxu0 %vm4307_vm1, %v5046_v38 }
 0x8f3   : > { %5466 = vmatprep.mubr.f32.mxu0 %v7021_v12  ;;  %5665 = vmatpush1.msra.mxu0 %v5634_v58  ;;  %v5365_v58 = vrot.slane %v5356_v19, %v8459_v45 }
 0x8f4   : > { %5666 = vmatprep.subr.mxu0 %v5633_v22 }
 0x8f5   : > { %5667 = vmatpush1.msra.mxu0 %v5632_v28 }
 0x8f6   : > { %6162 = vmatmul.mubr.msk.f32.gmra.mxu0 %vm4307_vm1, %v6389_v48  ;;  %5668 = vmatprep.subr.mxu0 %v5631_v55  ;;  %v5361_v48 = vrot.slane %v5356_v19, %v8462_v43 }
 0x8f7   : > { %5669 = vmatpush1.msra.mxu0 %v5630_v18  ;;  %5472 = vmatprep.mubr.f32.mxu0 %v7021_v12 }
 0x8f8   : > { %5670 = vmatprep.subr.mxu0 %v5629_v40 }
 0x8f9   : > { %5671 = vmatpush1.msra.mxu0 %v5628_v29 }
 0x8fa   : > { %5672 = vmatprep.subr.mxu0 %v5627_v56 }
 0x8fb   : > { %5673 = vmatpush1.msra.mxu0 %v5626_v46 }
 0x8fc   : > { %5674 = vmatprep.subr.mxu0 %v5625_v34 }
 0x8fd   : > { %5675 = vmatpush1.msra.mxu0 %v5624_v42 }
 0x8fe   : > { %5676 = vmatprep.subr.mxu0 %v5623_v49 }
 0x8ff   : > { %5677 = vmatpush1.msra.mxu0 %v5622_v3 }
 0x900   : > { %5678 = vmatprep.subr.mxu0 %v5621_v8 }
 0x901   : > { %5679 = vmatpush1.msra.mxu0 %v5620_v52 }
 0x911   : > { %v6411_v26 = vpop.f32.mrf.mxu1 }
 0x913   : > { %v5143_v54 = vpop.f32.mrf.mxu1 }
 0x914   : > { %6165 = vmatmul.mubr.msk.f32.vlgmr.msra.gmra.mxu1 %vm4307_vm1, %v5143_v54 }
 0x915   : > { %v6392_v4 = vpop.f32.mrf.mxu0  ;;  %5592 = vmatprep.mubr.f32.mxu1 %v7021_v12  ;;  %5791 = vmatpush1.msra.mxu1 %v5760_v44 }
 0x916   : > { %5792 = vmatprep.subr.mxu1 %v5759_v57 }
 0x917   : > { %v5056_v39 = vpop.f32.mrf.mxu0  ;;  %5793 = vmatpush1.msra.mxu1 %v5758_v51 }
 0x918   : > { %6163 = vmatmul.mubr.msk.f32.gmra.mxu0 %vm4307_vm1, %v5056_v39  ;;  %6166 = vmatmul.mubr.msk.f32.gmra.mxu1 %vm4307_vm1, %v6411_v26 }
 0x919   : > { %v6414_v20 = vpop.f32.mrf.mxu1  ;;  %5478 = vmatprep.mubr.f32.mxu0 %v7021_v12  ;;  %5598 = vmatprep.mubr.f32.mxu1 %v7021_v12 }
 0x91a   : > { %5794 = vmatprep.subr.mxu1 %v5757_v0 }
 0x91b   : > { %v5153_v1 = vpop.f32.mrf.mxu1  ;;  %5795 = vmatpush1.msra.mxu1 %v5756_v11 }
 0x91c   : > { %6164 = vmatmul.mubr.msk.f32.gmra.mxu0 %vm4307_vm1, %v6392_v4  ;;  %6167 = vmatmul.mubr.msk.f32.gmra.mxu1 %vm4307_vm1, %v5153_v1 }
 0x91d   : > { %v6433_v30 = vpop.f32.mrf.mxu0  ;;  %5604 = vmatprep.mubr.f32.mxu1 %v7021_v12  ;;  %5712 = vmatprep.mubr.f32.mxu0 %v7021_v12 }
 0x91e   : > { %5796 = vmatprep.subr.mxu1 %v5755_v13 }
 0x91f   : > { %v5240_v41 = vpop.f32.mrf.mxu0  ;;  %5797 = vmatpush1.msra.mxu1 %v5754_v50 }
 0x920   : > { %6168 = vmatmul.mubr.msk.f32.gmra.mxu1 %vm4307_vm1, %v6414_v20  ;;  %6169 = vmatmul.mubr.msk.f32.vlgmr.msra.gmra.mxu0 %vm4307_vm1, %v5240_v41 }
 0x921   : > { %5718 = vmatprep.mubr.f32.mxu0 %v7021_v12  ;;  %5798 = vmatprep.subr.mxu1 %v5753_v23 }
 0x922   : > { %5799 = vmatpush1.msra.mxu1 %v5752_v59  ;;  %5838 = vmatprep.mubr.f32.mxu1 %v7021_v12 }
 0x923   : > { %5800 = vmatprep.subr.mxu1 %v5751_v14 }
 0x924   : > { %6170 = vmatmul.mubr.msk.f32.gmra.mxu0 %vm4307_vm1, %v6433_v30  ;;  %5801 = vmatpush1.msra.mxu1 %v5750_v21 }
 0x925   : > { %5802 = vmatprep.subr.mxu1 %v5749_v24  ;;  %5724 = vmatprep.mubr.f32.mxu0 %v7021_v12 }
 0x926   : > { %5803 = vmatpush1.msra.mxu1 %v5748_v17 }
 0x927   : > { %5804 = vmatprep.subr.mxu1 %v5747_v35 }
 0x928   : > { %5805 = vmatpush1.msra.mxu1 %v5746_v37 }
 0x92f   : > { %v6455_v27 = vpop.f32.mrf.mxu1 }
 0x931   : > { %v5337_v61 = vpop.f32.mrf.mxu1 }
 0x932   : > { %6173 = vmatmul.mubr.msk.f32.vlgmr.msra.gmra.mxu1 %vm4307_vm1, %v5337_v61 }
 0x933   : > { %v6436_v5 = vpop.f32.mrf.mxu0  ;;  %5844 = vmatprep.mubr.f32.mxu1 %v7021_v12 }
 0x935   : > { %v5250_v9 = vpop.f32.mrf.mxu0 }
 0x936   : > { %6171 = vmatmul.mubr.msk.f32.gmra.mxu0 %vm4307_vm1, %v5250_v9  ;;  %6174 = vmatmul.mubr.msk.f32.gmra.mxu1 %vm4307_vm1, %v6455_v27 }
 0x937   : > { %v6458_v10 = vpop.f32.mrf.mxu1  ;;  %5730 = vmatprep.mubr.f32.mxu0 %v7021_v12  ;;  %5850 = vmatprep.mubr.f32.mxu1 %v7021_v12 }
 0x939   : > { %v5347_v63 = vpop.f32.mrf.mxu1 }
 0x93a   : > { %6172 = vmatmul.mubr.msk.f32.gmra.mxu0 %vm4307_vm1, %v6436_v5  ;;  %6175 = vmatmul.mubr.msk.f32.gmra.mxu1 %vm4307_vm1, %v5347_v63 }
 0x93b   : > { %5856 = vmatprep.mubr.f32.mxu1 %v7021_v12 }
 0x93e   : > { %6176 = vmatmul.mubr.msk.f32.gmra.mxu1 %vm4307_vm1, %v6458_v10 }
 0x9b2   : > { %v5462_v25 = vpop.f32.mrf.mxu0 }
 0x9b3   : > { %v5485_v28 = vadd.f32 %v5462_v25, %v5361_v48 }
 0x9b4   : > { %v5464_v60 = vpop.f32.mrf.mxu0 }
 0x9b5   : > { %v5486_v55 = vadd.f32 %v5464_v60, %v5365_v58 }
 0x9b6   : > { %v5468_v16 = vpop.f32.mrf.mxu0 }
 0x9b7   : > { %v5487_v56 = vadd.f32 %v5468_v16, %v5361_v48 }
 0x9b8   : > { %v5470_v53 = vpop.f32.mrf.mxu0 }
 0x9b9   : > { %v5488_v49 = vadd.f32 %v5470_v53, %v5365_v58 }
 0x9d4   : > { %v5588_v7 = vpop.f32.mrf.mxu1 }
 0x9d5   : > { %v5611_v18 = vadd.f32 %v5588_v7, %v5485_v28 }
 0x9d6   : > { %v5590_v6 = vpop.f32.mrf.mxu1 }
 0x9d7   : > { %v5612_v46 = vadd.f32 %v5590_v6, %v5486_v55 }
 0x9d8   : > { %v5474_v33 = vpop.f32.mrf.mxu0  ;;  %v5594_v31 = vpop.f32.mrf.mxu1 }
 0x9d9   : > { %v5613_v3 = vadd.f32 %v5594_v31, %v5487_v56  ;;  %v5489_v26 = vadd.f32 %v5474_v33, %v5361_v48 }
 0x9da   : > { %v5476_v2 = vpop.f32.mrf.mxu0  ;;  %v5596_v36 = vpop.f32.mrf.mxu1 }
 0x9db   : > { %v5614_v44 = vadd.f32 %v5596_v36, %v5488_v49  ;;  %v5490_v39 = vadd.f32 %v5476_v2, %v5365_v58 }
 0x9dc   : > { %v5480_v15 = vpop.f32.mrf.mxu0  ;;  %v5600_v62 = vpop.f32.mrf.mxu1 }
 0x9dd   : > { %v5615_v0 = vadd.f32 %v5600_v62, %v5489_v26  ;;  %v5491_v50 = vadd.f32 %v5480_v15, %v5361_v48 }
 0x9de   : > { %v5482_v47 = vpop.f32.mrf.mxu0  ;;  %v5602_v12 = vpop.f32.mrf.mxu1 }
 0x9df   : > { %v5616_v30 = vadd.f32 %v5602_v12, %v5490_v39  ;;  %v5492_v21 = vadd.f32 %v5482_v47, %v5365_v58 }
 0x9e0   : > { %v5714_v32 = vpop.f32.mrf.mxu0  ;;  %v5606_v38 = vpop.f32.mrf.mxu1 }
 0x9e1   : > { %v5737_v34 = vadd.f32 %v5714_v32, %v5611_v18  ;;  %v5617_v24 = vadd.f32 %v5606_v38, %v5491_v50 }
 0x9e2   : > { %v5716_v22 = vpop.f32.mrf.mxu0  ;;  %v5608_v40 = vpop.f32.mrf.mxu1 }
 0x9e3   : > { %v5738_v8 = vadd.f32 %v5716_v22, %v5612_v46  ;;  %v5618_v61 = vadd.f32 %v5608_v40, %v5492_v21 }
 0x9e4   : > { %v5720_v29 = vpop.f32.mrf.mxu0 }
 0x9e5   : > { %v5739_v54 = vadd.f32 %v5720_v29, %v5613_v3 }
 0x9e6   : > { %v5722_v43 = vpop.f32.mrf.mxu0 }
 0x9e7   : > { %v5740_v11 = vadd.f32 %v5722_v43, %v5614_v44 }
 0x9f2   : > { %v5840_v42 = vpop.f32.mrf.mxu1 }
 0x9f3   : > { %v5863_v52 = vadd.f32 %v5840_v42, %v5737_v34 }
 0x9f4   : > { %v5842_v45 = vpop.f32.mrf.mxu1 }
 0x9f5   : > { %5871 = vst [vmem:[%s7306_s26] sm:$0xff] %v5863_v52  ;;  %v5864_v57 = vadd.f32 %v5842_v45, %v5738_v8 }
 0x9f6   : > { %v5726_v51 = vpop.f32.mrf.mxu0  ;;  %v5846_v4 = vpop.f32.mrf.mxu1 }
 0x9f7   : > { %5872 = vst [vmem:[%s7306_s26 + $0x8] sm:$0xff] %v5864_v57  ;;  %v5865_v20 = vadd.f32 %v5846_v4, %v5739_v54  ;;  %v5741_v23 = vadd.f32 %v5726_v51, %v5615_v0 }
 0x9f8   : > { %v5728_v1 = vpop.f32.mrf.mxu0  ;;  %v5848_v13 = vpop.f32.mrf.mxu1 }
 0x9f9   : > { %5873 = vst [vmem:[%s7306_s26 + $0x10] sm:$0xff] %v5865_v20  ;;  %v5866_v41 = vadd.f32 %v5848_v13, %v5740_v11  ;;  %v5742_v17 = vadd.f32 %v5728_v1, %v5616_v30 }
 0x9fa   : > { %v5732_v59 = vpop.f32.mrf.mxu0  ;;  %v5852_v14 = vpop.f32.mrf.mxu1 }
 0x9fb   : > { %5874 = vst [vmem:[%s7306_s26 + $0x18] sm:$0xff] %v5866_v41  ;;  %v5867_v35 = vadd.f32 %v5852_v14, %v5741_v23  ;;  %v5743_v5 = vadd.f32 %v5732_v59, %v5617_v24 }
 0x9fc   : > { %v5734_v37 = vpop.f32.mrf.mxu0  ;;  %v5854_v27 = vpop.f32.mrf.mxu1 }
 0x9fd   : > { %5875 = vst [vmem:[%s7306_s26 + $0x20] sm:$0xff] %v5867_v35  ;;  %v5868_v9 = vadd.f32 %v5854_v27, %v5742_v17  ;;  %v5744_v63 = vadd.f32 %v5734_v37, %v5618_v61 }
 0x9fe   : > { %v5858_v10 = vpop.f32.mrf.mxu1 }
 0x9ff   : > { %5876 = vst [vmem:[%s7306_s26 + $0x28] sm:$0xff] %v5868_v9  ;;  %v5869_v25 = vadd.f32 %v5858_v10, %v5743_v5 }
 0xa00   : > { %v5860_v60 = vpop.f32.mrf.mxu1 }
 0xa01   : > { %5877 = vst [vmem:[%s7306_s26 + $0x30] sm:$0xff] %v5869_v25  ;;  %v5870_v16 = vadd.f32 %v5860_v60, %v5744_v63 }
 0xa03   : > { %5878 = vst [vmem:[%s7306_s26 + $0x38] sm:$0xff] %v5870_v16 }
 0xa04   : > { %6884 = shalt.err (!%p6881_p10)
}
 0xa05   : > { %s6885_s18 = scalar_lea.hbm %s8932_s27, 1024  ;;  %s6889_s17 = scalar_lea.hbm %s9067_s22, 4096 }
 0xa06   : > { %p6886_p1 = scmp.ne.s32.totalorder %s8932_s27, %s6885_s18  ;;  %p6890_p5 = scmp.lt.s32.totalorder %s8932_s27, %s9067_s22 }
 0xa07   : > { %p6891_p12 = scmp.lt.s32.totalorder %s6889_s17, %s6885_s18 }
 0xa08   : > { %p6887_p0 = pnand %p6886_p1, %p7242_p3 }
 0xa09   : > { %p6892_p6 = por %p6891_p12, %p6890_p5 }
 0xa0a   : > { %p6888_p7 = pneg %p6887_p0 }
 0xa0c   : > { %p6893_p9 = pnand %p6892_p6, %p6888_p7 }
 0xa0e   : > { %6896 = shalt.err (!%p6893_p9)
}
 0xa0f   : > { %s7023_s23 = smov 256   ;;  %s7024_s8 = smov 16  }
 0xa10   : > { %6481 = dma.vmem_to_hbm [thread:$0]  (%p7242_p3), %s8926_s15, 1024, %s8932_s27, %s8937_s16, %s7023_s23, %s7023_s23, %s7024_s8  }
 0xa11 PF: > { %p6518_p11 = scmp.ge.s32.totalorder %s7003_s19, 2  ;;  %s5911_s25 = sand.u32 1, %s6963_s30  }
 0xa12   : > { %s5912_s21 = scalar_lea.sflag [#allocation6], %s5911_s25 }
 0xa13   : > { %p6504_p13 = pnand %p6518_p11, %p7255_p8 }
 0xa15   : > { %p6505_p2 = pneg %p6504_p13 }
 0xa17   : > { %6958 = dma.done.wait (%p6505_p2), %s5912_s21, 1024  }
 0xa18   : > { %6960 = vsyncadd (%p6505_p2), %s5912_s21, 4294966272  ;;  %s28_s19 = sadd.s32 1, %s7003_s19   ;;  %s9068_s1 = sld [smem:[#allocation26_spill]] }
 0xa19   : > { %p25_p4 = scmp.ge.s32.totalorder %s28_s19, 6   ;;  %s9069_s15 = sld [smem:[#allocation22_spill]] }
 0xa1a   : > { %s9070_s16 = sld [smem:[#allocation23_spill]]  ;;  %s9073_s30 = smov %s6967_s10 }
 0xa1b   : > { %s9071_s17 = sld [smem:[#allocation24_spill]]  ;;  %s9074_s10 = smov %s6971_s11 }
 0xa1c   : > { %s9072_s18 = sld [smem:[#allocation25_spill]]  ;;  %s9075_s11 = smov %s7250_s3 }
 0xa1d   : > { %s9076_s12 = smov %s6979_s13  ;;  %s9077_s13 = smov %s6983_s14 }
 0xa1e   : > { %s9078_s14 = smov %s9068_s1  ;;  %27 = sbr.rel (!%p25_p4) target bundleno = 20 (0x14), region = 129 }
 0xa23   :  { %5917 = vsyncpa [#allocation5], 1 }
 0xa24   :  { %5919 = vsyncpa [#allocation5 + $0x1], 1 }
 0xa25   :  { %5920 = vsyncpa [#allocation8], 1 }
 0xa26   :  { %5921 = vsyncpa [#allocation11], 1 }
 0xa27   :  { %5922 = vsyncpa [#allocation14], 1 }
 0xa28   :  { %5923 = vsyncpa [#allocation6], 1 }
 0xa29   :  { %5925 = vsyncpa [#allocation6 + $0x1], 1 }

</bundles_post_ra>
